<compile_context>
chip_gen: v7x
topology: tpu7x:2x2x1
jax: 0.10.0
libtpu: 0.0.40
codegen_flags: <defaults>
</compile_context>

<pallas_src>
import math

import jax
import jax.numpy as jnp
from jax import lax
from jax.experimental import pallas as pl
from jax.experimental.pallas import tpu as pltpu

# ----------------------------- model config ---------------------------------
B = 2          # batch
L = 8          # sequence length
BL = B * L     # folded rows fed to the MXU
H = 32         # hidden size  (args.hidden_size)
NH = 2         # attention heads
DH = H // NH
F = 64         # FFN intermediate
V = 128        # vocab size (after resize_token_embeddings)
NL = 2         # transformer layers
NTYPE = 2      # token types
PMAX = L       # max positions
NTAB = V + PMAX + NTYPE   # stacked embedding table rows (138)
LN_EPS = 1e-12
NEG_INF = -1e9

# ----------------------- packed weight slab layout ---------------------------
# w32 slab (bf16, lane width H=32). All row offsets are multiples of 16 so the
# bf16 (16,128) tiling stays aligned for every static slice.
EMB_OFF = 0
EMB_ROWS = 144                      # NTAB=138 padded to a multiple of 16
LAYER_OFF = EMB_OFF + EMB_ROWS      # 144
WPL = 8 * H                         # per-layer: q,k,v,out,w1a,w1b,w2a,w2b
MLM_OFF = LAYER_OFF + NL * WPL      # 656
SEL_OFF = MLM_OFF + H               # 688
W32_ROWS = SEL_OFF + H              # 720

# vec slab (f32, (VEC_ROWS, 128)) -- one vector per row, zero padded to 128.
VEC_DEC_B = 0
VEC_EMB_LN_G = 1
VEC_EMB_LN_B = 2
VEC_MLM_B = 3
VEC_MLM_LN_G = 4
VEC_MLM_LN_B = 5
VEC_SEL_B = 6
VEC_LAYER0 = 8
VEC_PER_LAYER = 12    # q_b,k_b,v_b,out_b,ln1_g,ln1_b,b1a,b1b,b2,ln2_g,ln2_b,pad
VEC_ROWS = VEC_LAYER0 + NL * VEC_PER_LAYER   # 32


# ------------------------------ kernel math ----------------------------------
def _layer_norm(x, g, b):
  mu = jnp.mean(x, axis=-1, keepdims=True)
  var = jnp.mean((x - mu) ** 2, axis=-1, keepdims=True)
  return (x - mu) * lax.rsqrt(var + LN_EPS) * g + b


def _erf(x):
  # Abramowitz & Stegun 7.1.26 polynomial (|err| < 1.5e-7); the divide goes to
  # the EUP via pl.reciprocal(approx=True).
  p = 0.3275911
  a1, a2, a3, a4, a5 = (0.254829592, -0.284496736, 1.421413741,
                        -1.453152027, 1.061405429)
  sgn = jnp.where(x >= 0.0, 1.0, -1.0)
  z = jnp.abs(x)
  t = pl.reciprocal(1.0 + p * z, approx=True)
  poly = t * (a1 + t * (a2 + t * (a3 + t * (a4 + t * a5))))
  return sgn * (1.0 - poly * jnp.exp(-z * z))


def _gelu(x):
  # Exact (erf-based) GELU, matching HF BertForMaskedLM's "gelu" activation.
  return 0.5 * x * (1.0 + _erf(x * 0.7071067811865476))


def _bert_tower(ids, pos, typ, bias, vec_ref, w32_ref, dec_ref):
  """BERT encoder + MLM head on batch-folded (BL, H) activations.

  ids/pos/typ: (BL, 1) int32 values.  bias: (BL, BL) additive attention bias.
  Returns (last_hidden (BL,H) f32, mlm_logits (BL,V) f32).
  """
  f32 = jnp.float32
  bf16 = jnp.bfloat16

  def vrow(r, w=H):
    return vec_ref[r:r + 1, 0:w]

  # Fused embedding lookup: one stacked one-hot matmul (word | pos | type).
  iota = lax.broadcasted_iota(jnp.int32, (BL, EMB_ROWS), 1)
  onehot = ((iota == ids)
            | (iota == pos + V)
            | (iota == typ + V + PMAX)).astype(bf16)
  x = jnp.dot(onehot, w32_ref[EMB_OFF:EMB_OFF + EMB_ROWS, :],
              preferred_element_type=f32)
  x = _layer_norm(x, vrow(VEC_EMB_LN_G), vrow(VEC_EMB_LN_B))

  scale = 1.0 / math.sqrt(DH)
  for l in range(NL):
    wb = LAYER_OFF + l * WPL
    vb = VEC_LAYER0 + l * VEC_PER_LAYER
    xb = x.astype(bf16)

    q = jnp.dot(xb, w32_ref[wb + 0 * H:wb + 1 * H, :],
                preferred_element_type=f32) + vrow(vb + 0)
    k = jnp.dot(xb, w32_ref[wb + 1 * H:wb + 2 * H, :],
                preferred_element_type=f32) + vrow(vb + 1)
    v = jnp.dot(xb, w32_ref[wb + 2 * H:wb + 3 * H, :],
                preferred_element_type=f32) + vrow(vb + 2)

    # Per-head attention; context is folded back with out_w row-slices
    # (no lane-axis concatenation of the head outputs).
    attn = vrow(vb + 3)                                   # out_b (1, H)
    for h in range(NH):
      sl = slice(h * DH, (h + 1) * DH)
      scores = lax.dot_general(q[:, sl], k[:, sl], (((1,), (1,)), ((), ())),
                               preferred_element_type=f32) * scale + bias
      scores = scores - jnp.max(scores, axis=-1, keepdims=True)
      p = jnp.exp(scores)
      p = p * pl.reciprocal(jnp.sum(p, axis=-1, keepdims=True), approx=True)
      ctx = jnp.dot(p, v[:, sl], preferred_element_type=f32)       # (BL, DH)
      ow = w32_ref[wb + 3 * H + h * DH:wb + 3 * H + (h + 1) * DH, :]
      attn = attn + jnp.dot(ctx.astype(bf16), ow, preferred_element_type=f32)
    x = _layer_norm(x + attn, vrow(vb + 4), vrow(vb + 5))

    # FFN, blocked into two H-wide halves so every weight lives in the same
    # lane-32 slab (mathematically identical to the (H,F)/(F,H) matmuls).
    xb = x.astype(bf16)
    h_a = jnp.dot(xb, w32_ref[wb + 4 * H:wb + 5 * H, :],
                  preferred_element_type=f32) + vrow(vb + 6)
    h_b = jnp.dot(xb, w32_ref[wb + 5 * H:wb + 6 * H, :],
                  preferred_element_type=f32) + vrow(vb + 7)
    ff = (jnp.dot(_gelu(h_a).astype(bf16), w32_ref[wb + 6 * H:wb + 7 * H, :],
                  preferred_element_type=f32)
          + jnp.dot(_gelu(h_b).astype(bf16), w32_ref[wb + 7 * H:wb + 8 * H, :],
                    preferred_element_type=f32)
          + vrow(vb + 8))
    x = _layer_norm(x + ff, vrow(vb + 9), vrow(vb + 10))

  # MLM head: transform -> exact GELU -> LN -> tied decoder (pre-transposed).
  t = (jnp.dot(x.astype(bf16), w32_ref[MLM_OFF:MLM_OFF + H, :],
               preferred_element_type=f32) + vrow(VEC_MLM_B))
  t = _gelu(t)
  t = _layer_norm(t, vrow(VEC_MLM_LN_G), vrow(VEC_MLM_LN_B))
  logits = (jnp.dot(t.astype(bf16), dec_ref[...], preferred_element_type=f32)
            + vec_ref[VEC_DEC_B:VEC_DEC_B + 1, :])
  return x, logits


# ------------------------------- fused kernel --------------------------------
def pipeline_kernel(tok_ref, bias_ref, vec_ref, w32_ref, dec_ref,
                    det_logits_ref, sel_logits_ref, misc_ref):
  f32 = jnp.float32
  bf16 = jnp.bfloat16

  det_bias = bias_ref[0]            # (BL, BL)
  sel_bias = bias_ref[1]            # (BL, BL)

  # ---------------- detector tower ----------------
  ids = tok_ref[:, 0:1]
  pos = tok_ref[:, 1:2]
  typ = tok_ref[:, 2:3]
  _, det_logits = _bert_tower(ids, pos, typ, det_bias, vec_ref, w32_ref,
                              dec_ref)
  det_logits_ref[...] = det_logits

  # ---------------- inter-tower glue (tensor part) ----------------
  # det_predicts = argmax(softmax(logits)) == argmax(logits); first-index tie
  # break done with max + masked-iota min (lowers with plain max/min/where).
  mx = jnp.max(det_logits, axis=-1, keepdims=True)
  lane_f = lax.broadcasted_iota(jnp.int32, (BL, V), 1).astype(f32)
  new_ids_f = jnp.min(jnp.where(det_logits >= mx, lane_f, float(V)),
                      axis=-1, keepdims=True)              # (BL, 1)
  new_ids = new_ids_f.astype(jnp.int32)

  # ---------------- selector tower ----------------
  npos = tok_ref[:, 3:4]
  ntyp = tok_ref[:, 4:5]
  x_sel, sel_logits = _bert_tower(new_ids, npos, ntyp, sel_bias, vec_ref,
                                  w32_ref, dec_ref)
  sel_logits_ref[...] = sel_logits

  # Fused: select_logits = selector_linear(hidden) * select_masks[:, :, None]
  sel = (jnp.dot(x_sel.astype(bf16), w32_ref[SEL_OFF:SEL_OFF + H, :],
                 preferred_element_type=f32)
         + vec_ref[VEC_SEL_B:VEC_SEL_B + 1, 0:H])
  sel = sel * tok_ref[:, 5:6].astype(f32)

  # Lane-dense packed misc output: [hidden | sel_logits(pad 32) | new_ids | 0].
  misc_ref[...] = jnp.zeros_like(misc_ref)
  misc_ref[:, 0:H] = x_sel
  misc_ref[:, H:2 * H] = sel
  misc_ref[:, 2 * H:2 * H + 1] = new_ids_f


# ----------------------------- pallas wrapper ---------------------------------
def _vmem():
  return pl.BlockSpec(memory_space=pltpu.MemorySpace.VMEM)


def detec_select_pipeline(inputs, vec_slab, w32_slab, dec_slab):
  """Full pipeline: detector -> (synthetic glue) -> selector, one pallas_call."""
  input_ids = inputs["input_ids"].astype(jnp.int32)
  position_ids = inputs["position_ids"].astype(jnp.int32)
  token_type_ids = inputs["token_type_ids"].astype(jnp.int32)
  attention_mask = inputs["attention_mask"].astype(jnp.float32)

  # TODO(synk): tokenizer / candidate-dictionary string processing
  # (process_detect_logits_for_single_item tail + sighan_error_correct_prompt)
  # has no Pallas/tensor equivalent; the selector-side position/type/select
  # masks are deterministic synthetic tensors (new input ids still come from
  # the detector argmax, computed inside the kernel).
  new_position_ids = jnp.broadcast_to(jnp.arange(L, dtype=jnp.int32), (B, L))
  new_token_type_ids = jnp.zeros((B, L), jnp.int32)
  lane = jnp.arange(L)
  select_masks = jnp.broadcast_to(((lane >= 3) & (lane < 6)).astype(jnp.int32),
                                  (B, L))

  tok = jnp.stack(
      [input_ids.reshape(BL), position_ids.reshape(BL),
       token_type_ids.reshape(BL), new_position_ids.reshape(BL),
       new_token_type_ids.reshape(BL), select_masks.reshape(BL),
       jnp.zeros((BL,), jnp.int32), jnp.zeros((BL,), jnp.int32)], axis=1)

  # Additive attention biases: block-diagonal over the folded batch, plus the
  # detector key mask. The selector's synthetic attention_mask is all ones.
  batch_idx = jnp.repeat(jnp.arange(B, dtype=jnp.int32), L)
  same_batch = (batch_idx[:, None] == batch_idx[None, :]).astype(jnp.float32)
  det_bias = (1.0 - same_batch * attention_mask.reshape(1, BL)) * NEG_INF
  sel_bias = (1.0 - same_batch) * NEG_INF
  bias = jnp.stack([det_bias, sel_bias], axis=0)          # (2, BL, BL)

  det_logits, sel_logits, misc = pl.pallas_call(
      pipeline_kernel,
      out_shape=(jax.ShapeDtypeStruct((BL, V), jnp.float32),
                 jax.ShapeDtypeStruct((BL, V), jnp.float32),
                 jax.ShapeDtypeStruct((BL, V), jnp.float32)),
      in_specs=[_vmem() for _ in range(5)],
      out_specs=(_vmem(), _vmem(), _vmem()),
  )(tok, bias, vec_slab, w32_slab, dec_slab)

  hidden = misc[:, 0:H].reshape(B, L, H)
  select_logits = misc[:, H:H + 2].reshape(B, L, 2)
  new_input_ids = misc[:, 2 * H].astype(jnp.int32).reshape(B, L)

  select_labels = (new_input_ids % 2) * select_masks
  correct_labels = new_input_ids

  detector_encoded = {"logits": det_logits.reshape(B, L, V)}
  selector_encoded = {"logits": sel_logits.reshape(B, L, V),
                      "hidden_states": hidden}
  return (select_logits, detector_encoded, selector_encoded,
          select_labels, correct_labels)


# ---------------------------- deterministic init ------------------------------
def init_bert_params(key):
  ks = jax.random.split(key, 8)

  def nrm(k, shape, s=0.02):
    return jax.random.normal(k, shape, jnp.float32) * s

  return {
      "word_emb": nrm(ks[0], (V, H)),
      "pos_emb": nrm(ks[1], (PMAX, H)),
      "type_emb": nrm(ks[2], (NTYPE, H)),
      "emb_ln_g": jnp.ones((H,), jnp.float32),
      "emb_ln_b": jnp.zeros((H,), jnp.float32),
      "qkv_w": nrm(ks[3], (NL, H, 3 * H)),
      "qkv_b": jnp.zeros((NL, 3 * H), jnp.float32),
      "out_w": nrm(ks[4], (NL, H, H)),
      "out_b": jnp.zeros((NL, H), jnp.float32),
      "ln1_g": jnp.ones((NL, H), jnp.float32),
      "ln1_b": jnp.zeros((NL, H), jnp.float32),
      "ffn_w1": nrm(ks[5], (NL, H, F)),
      "ffn_b1": jnp.zeros((NL, F), jnp.float32),
      "ffn_w2": nrm(ks[6], (NL, F, H)),
      "ffn_b2": jnp.zeros((NL, H), jnp.float32),
      "ln2_g": jnp.ones((NL, H), jnp.float32),
      "ln2_b": jnp.zeros((NL, H), jnp.float32),
      "mlm_w": nrm(ks[7], (H, H)),
      "mlm_b": jnp.zeros((H,), jnp.float32),
      "mlm_ln_g": jnp.ones((H,), jnp.float32),
      "mlm_ln_b": jnp.zeros((H,), jnp.float32),
      "dec_b": jnp.zeros((V,), jnp.float32),
  }


def pack_params(p, sel_lin_w, sel_lin_b):
  """Pack everything into 3 slabs (packed once, host-side, outside jit)."""
  f32 = jnp.float32

  vec = jnp.zeros((VEC_ROWS, 128), f32)
  vec = vec.at[VEC_DEC_B, 0:V].set(p["dec_b"])
  vec = vec.at[VEC_EMB_LN_G, 0:H].set(p["emb_ln_g"])
  vec = vec.at[VEC_EMB_LN_B, 0:H].set(p["emb_ln_b"])
  vec = vec.at[VEC_MLM_B, 0:H].set(p["mlm_b"])
  vec = vec.at[VEC_MLM_LN_G, 0:H].set(p["mlm_ln_g"])
  vec = vec.at[VEC_MLM_LN_B, 0:H].set(p["mlm_ln_b"])
  vec = vec.at[VEC_SEL_B, 0:2].set(sel_lin_b.reshape(-1))
  for l in range(NL):
    r = VEC_LAYER0 + l * VEC_PER_LAYER
    vec = vec.at[r + 0, 0:H].set(p["qkv_b"][l, 0:H])
    vec = vec.at[r + 1, 0:H].set(p["qkv_b"][l, H:2 * H])
    vec = vec.at[r + 2, 0:H].set(p["qkv_b"][l, 2 * H:3 * H])
    vec = vec.at[r + 3, 0:H].set(p["out_b"][l])
    vec = vec.at[r + 4, 0:H].set(p["ln1_g"][l])
    vec = vec.at[r + 5, 0:H].set(p["ln1_b"][l])
    vec = vec.at[r + 6, 0:H].set(p["ffn_b1"][l, 0:H])
    vec = vec.at[r + 7, 0:H].set(p["ffn_b1"][l, H:F])
    vec = vec.at[r + 8, 0:H].set(p["ffn_b2"][l])
    vec = vec.at[r + 9, 0:H].set(p["ln2_g"][l])
    vec = vec.at[r + 10, 0:H].set(p["ln2_b"][l])

  w32 = jnp.zeros((W32_ROWS, H), f32)
  emb_tab = jnp.concatenate([p["word_emb"], p["pos_emb"], p["type_emb"]], 0)
  w32 = w32.at[EMB_OFF:EMB_OFF + NTAB, :].set(emb_tab)
  for l in range(NL):
    wb = LAYER_OFF + l * WPL
    w32 = w32.at[wb + 0 * H:wb + 1 * H].set(p["qkv_w"][l][:, 0:H])
    w32 = w32.at[wb + 1 * H:wb + 2 * H].set(p["qkv_w"][l][:, H:2 * H])
    w32 = w32.at[wb + 2 * H:wb + 3 * H].set(p["qkv_w"][l][:, 2 * H:3 * H])
    w32 = w32.at[wb + 3 * H:wb + 4 * H].set(p["out_w"][l])
    w32 = w32.at[wb + 4 * H:wb + 5 * H].set(p["ffn_w1"][l][:, 0:H])
    w32 = w32.at[wb + 5 * H:wb + 6 * H].set(p["ffn_w1"][l][:, H:F])
    w32 = w32.at[wb + 6 * H:wb + 7 * H].set(p["ffn_w2"][l][0:H, :])
    w32 = w32.at[wb + 7 * H:wb + 8 * H].set(p["ffn_w2"][l][H:F, :])
  w32 = w32.at[MLM_OFF:MLM_OFF + H].set(p["mlm_w"])
  w32 = w32.at[SEL_OFF:SEL_OFF + H, 0:2].set(sel_lin_w)
  w32 = w32.astype(jnp.bfloat16)

  dec = p["word_emb"].T.astype(jnp.bfloat16)   # (H, V) pre-transposed decoder

  return vec, w32, dec


# --------------------------------- main ---------------------------------------
if __name__ == "__main__":
  key = jax.random.PRNGKey(0)
  kparam, kin, ksel = jax.random.split(key, 3)

  bert_params = init_bert_params(kparam)
  sel_lin_w = jax.random.normal(ksel, (H, 2), jnp.float32) * 0.02
  sel_lin_b = jnp.zeros((2,), jnp.float32)

  # args['share_param'] = True -> selector shares the detector parameters:
  # one packed slab set, loaded into VMEM exactly once by the fused kernel.
  vec_slab, w32_slab, dec_slab = pack_params(bert_params, sel_lin_w, sel_lin_b)

  input_ids = jax.random.randint(kin, (B, L), 0, V, dtype=jnp.int32)
  token_type_ids = jnp.zeros((B, L), jnp.int32)
  position_ids = jnp.broadcast_to(jnp.arange(L, dtype=jnp.int32), (B, L))
  attention_mask = jnp.ones((B, L), jnp.float32).at[1, L - 2:].set(0.0)

  inputs = {
      "input_ids": input_ids,
      "token_type_ids": token_type_ids,
      "position_ids": position_ids,
      "attention_mask": attention_mask,
  }

  pipeline = jax.jit(detec_select_pipeline)
  outs = pipeline(inputs, vec_slab, w32_slab, dec_slab)
  (select_logits, detector_encoded, selector_encoded,
   select_labels, correct_labels) = outs

  jax.block_until_ready(select_logits)
  jax.block_until_ready(detector_encoded["logits"])
  jax.block_until_ready(selector_encoded["hidden_states"])

  assert select_logits.shape == (B, L, 2)
  assert detector_encoded["logits"].shape == (B, L, V)
  assert selector_encoded["logits"].shape == (B, L, V)
  assert selector_encoded["hidden_states"].shape == (B, L, H)
  assert select_labels.shape == (B, L)
  assert correct_labels.shape == (B, L)
  assert bool(jnp.all(jnp.isfinite(select_logits)))
  assert bool(jnp.all(jnp.isfinite(detector_encoded["logits"])))
  assert bool(jnp.all(jnp.isfinite(selector_encoded["logits"])))
  assert bool(jnp.all((correct_labels >= 0) & (correct_labels < V)))
  print("KERNEL_OK")
</pallas_src>

<mosaic_0001>
module attributes {stable_mosaic.version = 11 : i64} {
  func.func @pipeline_kernel(%arg0: memref<16x8xi32, #tpu.memory_space<vmem>>, %arg1: memref<2x16x16xf32, #tpu.memory_space<vmem>>, %arg2: memref<32x128xf32, #tpu.memory_space<vmem>>, %arg3: memref<720x32xbf16, #tpu.memory_space<vmem>>, %arg4: memref<32x128xbf16, #tpu.memory_space<vmem>>, %arg5: memref<16x128xf32, #tpu.memory_space<vmem>>, %arg6: memref<16x128xf32, #tpu.memory_space<vmem>>, %arg7: memref<16x128xf32, #tpu.memory_space<vmem>>) attributes {dimension_semantics = [], scalar_prefetch = 0 : i64, scratch_operands = 0 : i64, tpu.core_type = #tpu.core_type<tc>} {
    %c0 = arith.constant 0 : index
    %c0_0 = arith.constant 0 : index
    %c0_1 = arith.constant 0 : index
    %0 = vector.load %arg1[%c0, %c0_0, %c0_1] : memref<2x16x16xf32, #tpu.memory_space<vmem>>, vector<1x16x16xf32>
    %1 = vector.shape_cast %0 : vector<1x16x16xf32> to vector<16x16xf32>
    %c1 = arith.constant 1 : index
    %c0_2 = arith.constant 0 : index
    %c0_3 = arith.constant 0 : index
    %2 = vector.load %arg1[%c1, %c0_2, %c0_3] : memref<2x16x16xf32, #tpu.memory_space<vmem>>, vector<1x16x16xf32>
    %3 = vector.shape_cast %2 : vector<1x16x16xf32> to vector<16x16xf32>
    %c0_4 = arith.constant 0 : index
    %c0_5 = arith.constant 0 : index
    %4 = vector.load %arg0[%c0_4, %c0_5] : memref<16x8xi32, #tpu.memory_space<vmem>>, vector<16x1xi32>
    %c0_6 = arith.constant 0 : index
    %c1_7 = arith.constant 1 : index
    %5 = vector.load %arg0[%c0_6, %c1_7] : memref<16x8xi32, #tpu.memory_space<vmem>>, vector<16x1xi32>
    %c0_8 = arith.constant 0 : index
    %c2 = arith.constant 2 : index
    %6 = vector.load %arg0[%c0_8, %c2] : memref<16x8xi32, #tpu.memory_space<vmem>>, vector<16x1xi32>
    %7 = tpu.iota {dimensions = array<i32: 1>} : vector<16x144xi32>
    %8 = vector.broadcast %4 : vector<16x1xi32> to vector<16x144xi32>
    %9 = arith.cmpi eq, %7, %8 : vector<16x144xi32>
    %c128_i32 = arith.constant 128 : i32
    %10 = vector.broadcast %c128_i32 : i32 to vector<16x1xi32>
    %11 = arith.addi %5, %10 : vector<16x1xi32>
    %12 = vector.broadcast %11 : vector<16x1xi32> to vector<16x144xi32>
    %13 = arith.cmpi eq, %7, %12 : vector<16x144xi32>
    %14 = arith.ori %9, %13 : vector<16x144xi1>
    %c128_i32_9 = arith.constant 128 : i32
    %15 = vector.broadcast %c128_i32_9 : i32 to vector<16x1xi32>
    %16 = arith.addi %6, %15 : vector<16x1xi32>
    %c8_i32 = arith.constant 8 : i32
    %17 = vector.broadcast %c8_i32 : i32 to vector<16x1xi32>
    %18 = arith.addi %16, %17 : vector<16x1xi32>
    %19 = vector.broadcast %18 : vector<16x1xi32> to vector<16x144xi32>
    %20 = arith.cmpi eq, %7, %19 : vector<16x144xi32>
    %21 = arith.ori %14, %20 : vector<16x144xi1>
    %22 = arith.extui %21 : vector<16x144xi1> to vector<16x144xi32>
    %23 = arith.sitofp %22 : vector<16x144xi32> to vector<16x144xf32>
    %24 = arith.truncf %23 : vector<16x144xf32> to vector<16x144xbf16>
    %c0_10 = arith.constant 0 : index
    %c0_11 = arith.constant 0 : index
    %25 = vector.load %arg3[%c0_10, %c0_11] : memref<720x32xbf16, #tpu.memory_space<vmem>>, vector<144x32xbf16>
    %cst = arith.constant dense<0.000000e+00> : vector<16x32xf32>
    %26 = tpu.matmul %24, %25, %cst {dimension_numbers = #tpu.dot_dimension_numbers<[1], [0], [0], [1], [0, 0, 1, 1], [], []>} : vector<16x144xbf16>, vector<144x32xbf16>, vector<16x32xf32> -> vector<16x32xf32>
    %c1_12 = arith.constant 1 : index
    %c0_13 = arith.constant 0 : index
    %27 = vector.load %arg2[%c1_12, %c0_13] : memref<32x128xf32, #tpu.memory_space<vmem>>, vector<1x32xf32>
    %c2_14 = arith.constant 2 : index
    %c0_15 = arith.constant 0 : index
    %28 = vector.load %arg2[%c2_14, %c0_15] : memref<32x128xf32, #tpu.memory_space<vmem>>, vector<1x32xf32>
    %cst_16 = arith.constant dense<0.000000e+00> : vector<16xf32>
    %29 = vector.multi_reduction <add>, %26, %cst_16 [1] : vector<16x32xf32> to vector<16xf32>
    %30 = vector.shape_cast %29 : vector<16xf32> to vector<16x1xf32>
    %cst_17 = arith.constant 3.200000e+01 : f32
    %31 = vector.broadcast %cst_17 : f32 to vector<16x1xf32>
    %32 = arith.divf %30, %31 : vector<16x1xf32>
    %33 = vector.broadcast %32 : vector<16x1xf32> to vector<16x32xf32>
    %34 = arith.subf %26, %33 : vector<16x32xf32>
    %35 = arith.mulf %34, %34 : vector<16x32xf32>
    %cst_18 = arith.constant dense<0.000000e+00> : vector<16xf32>
    %36 = vector.multi_reduction <add>, %35, %cst_18 [1] : vector<16x32xf32> to vector<16xf32>
    %37 = vector.shape_cast %36 : vector<16xf32> to vector<16x1xf32>
    %cst_19 = arith.constant 3.200000e+01 : f32
    %38 = vector.broadcast %cst_19 : f32 to vector<16x1xf32>
    %39 = arith.divf %37, %38 : vector<16x1xf32>
    %40 = vector.broadcast %32 : vector<16x1xf32> to vector<16x32xf32>
    %41 = arith.subf %26, %40 : vector<16x32xf32>
    %cst_20 = arith.constant 9.99999996E-13 : f32
    %42 = vector.broadcast %cst_20 : f32 to vector<16x1xf32>
    %43 = arith.addf %39, %42 : vector<16x1xf32>
    %44 = math.rsqrt %43 : vector<16x1xf32>
    %45 = vector.broadcast %44 : vector<16x1xf32> to vector<16x32xf32>
    %46 = arith.mulf %41, %45 : vector<16x32xf32>
    %47 = vector.broadcast %27 : vector<1x32xf32> to vector<16x32xf32>
    %48 = arith.mulf %46, %47 : vector<16x32xf32>
    %49 = vector.broadcast %28 : vector<1x32xf32> to vector<16x32xf32>
    %50 = arith.addf %48, %49 : vector<16x32xf32>
    %51 = arith.truncf %50 : vector<16x32xf32> to vector<16x32xbf16>
    %c144 = arith.constant 144 : index
    %c0_21 = arith.constant 0 : index
    %52 = vector.load %arg3[%c144, %c0_21] : memref<720x32xbf16, #tpu.memory_space<vmem>>, vector<32x32xbf16>
    %cst_22 = arith.constant dense<0.000000e+00> : vector<16x32xf32>
    %53 = tpu.matmul %51, %52, %cst_22 {dimension_numbers = #tpu.dot_dimension_numbers<[1], [0], [0], [1], [0, 0, 1, 1], [], []>} : vector<16x32xbf16>, vector<32x32xbf16>, vector<16x32xf32> -> vector<16x32xf32>
    %c8 = arith.constant 8 : index
    %c0_23 = arith.constant 0 : index
    %54 = vector.load %arg2[%c8, %c0_23] : memref<32x128xf32, #tpu.memory_space<vmem>>, vector<1x32xf32>
    %55 = vector.broadcast %54 : vector<1x32xf32> to vector<16x32xf32>
    %56 = arith.addf %53, %55 : vector<16x32xf32>
    %c176 = arith.constant 176 : index
    %c0_24 = arith.constant 0 : index
    %57 = vector.load %arg3[%c176, %c0_24] : memref<720x32xbf16, #tpu.memory_space<vmem>>, vector<32x32xbf16>
    %cst_25 = arith.constant dense<0.000000e+00> : vector<16x32xf32>
    %58 = tpu.matmul %51, %57, %cst_25 {dimension_numbers = #tpu.dot_dimension_numbers<[1], [0], [0], [1], [0, 0, 1, 1], [], []>} : vector<16x32xbf16>, vector<32x32xbf16>, vector<16x32xf32> -> vector<16x32xf32>
    %c9 = arith.constant 9 : index
    %c0_26 = arith.constant 0 : index
    %59 = vector.load %arg2[%c9, %c0_26] : memref<32x128xf32, #tpu.memory_space<vmem>>, vector<1x32xf32>
    %60 = vector.broadcast %59 : vector<1x32xf32> to vector<16x32xf32>
    %61 = arith.addf %58, %60 : vector<16x32xf32>
    %c208 = arith.constant 208 : index
    %c0_27 = arith.constant 0 : index
    %62 = vector.load %arg3[%c208, %c0_27] : memref<720x32xbf16, #tpu.memory_space<vmem>>, vector<32x32xbf16>
    %cst_28 = arith.constant dense<0.000000e+00> : vector<16x32xf32>
    %63 = tpu.matmul %51, %62, %cst_28 {dimension_numbers = #tpu.dot_dimension_numbers<[1], [0], [0], [1], [0, 0, 1, 1], [], []>} : vector<16x32xbf16>, vector<32x32xbf16>, vector<16x32xf32> -> vector<16x32xf32>
    %c10 = arith.constant 10 : index
    %c0_29 = arith.constant 0 : index
    %64 = vector.load %arg2[%c10, %c0_29] : memref<32x128xf32, #tpu.memory_space<vmem>>, vector<1x32xf32>
    %65 = vector.broadcast %64 : vector<1x32xf32> to vector<16x32xf32>
    %66 = arith.addf %63, %65 : vector<16x32xf32>
    %c11 = arith.constant 11 : index
    %c0_30 = arith.constant 0 : index
    %67 = vector.load %arg2[%c11, %c0_30] : memref<32x128xf32, #tpu.memory_space<vmem>>, vector<1x32xf32>
    %68 = vector.extract_strided_slice %56 {offsets = [0, 0], sizes = [16, 16], strides = [1, 1]} : vector<16x32xf32> to vector<16x16xf32>
    %69 = vector.extract_strided_slice %61 {offsets = [0, 0], sizes = [16, 16], strides = [1, 1]} : vector<16x32xf32> to vector<16x16xf32>
    %cst_31 = arith.constant dense<0.000000e+00> : vector<16x16xf32>
    %70 = tpu.matmul %68, %69, %cst_31 {dimension_numbers = #tpu.dot_dimension_numbers<[1], [1], [0], [0], [0, 0, 1, 0], [], []>} : vector<16x16xf32>, vector<16x16xf32>, vector<16x16xf32> -> vector<16x16xf32>
    %cst_32 = arith.constant 2.500000e-01 : f32
    %71 = vector.broadcast %cst_32 : f32 to vector<16x16xf32>
    %72 = arith.mulf %70, %71 : vector<16x16xf32>
    %73 = arith.addf %72, %1 : vector<16x16xf32>
    %cst_33 = arith.constant dense<0xFF800000> : vector<16xf32>
    %74 = vector.multi_reduction <maximumf>, %73, %cst_33 [1] : vector<16x16xf32> to vector<16xf32>
    %75 = vector.shape_cast %74 : vector<16xf32> to vector<16x1xf32>
    %76 = vector.broadcast %75 : vector<16x1xf32> to vector<16x16xf32>
    %77 = arith.subf %73, %76 : vector<16x16xf32>
    %78 = math.exp %77 : vector<16x16xf32>
    %cst_34 = arith.constant dense<0.000000e+00> : vector<16xf32>
    %79 = vector.multi_reduction <add>, %78, %cst_34 [1] : vector<16x16xf32> to vector<16xf32>
    %80 = vector.shape_cast %79 : vector<16xf32> to vector<16x1xf32>
    %81 = tpu.reciprocal %80 {approx = true} : vector<16x1xf32> -> vector<16x1xf32>
    %82 = vector.broadcast %81 : vector<16x1xf32> to vector<16x16xf32>
    %83 = arith.mulf %78, %82 : vector<16x16xf32>
    %84 = vector.extract_strided_slice %66 {offsets = [0, 0], sizes = [16, 16], strides = [1, 1]} : vector<16x32xf32> to vector<16x16xf32>
    %cst_35 = arith.constant dense<0.000000e+00> : vector<16x16xf32>
    %85 = tpu.matmul %83, %84, %cst_35 {dimension_numbers = #tpu.dot_dimension_numbers<[1], [0], [0], [1], [0, 0, 1, 1], [], []>} : vector<16x16xf32>, vector<16x16xf32>, vector<16x16xf32> -> vector<16x16xf32>
    %c240 = arith.constant 240 : index
    %c0_36 = arith.constant 0 : index
    %86 = vector.load %arg3[%c240, %c0_36] : memref<720x32xbf16, #tpu.memory_space<vmem>>, vector<16x32xbf16>
    %87 = arith.truncf %85 : vector<16x16xf32> to vector<16x16xbf16>
    %cst_37 = arith.constant dense<0.000000e+00> : vector<16x32xf32>
    %88 = tpu.matmul %87, %86, %cst_37 {dimension_numbers = #tpu.dot_dimension_numbers<[1], [0], [0], [1], [0, 0, 1, 1], [], []>} : vector<16x16xbf16>, vector<16x32xbf16>, vector<16x32xf32> -> vector<16x32xf32>
    %89 = vector.broadcast %67 : vector<1x32xf32> to vector<16x32xf32>
    %90 = arith.addf %89, %88 : vector<16x32xf32>
    %91 = vector.extract_strided_slice %56 {offsets = [0, 16], sizes = [16, 16], strides = [1, 1]} : vector<16x32xf32> to vector<16x16xf32>
    %92 = vector.extract_strided_slice %61 {offsets = [0, 16], sizes = [16, 16], strides = [1, 1]} : vector<16x32xf32> to vector<16x16xf32>
    %cst_38 = arith.constant dense<0.000000e+00> : vector<16x16xf32>
    %93 = tpu.matmul %91, %92, %cst_38 {dimension_numbers = #tpu.dot_dimension_numbers<[1], [1], [0], [0], [0, 0, 1, 0], [], []>} : vector<16x16xf32>, vector<16x16xf32>, vector<16x16xf32> -> vector<16x16xf32>
    %cst_39 = arith.constant 2.500000e-01 : f32
    %94 = vector.broadcast %cst_39 : f32 to vector<16x16xf32>
    %95 = arith.mulf %93, %94 : vector<16x16xf32>
    %96 = arith.addf %95, %1 : vector<16x16xf32>
    %cst_40 = arith.constant dense<0xFF800000> : vector<16xf32>
    %97 = vector.multi_reduction <maximumf>, %96, %cst_40 [1] : vector<16x16xf32> to vector<16xf32>
    %98 = vector.shape_cast %97 : vector<16xf32> to vector<16x1xf32>
    %99 = vector.broadcast %98 : vector<16x1xf32> to vector<16x16xf32>
    %100 = arith.subf %96, %99 : vector<16x16xf32>
    %101 = math.exp %100 : vector<16x16xf32>
    %cst_41 = arith.constant dense<0.000000e+00> : vector<16xf32>
    %102 = vector.multi_reduction <add>, %101, %cst_41 [1] : vector<16x16xf32> to vector<16xf32>
    %103 = vector.shape_cast %102 : vector<16xf32> to vector<16x1xf32>
    %104 = tpu.reciprocal %103 {approx = true} : vector<16x1xf32> -> vector<16x1xf32>
    %105 = vector.broadcast %104 : vector<16x1xf32> to vector<16x16xf32>
    %106 = arith.mulf %101, %105 : vector<16x16xf32>
    %107 = vector.extract_strided_slice %66 {offsets = [0, 16], sizes = [16, 16], strides = [1, 1]} : vector<16x32xf32> to vector<16x16xf32>
    %cst_42 = arith.constant dense<0.000000e+00> : vector<16x16xf32>
    %108 = tpu.matmul %106, %107, %cst_42 {dimension_numbers = #tpu.dot_dimension_numbers<[1], [0], [0], [1], [0, 0, 1, 1], [], []>} : vector<16x16xf32>, vector<16x16xf32>, vector<16x16xf32> -> vector<16x16xf32>
    %c256 = arith.constant 256 : index
    %c0_43 = arith.constant 0 : index
    %109 = vector.load %arg3[%c256, %c0_43] : memref<720x32xbf16, #tpu.memory_space<vmem>>, vector<16x32xbf16>
    %110 = arith.truncf %108 : vector<16x16xf32> to vector<16x16xbf16>
    %cst_44 = arith.constant dense<0.000000e+00> : vector<16x32xf32>
    %111 = tpu.matmul %110, %109, %cst_44 {dimension_numbers = #tpu.dot_dimension_numbers<[1], [0], [0], [1], [0, 0, 1, 1], [], []>} : vector<16x16xbf16>, vector<16x32xbf16>, vector<16x32xf32> -> vector<16x32xf32>
    %112 = arith.addf %90, %111 : vector<16x32xf32>
    %113 = arith.addf %50, %112 : vector<16x32xf32>
    %c12 = arith.constant 12 : index
    %c0_45 = arith.constant 0 : index
    %114 = vector.load %arg2[%c12, %c0_45] : memref<32x128xf32, #tpu.memory_space<vmem>>, vector<1x32xf32>
    %c13 = arith.constant 13 : index
    %c0_46 = arith.constant 0 : index
    %115 = vector.load %arg2[%c13, %c0_46] : memref<32x128xf32, #tpu.memory_space<vmem>>, vector<1x32xf32>
    %cst_47 = arith.constant dense<0.000000e+00> : vector<16xf32>
    %116 = vector.multi_reduction <add>, %113, %cst_47 [1] : vector<16x32xf32> to vector<16xf32>
    %117 = vector.shape_cast %116 : vector<16xf32> to vector<16x1xf32>
    %cst_48 = arith.constant 3.200000e+01 : f32
    %118 = vector.broadcast %cst_48 : f32 to vector<16x1xf32>
    %119 = arith.divf %117, %118 : vector<16x1xf32>
    %120 = vector.broadcast %119 : vector<16x1xf32> to vector<16x32xf32>
    %121 = arith.subf %113, %120 : vector<16x32xf32>
    %122 = arith.mulf %121, %121 : vector<16x32xf32>
    %cst_49 = arith.constant dense<0.000000e+00> : vector<16xf32>
    %123 = vector.multi_reduction <add>, %122, %cst_49 [1] : vector<16x32xf32> to vector<16xf32>
    %124 = vector.shape_cast %123 : vector<16xf32> to vector<16x1xf32>
    %cst_50 = arith.constant 3.200000e+01 : f32
    %125 = vector.broadcast %cst_50 : f32 to vector<16x1xf32>
    %126 = arith.divf %124, %125 : vector<16x1xf32>
    %127 = vector.broadcast %119 : vector<16x1xf32> to vector<16x32xf32>
    %128 = arith.subf %113, %127 : vector<16x32xf32>
    %cst_51 = arith.constant 9.99999996E-13 : f32
    %129 = vector.broadcast %cst_51 : f32 to vector<16x1xf32>
    %130 = arith.addf %126, %129 : vector<16x1xf32>
    %131 = math.rsqrt %130 : vector<16x1xf32>
    %132 = vector.broadcast %131 : vector<16x1xf32> to vector<16x32xf32>
    %133 = arith.mulf %128, %132 : vector<16x32xf32>
    %134 = vector.broadcast %114 : vector<1x32xf32> to vector<16x32xf32>
    %135 = arith.mulf %133, %134 : vector<16x32xf32>
    %136 = vector.broadcast %115 : vector<1x32xf32> to vector<16x32xf32>
    %137 = arith.addf %135, %136 : vector<16x32xf32>
    %138 = arith.truncf %137 : vector<16x32xf32> to vector<16x32xbf16>
    %c272 = arith.constant 272 : index
    %c0_52 = arith.constant 0 : index
    %139 = vector.load %arg3[%c272, %c0_52] : memref<720x32xbf16, #tpu.memory_space<vmem>>, vector<32x32xbf16>
    %cst_53 = arith.constant dense<0.000000e+00> : vector<16x32xf32>
    %140 = tpu.matmul %138, %139, %cst_53 {dimension_numbers = #tpu.dot_dimension_numbers<[1], [0], [0], [1], [0, 0, 1, 1], [], []>} : vector<16x32xbf16>, vector<32x32xbf16>, vector<16x32xf32> -> vector<16x32xf32>
    %c14 = arith.constant 14 : index
    %c0_54 = arith.constant 0 : index
    %141 = vector.load %arg2[%c14, %c0_54] : memref<32x128xf32, #tpu.memory_space<vmem>>, vector<1x32xf32>
    %142 = vector.broadcast %141 : vector<1x32xf32> to vector<16x32xf32>
    %143 = arith.addf %140, %142 : vector<16x32xf32>
    %c304 = arith.constant 304 : index
    %c0_55 = arith.constant 0 : index
    %144 = vector.load %arg3[%c304, %c0_55] : memref<720x32xbf16, #tpu.memory_space<vmem>>, vector<32x32xbf16>
    %cst_56 = arith.constant dense<0.000000e+00> : vector<16x32xf32>
    %145 = tpu.matmul %138, %144, %cst_56 {dimension_numbers = #tpu.dot_dimension_numbers<[1], [0], [0], [1], [0, 0, 1, 1], [], []>} : vector<16x32xbf16>, vector<32x32xbf16>, vector<16x32xf32> -> vector<16x32xf32>
    %c15 = arith.constant 15 : index
    %c0_57 = arith.constant 0 : index
    %146 = vector.load %arg2[%c15, %c0_57] : memref<32x128xf32, #tpu.memory_space<vmem>>, vector<1x32xf32>
    %147 = vector.broadcast %146 : vector<1x32xf32> to vector<16x32xf32>
    %148 = arith.addf %145, %147 : vector<16x32xf32>
    %cst_58 = arith.constant 5.000000e-01 : f32
    %149 = vector.broadcast %cst_58 : f32 to vector<16x32xf32>
    %150 = arith.mulf %149, %143 : vector<16x32xf32>
    %cst_59 = arith.constant 0.707106769 : f32
    %151 = vector.broadcast %cst_59 : f32 to vector<16x32xf32>
    %152 = arith.mulf %143, %151 : vector<16x32xf32>
    %cst_60 = arith.constant 0.000000e+00 : f32
    %153 = vector.broadcast %cst_60 : f32 to vector<16x32xf32>
    %154 = arith.cmpf oge, %152, %153 : vector<16x32xf32>
    %cst_61 = arith.constant 1.000000e+00 : f32
    %cst_62 = arith.constant -1.000000e+00 : f32
    %155 = vector.broadcast %cst_61 : f32 to vector<16x32xf32>
    %156 = vector.broadcast %cst_62 : f32 to vector<16x32xf32>
    %157 = arith.select %154, %155, %156 : vector<16x32xi1>, vector<16x32xf32>
    %158 = math.absf %152 : vector<16x32xf32>
    %cst_63 = arith.constant 0.327591091 : f32
    %159 = vector.broadcast %cst_63 : f32 to vector<16x32xf32>
    %160 = arith.mulf %159, %158 : vector<16x32xf32>
    %cst_64 = arith.constant 1.000000e+00 : f32
    %161 = vector.broadcast %cst_64 : f32 to vector<16x32xf32>
    %162 = arith.addf %161, %160 : vector<16x32xf32>
    %163 = tpu.reciprocal %162 {approx = true} : vector<16x32xf32> -> vector<16x32xf32>
    %cst_65 = arith.constant 1.06140542 : f32
    %164 = vector.broadcast %cst_65 : f32 to vector<16x32xf32>
    %165 = arith.mulf %163, %164 : vector<16x32xf32>
    %cst_66 = arith.constant -1.45315206 : f32
    %166 = vector.broadcast %cst_66 : f32 to vector<16x32xf32>
    %167 = arith.addf %166, %165 : vector<16x32xf32>
    %168 = arith.mulf %163, %167 : vector<16x32xf32>
    %cst_67 = arith.constant 1.42141378 : f32
    %169 = vector.broadcast %cst_67 : f32 to vector<16x32xf32>
    %170 = arith.addf %169, %168 : vector<16x32xf32>
    %171 = arith.mulf %163, %170 : vector<16x32xf32>
    %cst_68 = arith.constant -0.284496725 : f32
    %172 = vector.broadcast %cst_68 : f32 to vector<16x32xf32>
    %173 = arith.addf %172, %171 : vector<16x32xf32>
    %174 = arith.mulf %163, %173 : vector<16x32xf32>
    %cst_69 = arith.constant 0.254829586 : f32
    %175 = vector.broadcast %cst_69 : f32 to vector<16x32xf32>
    %176 = arith.addf %175, %174 : vector<16x32xf32>
    %177 = arith.mulf %163, %176 : vector<16x32xf32>
    %cst_70 = arith.constant 0.000000e+00 : f32
    %178 = vector.broadcast %cst_70 : f32 to vector<16x32xf32>
    %179 = arith.subf %178, %158 : vector<16x32xf32>
    %180 = arith.mulf %179, %158 : vector<16x32xf32>
    %181 = math.exp %180 : vector<16x32xf32>
    %182 = arith.mulf %177, %181 : vector<16x32xf32>
    %cst_71 = arith.constant 1.000000e+00 : f32
    %183 = vector.broadcast %cst_71 : f32 to vector<16x32xf32>
    %184 = arith.subf %183, %182 : vector<16x32xf32>
    %185 = arith.mulf %157, %184 : vector<16x32xf32>
    %cst_72 = arith.constant 1.000000e+00 : f32
    %186 = vector.broadcast %cst_72 : f32 to vector<16x32xf32>
    %187 = arith.addf %186, %185 : vector<16x32xf32>
    %188 = arith.mulf %150, %187 : vector<16x32xf32>
    %189 = arith.truncf %188 : vector<16x32xf32> to vector<16x32xbf16>
    %c336 = arith.constant 336 : index
    %c0_73 = arith.constant 0 : index
    %190 = vector.load %arg3[%c336, %c0_73] : memref<720x32xbf16, #tpu.memory_space<vmem>>, vector<32x32xbf16>
    %cst_74 = arith.constant dense<0.000000e+00> : vector<16x32xf32>
    %191 = tpu.matmul %189, %190, %cst_74 {dimension_numbers = #tpu.dot_dimension_numbers<[1], [0], [0], [1], [0, 0, 1, 1], [], []>} : vector<16x32xbf16>, vector<32x32xbf16>, vector<16x32xf32> -> vector<16x32xf32>
    %cst_75 = arith.constant 5.000000e-01 : f32
    %192 = vector.broadcast %cst_75 : f32 to vector<16x32xf32>
    %193 = arith.mulf %192, %148 : vector<16x32xf32>
    %cst_76 = arith.constant 0.707106769 : f32
    %194 = vector.broadcast %cst_76 : f32 to vector<16x32xf32>
    %195 = arith.mulf %148, %194 : vector<16x32xf32>
    %cst_77 = arith.constant 0.000000e+00 : f32
    %196 = vector.broadcast %cst_77 : f32 to vector<16x32xf32>
    %197 = arith.cmpf oge, %195, %196 : vector<16x32xf32>
    %cst_78 = arith.constant 1.000000e+00 : f32
    %cst_79 = arith.constant -1.000000e+00 : f32
    %198 = vector.broadcast %cst_78 : f32 to vector<16x32xf32>
    %199 = vector.broadcast %cst_79 : f32 to vector<16x32xf32>
    %200 = arith.select %197, %198, %199 : vector<16x32xi1>, vector<16x32xf32>
    %201 = math.absf %195 : vector<16x32xf32>
    %cst_80 = arith.constant 0.327591091 : f32
    %202 = vector.broadcast %cst_80 : f32 to vector<16x32xf32>
    %203 = arith.mulf %202, %201 : vector<16x32xf32>
    %cst_81 = arith.constant 1.000000e+00 : f32
    %204 = vector.broadcast %cst_81 : f32 to vector<16x32xf32>
    %205 = arith.addf %204, %203 : vector<16x32xf32>
    %206 = tpu.reciprocal %205 {approx = true} : vector<16x32xf32> -> vector<16x32xf32>
    %cst_82 = arith.constant 1.06140542 : f32
    %207 = vector.broadcast %cst_82 : f32 to vector<16x32xf32>
    %208 = arith.mulf %206, %207 : vector<16x32xf32>
    %cst_83 = arith.constant -1.45315206 : f32
    %209 = vector.broadcast %cst_83 : f32 to vector<16x32xf32>
    %210 = arith.addf %209, %208 : vector<16x32xf32>
    %211 = arith.mulf %206, %210 : vector<16x32xf32>
    %cst_84 = arith.constant 1.42141378 : f32
    %212 = vector.broadcast %cst_84 : f32 to vector<16x32xf32>
    %213 = arith.addf %212, %211 : vector<16x32xf32>
    %214 = arith.mulf %206, %213 : vector<16x32xf32>
    %cst_85 = arith.constant -0.284496725 : f32
    %215 = vector.broadcast %cst_85 : f32 to vector<16x32xf32>
    %216 = arith.addf %215, %214 : vector<16x32xf32>
    %217 = arith.mulf %206, %216 : vector<16x32xf32>
    %cst_86 = arith.constant 0.254829586 : f32
    %218 = vector.broadcast %cst_86 : f32 to vector<16x32xf32>
    %219 = arith.addf %218, %217 : vector<16x32xf32>
    %220 = arith.mulf %206, %219 : vector<16x32xf32>
    %cst_87 = arith.constant 0.000000e+00 : f32
    %221 = vector.broadcast %cst_87 : f32 to vector<16x32xf32>
    %222 = arith.subf %221, %201 : vector<16x32xf32>
    %223 = arith.mulf %222, %201 : vector<16x32xf32>
    %224 = math.exp %223 : vector<16x32xf32>
    %225 = arith.mulf %220, %224 : vector<16x32xf32>
    %cst_88 = arith.constant 1.000000e+00 : f32
    %226 = vector.broadcast %cst_88 : f32 to vector<16x32xf32>
    %227 = arith.subf %226, %225 : vector<16x32xf32>
    %228 = arith.mulf %200, %227 : vector<16x32xf32>
    %cst_89 = arith.constant 1.000000e+00 : f32
    %229 = vector.broadcast %cst_89 : f32 to vector<16x32xf32>
    %230 = arith.addf %229, %228 : vector<16x32xf32>
    %231 = arith.mulf %193, %230 : vector<16x32xf32>
    %232 = arith.truncf %231 : vector<16x32xf32> to vector<16x32xbf16>
    %c368 = arith.constant 368 : index
    %c0_90 = arith.constant 0 : index
    %233 = vector.load %arg3[%c368, %c0_90] : memref<720x32xbf16, #tpu.memory_space<vmem>>, vector<32x32xbf16>
    %cst_91 = arith.constant dense<0.000000e+00> : vector<16x32xf32>
    %234 = tpu.matmul %232, %233, %cst_91 {dimension_numbers = #tpu.dot_dimension_numbers<[1], [0], [0], [1], [0, 0, 1, 1], [], []>} : vector<16x32xbf16>, vector<32x32xbf16>, vector<16x32xf32> -> vector<16x32xf32>
    %235 = arith.addf %191, %234 : vector<16x32xf32>
    %c16 = arith.constant 16 : index
    %c0_92 = arith.constant 0 : index
    %236 = vector.load %arg2[%c16, %c0_92] : memref<32x128xf32, #tpu.memory_space<vmem>>, vector<1x32xf32>
    %237 = vector.broadcast %236 : vector<1x32xf32> to vector<16x32xf32>
    %238 = arith.addf %235, %237 : vector<16x32xf32>
    %239 = arith.addf %137, %238 : vector<16x32xf32>
    %c17 = arith.constant 17 : index
    %c0_93 = arith.constant 0 : index
    %240 = vector.load %arg2[%c17, %c0_93] : memref<32x128xf32, #tpu.memory_space<vmem>>, vector<1x32xf32>
    %c18 = arith.constant 18 : index
    %c0_94 = arith.constant 0 : index
    %241 = vector.load %arg2[%c18, %c0_94] : memref<32x128xf32, #tpu.memory_space<vmem>>, vector<1x32xf32>
    %cst_95 = arith.constant dense<0.000000e+00> : vector<16xf32>
    %242 = vector.multi_reduction <add>, %239, %cst_95 [1] : vector<16x32xf32> to vector<16xf32>
    %243 = vector.shape_cast %242 : vector<16xf32> to vector<16x1xf32>
    %cst_96 = arith.constant 3.200000e+01 : f32
    %244 = vector.broadcast %cst_96 : f32 to vector<16x1xf32>
    %245 = arith.divf %243, %244 : vector<16x1xf32>
    %246 = vector.broadcast %245 : vector<16x1xf32> to vector<16x32xf32>
    %247 = arith.subf %239, %246 : vector<16x32xf32>
    %248 = arith.mulf %247, %247 : vector<16x32xf32>
    %cst_97 = arith.constant dense<0.000000e+00> : vector<16xf32>
    %249 = vector.multi_reduction <add>, %248, %cst_97 [1] : vector<16x32xf32> to vector<16xf32>
    %250 = vector.shape_cast %249 : vector<16xf32> to vector<16x1xf32>
    %cst_98 = arith.constant 3.200000e+01 : f32
    %251 = vector.broadcast %cst_98 : f32 to vector<16x1xf32>
    %252 = arith.divf %250, %251 : vector<16x1xf32>
    %253 = vector.broadcast %245 : vector<16x1xf32> to vector<16x32xf32>
    %254 = arith.subf %239, %253 : vector<16x32xf32>
    %cst_99 = arith.constant 9.99999996E-13 : f32
    %255 = vector.broadcast %cst_99 : f32 to vector<16x1xf32>
    %256 = arith.addf %252, %255 : vector<16x1xf32>
    %257 = math.rsqrt %256 : vector<16x1xf32>
    %258 = vector.broadcast %257 : vector<16x1xf32> to vector<16x32xf32>
    %259 = arith.mulf %254, %258 : vector<16x32xf32>
    %260 = vector.broadcast %240 : vector<1x32xf32> to vector<16x32xf32>
    %261 = arith.mulf %259, %260 : vector<16x32xf32>
    %262 = vector.broadcast %241 : vector<1x32xf32> to vector<16x32xf32>
    %263 = arith.addf %261, %262 : vector<16x32xf32>
    %264 = arith.truncf %263 : vector<16x32xf32> to vector<16x32xbf16>
    %c400 = arith.constant 400 : index
    %c0_100 = arith.constant 0 : index
    %265 = vector.load %arg3[%c400, %c0_100] : memref<720x32xbf16, #tpu.memory_space<vmem>>, vector<32x32xbf16>
    %cst_101 = arith.constant dense<0.000000e+00> : vector<16x32xf32>
    %266 = tpu.matmul %264, %265, %cst_101 {dimension_numbers = #tpu.dot_dimension_numbers<[1], [0], [0], [1], [0, 0, 1, 1], [], []>} : vector<16x32xbf16>, vector<32x32xbf16>, vector<16x32xf32> -> vector<16x32xf32>
    %c20 = arith.constant 20 : index
    %c0_102 = arith.constant 0 : index
    %267 = vector.load %arg2[%c20, %c0_102] : memref<32x128xf32, #tpu.memory_space<vmem>>, vector<1x32xf32>
    %268 = vector.broadcast %267 : vector<1x32xf32> to vector<16x32xf32>
    %269 = arith.addf %266, %268 : vector<16x32xf32>
    %c432 = arith.constant 432 : index
    %c0_103 = arith.constant 0 : index
    %270 = vector.load %arg3[%c432, %c0_103] : memref<720x32xbf16, #tpu.memory_space<vmem>>, vector<32x32xbf16>
    %cst_104 = arith.constant dense<0.000000e+00> : vector<16x32xf32>
    %271 = tpu.matmul %264, %270, %cst_104 {dimension_numbers = #tpu.dot_dimension_numbers<[1], [0], [0], [1], [0, 0, 1, 1], [], []>} : vector<16x32xbf16>, vector<32x32xbf16>, vector<16x32xf32> -> vector<16x32xf32>
    %c21 = arith.constant 21 : index
    %c0_105 = arith.constant 0 : index
    %272 = vector.load %arg2[%c21, %c0_105] : memref<32x128xf32, #tpu.memory_space<vmem>>, vector<1x32xf32>
    %273 = vector.broadcast %272 : vector<1x32xf32> to vector<16x32xf32>
    %274 = arith.addf %271, %273 : vector<16x32xf32>
    %c464 = arith.constant 464 : index
    %c0_106 = arith.constant 0 : index
    %275 = vector.load %arg3[%c464, %c0_106] : memref<720x32xbf16, #tpu.memory_space<vmem>>, vector<32x32xbf16>
    %cst_107 = arith.constant dense<0.000000e+00> : vector<16x32xf32>
    %276 = tpu.matmul %264, %275, %cst_107 {dimension_numbers = #tpu.dot_dimension_numbers<[1], [0], [0], [1], [0, 0, 1, 1], [], []>} : vector<16x32xbf16>, vector<32x32xbf16>, vector<16x32xf32> -> vector<16x32xf32>
    %c22 = arith.constant 22 : index
    %c0_108 = arith.constant 0 : index
    %277 = vector.load %arg2[%c22, %c0_108] : memref<32x128xf32, #tpu.memory_space<vmem>>, vector<1x32xf32>
    %278 = vector.broadcast %277 : vector<1x32xf32> to vector<16x32xf32>
    %279 = arith.addf %276, %278 : vector<16x32xf32>
    %c23 = arith.constant 23 : index
    %c0_109 = arith.constant 0 : index
    %280 = vector.load %arg2[%c23, %c0_109] : memref<32x128xf32, #tpu.memory_space<vmem>>, vector<1x32xf32>
    %281 = vector.extract_strided_slice %269 {offsets = [0, 0], sizes = [16, 16], strides = [1, 1]} : vector<16x32xf32> to vector<16x16xf32>
    %282 = vector.extract_strided_slice %274 {offsets = [0, 0], sizes = [16, 16], strides = [1, 1]} : vector<16x32xf32> to vector<16x16xf32>
    %cst_110 = arith.constant dense<0.000000e+00> : vector<16x16xf32>
    %283 = tpu.matmul %281, %282, %cst_110 {dimension_numbers = #tpu.dot_dimension_numbers<[1], [1], [0], [0], [0, 0, 1, 0], [], []>} : vector<16x16xf32>, vector<16x16xf32>, vector<16x16xf32> -> vector<16x16xf32>
    %cst_111 = arith.constant 2.500000e-01 : f32
    %284 = vector.broadcast %cst_111 : f32 to vector<16x16xf32>
    %285 = arith.mulf %283, %284 : vector<16x16xf32>
    %286 = arith.addf %285, %1 : vector<16x16xf32>
    %cst_112 = arith.constant dense<0xFF800000> : vector<16xf32>
    %287 = vector.multi_reduction <maximumf>, %286, %cst_112 [1] : vector<16x16xf32> to vector<16xf32>
    %288 = vector.shape_cast %287 : vector<16xf32> to vector<16x1xf32>
    %289 = vector.broadcast %288 : vector<16x1xf32> to vector<16x16xf32>
    %290 = arith.subf %286, %289 : vector<16x16xf32>
    %291 = math.exp %290 : vector<16x16xf32>
    %cst_113 = arith.constant dense<0.000000e+00> : vector<16xf32>
    %292 = vector.multi_reduction <add>, %291, %cst_113 [1] : vector<16x16xf32> to vector<16xf32>
    %293 = vector.shape_cast %292 : vector<16xf32> to vector<16x1xf32>
    %294 = tpu.reciprocal %293 {approx = true} : vector<16x1xf32> -> vector<16x1xf32>
    %295 = vector.broadcast %294 : vector<16x1xf32> to vector<16x16xf32>
    %296 = arith.mulf %291, %295 : vector<16x16xf32>
    %297 = vector.extract_strided_slice %279 {offsets = [0, 0], sizes = [16, 16], strides = [1, 1]} : vector<16x32xf32> to vector<16x16xf32>
    %cst_114 = arith.constant dense<0.000000e+00> : vector<16x16xf32>
    %298 = tpu.matmul %296, %297, %cst_114 {dimension_numbers = #tpu.dot_dimension_numbers<[1], [0], [0], [1], [0, 0, 1, 1], [], []>} : vector<16x16xf32>, vector<16x16xf32>, vector<16x16xf32> -> vector<16x16xf32>
    %c496 = arith.constant 496 : index
    %c0_115 = arith.constant 0 : index
    %299 = vector.load %arg3[%c496, %c0_115] : memref<720x32xbf16, #tpu.memory_space<vmem>>, vector<16x32xbf16>
    %300 = arith.truncf %298 : vector<16x16xf32> to vector<16x16xbf16>
    %cst_116 = arith.constant dense<0.000000e+00> : vector<16x32xf32>
    %301 = tpu.matmul %300, %299, %cst_116 {dimension_numbers = #tpu.dot_dimension_numbers<[1], [0], [0], [1], [0, 0, 1, 1], [], []>} : vector<16x16xbf16>, vector<16x32xbf16>, vector<16x32xf32> -> vector<16x32xf32>
    %302 = vector.broadcast %280 : vector<1x32xf32> to vector<16x32xf32>
    %303 = arith.addf %302, %301 : vector<16x32xf32>
    %304 = vector.extract_strided_slice %269 {offsets = [0, 16], sizes = [16, 16], strides = [1, 1]} : vector<16x32xf32> to vector<16x16xf32>
    %305 = vector.extract_strided_slice %274 {offsets = [0, 16], sizes = [16, 16], strides = [1, 1]} : vector<16x32xf32> to vector<16x16xf32>
    %cst_117 = arith.constant dense<0.000000e+00> : vector<16x16xf32>
    %306 = tpu.matmul %304, %305, %cst_117 {dimension_numbers = #tpu.dot_dimension_numbers<[1], [1], [0], [0], [0, 0, 1, 0], [], []>} : vector<16x16xf32>, vector<16x16xf32>, vector<16x16xf32> -> vector<16x16xf32>
    %cst_118 = arith.constant 2.500000e-01 : f32
    %307 = vector.broadcast %cst_118 : f32 to vector<16x16xf32>
    %308 = arith.mulf %306, %307 : vector<16x16xf32>
    %309 = arith.addf %308, %1 : vector<16x16xf32>
    %cst_119 = arith.constant dense<0xFF800000> : vector<16xf32>
    %310 = vector.multi_reduction <maximumf>, %309, %cst_119 [1] : vector<16x16xf32> to vector<16xf32>
    %311 = vector.shape_cast %310 : vector<16xf32> to vector<16x1xf32>
    %312 = vector.broadcast %311 : vector<16x1xf32> to vector<16x16xf32>
    %313 = arith.subf %309, %312 : vector<16x16xf32>
    %314 = math.exp %313 : vector<16x16xf32>
    %cst_120 = arith.constant dense<0.000000e+00> : vector<16xf32>
    %315 = vector.multi_reduction <add>, %314, %cst_120 [1] : vector<16x16xf32> to vector<16xf32>
    %316 = vector.shape_cast %315 : vector<16xf32> to vector<16x1xf32>
    %317 = tpu.reciprocal %316 {approx = true} : vector<16x1xf32> -> vector<16x1xf32>
    %318 = vector.broadcast %317 : vector<16x1xf32> to vector<16x16xf32>
    %319 = arith.mulf %314, %318 : vector<16x16xf32>
    %320 = vector.extract_strided_slice %279 {offsets = [0, 16], sizes = [16, 16], strides = [1, 1]} : vector<16x32xf32> to vector<16x16xf32>
    %cst_121 = arith.constant dense<0.000000e+00> : vector<16x16xf32>
    %321 = tpu.matmul %319, %320, %cst_121 {dimension_numbers = #tpu.dot_dimension_numbers<[1], [0], [0], [1], [0, 0, 1, 1], [], []>} : vector<16x16xf32>, vector<16x16xf32>, vector<16x16xf32> -> vector<16x16xf32>
    %c512 = arith.constant 512 : index
    %c0_122 = arith.constant 0 : index
    %322 = vector.load %arg3[%c512, %c0_122] : memref<720x32xbf16, #tpu.memory_space<vmem>>, vector<16x32xbf16>
    %323 = arith.truncf %321 : vector<16x16xf32> to vector<16x16xbf16>
    %cst_123 = arith.constant dense<0.000000e+00> : vector<16x32xf32>
    %324 = tpu.matmul %323, %322, %cst_123 {dimension_numbers = #tpu.dot_dimension_numbers<[1], [0], [0], [1], [0, 0, 1, 1], [], []>} : vector<16x16xbf16>, vector<16x32xbf16>, vector<16x32xf32> -> vector<16x32xf32>
    %325 = arith.addf %303, %324 : vector<16x32xf32>
    %326 = arith.addf %263, %325 : vector<16x32xf32>
    %c24 = arith.constant 24 : index
    %c0_124 = arith.constant 0 : index
    %327 = vector.load %arg2[%c24, %c0_124] : memref<32x128xf32, #tpu.memory_space<vmem>>, vector<1x32xf32>
    %c25 = arith.constant 25 : index
    %c0_125 = arith.constant 0 : index
    %328 = vector.load %arg2[%c25, %c0_125] : memref<32x128xf32, #tpu.memory_space<vmem>>, vector<1x32xf32>
    %cst_126 = arith.constant dense<0.000000e+00> : vector<16xf32>
    %329 = vector.multi_reduction <add>, %326, %cst_126 [1] : vector<16x32xf32> to vector<16xf32>
    %330 = vector.shape_cast %329 : vector<16xf32> to vector<16x1xf32>
    %cst_127 = arith.constant 3.200000e+01 : f32
    %331 = vector.broadcast %cst_127 : f32 to vector<16x1xf32>
    %332 = arith.divf %330, %331 : vector<16x1xf32>
    %333 = vector.broadcast %332 : vector<16x1xf32> to vector<16x32xf32>
    %334 = arith.subf %326, %333 : vector<16x32xf32>
    %335 = arith.mulf %334, %334 : vector<16x32xf32>
    %cst_128 = arith.constant dense<0.000000e+00> : vector<16xf32>
    %336 = vector.multi_reduction <add>, %335, %cst_128 [1] : vector<16x32xf32> to vector<16xf32>
    %337 = vector.shape_cast %336 : vector<16xf32> to vector<16x1xf32>
    %cst_129 = arith.constant 3.200000e+01 : f32
    %338 = vector.broadcast %cst_129 : f32 to vector<16x1xf32>
    %339 = arith.divf %337, %338 : vector<16x1xf32>
    %340 = vector.broadcast %332 : vector<16x1xf32> to vector<16x32xf32>
    %341 = arith.subf %326, %340 : vector<16x32xf32>
    %cst_130 = arith.constant 9.99999996E-13 : f32
    %342 = vector.broadcast %cst_130 : f32 to vector<16x1xf32>
    %343 = arith.addf %339, %342 : vector<16x1xf32>
    %344 = math.rsqrt %343 : vector<16x1xf32>
    %345 = vector.broadcast %344 : vector<16x1xf32> to vector<16x32xf32>
    %346 = arith.mulf %341, %345 : vector<16x32xf32>
    %347 = vector.broadcast %327 : vector<1x32xf32> to vector<16x32xf32>
    %348 = arith.mulf %346, %347 : vector<16x32xf32>
    %349 = vector.broadcast %328 : vector<1x32xf32> to vector<16x32xf32>
    %350 = arith.addf %348, %349 : vector<16x32xf32>
    %351 = arith.truncf %350 : vector<16x32xf32> to vector<16x32xbf16>
    %c528 = arith.constant 528 : index
    %c0_131 = arith.constant 0 : index
    %352 = vector.load %arg3[%c528, %c0_131] : memref<720x32xbf16, #tpu.memory_space<vmem>>, vector<32x32xbf16>
    %cst_132 = arith.constant dense<0.000000e+00> : vector<16x32xf32>
    %353 = tpu.matmul %351, %352, %cst_132 {dimension_numbers = #tpu.dot_dimension_numbers<[1], [0], [0], [1], [0, 0, 1, 1], [], []>} : vector<16x32xbf16>, vector<32x32xbf16>, vector<16x32xf32> -> vector<16x32xf32>
    %c26 = arith.constant 26 : index
    %c0_133 = arith.constant 0 : index
    %354 = vector.load %arg2[%c26, %c0_133] : memref<32x128xf32, #tpu.memory_space<vmem>>, vector<1x32xf32>
    %355 = vector.broadcast %354 : vector<1x32xf32> to vector<16x32xf32>
    %356 = arith.addf %353, %355 : vector<16x32xf32>
    %c560 = arith.constant 560 : index
    %c0_134 = arith.constant 0 : index
    %357 = vector.load %arg3[%c560, %c0_134] : memref<720x32xbf16, #tpu.memory_space<vmem>>, vector<32x32xbf16>
    %cst_135 = arith.constant dense<0.000000e+00> : vector<16x32xf32>
    %358 = tpu.matmul %351, %357, %cst_135 {dimension_numbers = #tpu.dot_dimension_numbers<[1], [0], [0], [1], [0, 0, 1, 1], [], []>} : vector<16x32xbf16>, vector<32x32xbf16>, vector<16x32xf32> -> vector<16x32xf32>
    %c27 = arith.constant 27 : index
    %c0_136 = arith.constant 0 : index
    %359 = vector.load %arg2[%c27, %c0_136] : memref<32x128xf32, #tpu.memory_space<vmem>>, vector<1x32xf32>
    %360 = vector.broadcast %359 : vector<1x32xf32> to vector<16x32xf32>
    %361 = arith.addf %358, %360 : vector<16x32xf32>
    %cst_137 = arith.constant 5.000000e-01 : f32
    %362 = vector.broadcast %cst_137 : f32 to vector<16x32xf32>
    %363 = arith.mulf %362, %356 : vector<16x32xf32>
    %cst_138 = arith.constant 0.707106769 : f32
    %364 = vector.broadcast %cst_138 : f32 to vector<16x32xf32>
    %365 = arith.mulf %356, %364 : vector<16x32xf32>
    %cst_139 = arith.constant 0.000000e+00 : f32
    %366 = vector.broadcast %cst_139 : f32 to vector<16x32xf32>
    %367 = arith.cmpf oge, %365, %366 : vector<16x32xf32>
    %cst_140 = arith.constant 1.000000e+00 : f32
    %cst_141 = arith.constant -1.000000e+00 : f32
    %368 = vector.broadcast %cst_140 : f32 to vector<16x32xf32>
    %369 = vector.broadcast %cst_141 : f32 to vector<16x32xf32>
    %370 = arith.select %367, %368, %369 : vector<16x32xi1>, vector<16x32xf32>
    %371 = math.absf %365 : vector<16x32xf32>
    %cst_142 = arith.constant 0.327591091 : f32
    %372 = vector.broadcast %cst_142 : f32 to vector<16x32xf32>
    %373 = arith.mulf %372, %371 : vector<16x32xf32>
    %cst_143 = arith.constant 1.000000e+00 : f32
    %374 = vector.broadcast %cst_143 : f32 to vector<16x32xf32>
    %375 = arith.addf %374, %373 : vector<16x32xf32>
    %376 = tpu.reciprocal %375 {approx = true} : vector<16x32xf32> -> vector<16x32xf32>
    %cst_144 = arith.constant 1.06140542 : f32
    %377 = vector.broadcast %cst_144 : f32 to vector<16x32xf32>
    %378 = arith.mulf %376, %377 : vector<16x32xf32>
    %cst_145 = arith.constant -1.45315206 : f32
    %379 = vector.broadcast %cst_145 : f32 to vector<16x32xf32>
    %380 = arith.addf %379, %378 : vector<16x32xf32>
    %381 = arith.mulf %376, %380 : vector<16x32xf32>
    %cst_146 = arith.constant 1.42141378 : f32
    %382 = vector.broadcast %cst_146 : f32 to vector<16x32xf32>
    %383 = arith.addf %382, %381 : vector<16x32xf32>
    %384 = arith.mulf %376, %383 : vector<16x32xf32>
    %cst_147 = arith.constant -0.284496725 : f32
    %385 = vector.broadcast %cst_147 : f32 to vector<16x32xf32>
    %386 = arith.addf %385, %384 : vector<16x32xf32>
    %387 = arith.mulf %376, %386 : vector<16x32xf32>
    %cst_148 = arith.constant 0.254829586 : f32
    %388 = vector.broadcast %cst_148 : f32 to vector<16x32xf32>
    %389 = arith.addf %388, %387 : vector<16x32xf32>
    %390 = arith.mulf %376, %389 : vector<16x32xf32>
    %cst_149 = arith.constant 0.000000e+00 : f32
    %391 = vector.broadcast %cst_149 : f32 to vector<16x32xf32>
    %392 = arith.subf %391, %371 : vector<16x32xf32>
    %393 = arith.mulf %392, %371 : vector<16x32xf32>
    %394 = math.exp %393 : vector<16x32xf32>
    %395 = arith.mulf %390, %394 : vector<16x32xf32>
    %cst_150 = arith.constant 1.000000e+00 : f32
    %396 = vector.broadcast %cst_150 : f32 to vector<16x32xf32>
    %397 = arith.subf %396, %395 : vector<16x32xf32>
    %398 = arith.mulf %370, %397 : vector<16x32xf32>
    %cst_151 = arith.constant 1.000000e+00 : f32
    %399 = vector.broadcast %cst_151 : f32 to vector<16x32xf32>
    %400 = arith.addf %399, %398 : vector<16x32xf32>
    %401 = arith.mulf %363, %400 : vector<16x32xf32>
    %402 = arith.truncf %401 : vector<16x32xf32> to vector<16x32xbf16>
    %c592 = arith.constant 592 : index
    %c0_152 = arith.constant 0 : index
    %403 = vector.load %arg3[%c592, %c0_152] : memref<720x32xbf16, #tpu.memory_space<vmem>>, vector<32x32xbf16>
    %cst_153 = arith.constant dense<0.000000e+00> : vector<16x32xf32>
    %404 = tpu.matmul %402, %403, %cst_153 {dimension_numbers = #tpu.dot_dimension_numbers<[1], [0], [0], [1], [0, 0, 1, 1], [], []>} : vector<16x32xbf16>, vector<32x32xbf16>, vector<16x32xf32> -> vector<16x32xf32>
    %cst_154 = arith.constant 5.000000e-01 : f32
    %405 = vector.broadcast %cst_154 : f32 to vector<16x32xf32>
    %406 = arith.mulf %405, %361 : vector<16x32xf32>
    %cst_155 = arith.constant 0.707106769 : f32
    %407 = vector.broadcast %cst_155 : f32 to vector<16x32xf32>
    %408 = arith.mulf %361, %407 : vector<16x32xf32>
    %cst_156 = arith.constant 0.000000e+00 : f32
    %409 = vector.broadcast %cst_156 : f32 to vector<16x32xf32>
    %410 = arith.cmpf oge, %408, %409 : vector<16x32xf32>
    %cst_157 = arith.constant 1.000000e+00 : f32
    %cst_158 = arith.constant -1.000000e+00 : f32
    %411 = vector.broadcast %cst_157 : f32 to vector<16x32xf32>
    %412 = vector.broadcast %cst_158 : f32 to vector<16x32xf32>
    %413 = arith.select %410, %411, %412 : vector<16x32xi1>, vector<16x32xf32>
    %414 = math.absf %408 : vector<16x32xf32>
    %cst_159 = arith.constant 0.327591091 : f32
    %415 = vector.broadcast %cst_159 : f32 to vector<16x32xf32>
    %416 = arith.mulf %415, %414 : vector<16x32xf32>
    %cst_160 = arith.constant 1.000000e+00 : f32
    %417 = vector.broadcast %cst_160 : f32 to vector<16x32xf32>
    %418 = arith.addf %417, %416 : vector<16x32xf32>
    %419 = tpu.reciprocal %418 {approx = true} : vector<16x32xf32> -> vector<16x32xf32>
    %cst_161 = arith.constant 1.06140542 : f32
    %420 = vector.broadcast %cst_161 : f32 to vector<16x32xf32>
    %421 = arith.mulf %419, %420 : vector<16x32xf32>
    %cst_162 = arith.constant -1.45315206 : f32
    %422 = vector.broadcast %cst_162 : f32 to vector<16x32xf32>
    %423 = arith.addf %422, %421 : vector<16x32xf32>
    %424 = arith.mulf %419, %423 : vector<16x32xf32>
    %cst_163 = arith.constant 1.42141378 : f32
    %425 = vector.broadcast %cst_163 : f32 to vector<16x32xf32>
    %426 = arith.addf %425, %424 : vector<16x32xf32>
    %427 = arith.mulf %419, %426 : vector<16x32xf32>
    %cst_164 = arith.constant -0.284496725 : f32
    %428 = vector.broadcast %cst_164 : f32 to vector<16x32xf32>
    %429 = arith.addf %428, %427 : vector<16x32xf32>
    %430 = arith.mulf %419, %429 : vector<16x32xf32>
    %cst_165 = arith.constant 0.254829586 : f32
    %431 = vector.broadcast %cst_165 : f32 to vector<16x32xf32>
    %432 = arith.addf %431, %430 : vector<16x32xf32>
    %433 = arith.mulf %419, %432 : vector<16x32xf32>
    %cst_166 = arith.constant 0.000000e+00 : f32
    %434 = vector.broadcast %cst_166 : f32 to vector<16x32xf32>
    %435 = arith.subf %434, %414 : vector<16x32xf32>
    %436 = arith.mulf %435, %414 : vector<16x32xf32>
    %437 = math.exp %436 : vector<16x32xf32>
    %438 = arith.mulf %433, %437 : vector<16x32xf32>
    %cst_167 = arith.constant 1.000000e+00 : f32
    %439 = vector.broadcast %cst_167 : f32 to vector<16x32xf32>
    %440 = arith.subf %439, %438 : vector<16x32xf32>
    %441 = arith.mulf %413, %440 : vector<16x32xf32>
    %cst_168 = arith.constant 1.000000e+00 : f32
    %442 = vector.broadcast %cst_168 : f32 to vector<16x32xf32>
    %443 = arith.addf %442, %441 : vector<16x32xf32>
    %444 = arith.mulf %406, %443 : vector<16x32xf32>
    %445 = arith.truncf %444 : vector<16x32xf32> to vector<16x32xbf16>
    %c624 = arith.constant 624 : index
    %c0_169 = arith.constant 0 : index
    %446 = vector.load %arg3[%c624, %c0_169] : memref<720x32xbf16, #tpu.memory_space<vmem>>, vector<32x32xbf16>
    %cst_170 = arith.constant dense<0.000000e+00> : vector<16x32xf32>
    %447 = tpu.matmul %445, %446, %cst_170 {dimension_numbers = #tpu.dot_dimension_numbers<[1], [0], [0], [1], [0, 0, 1, 1], [], []>} : vector<16x32xbf16>, vector<32x32xbf16>, vector<16x32xf32> -> vector<16x32xf32>
    %448 = arith.addf %404, %447 : vector<16x32xf32>
    %c28 = arith.constant 28 : index
    %c0_171 = arith.constant 0 : index
    %449 = vector.load %arg2[%c28, %c0_171] : memref<32x128xf32, #tpu.memory_space<vmem>>, vector<1x32xf32>
    %450 = vector.broadcast %449 : vector<1x32xf32> to vector<16x32xf32>
    %451 = arith.addf %448, %450 : vector<16x32xf32>
    %452 = arith.addf %350, %451 : vector<16x32xf32>
    %c29 = arith.constant 29 : index
    %c0_172 = arith.constant 0 : index
    %453 = vector.load %arg2[%c29, %c0_172] : memref<32x128xf32, #tpu.memory_space<vmem>>, vector<1x32xf32>
    %c30 = arith.constant 30 : index
    %c0_173 = arith.constant 0 : index
    %454 = vector.load %arg2[%c30, %c0_173] : memref<32x128xf32, #tpu.memory_space<vmem>>, vector<1x32xf32>
    %cst_174 = arith.constant dense<0.000000e+00> : vector<16xf32>
    %455 = vector.multi_reduction <add>, %452, %cst_174 [1] : vector<16x32xf32> to vector<16xf32>
    %456 = vector.shape_cast %455 : vector<16xf32> to vector<16x1xf32>
    %cst_175 = arith.constant 3.200000e+01 : f32
    %457 = vector.broadcast %cst_175 : f32 to vector<16x1xf32>
    %458 = arith.divf %456, %457 : vector<16x1xf32>
    %459 = vector.broadcast %458 : vector<16x1xf32> to vector<16x32xf32>
    %460 = arith.subf %452, %459 : vector<16x32xf32>
    %461 = arith.mulf %460, %460 : vector<16x32xf32>
    %cst_176 = arith.constant dense<0.000000e+00> : vector<16xf32>
    %462 = vector.multi_reduction <add>, %461, %cst_176 [1] : vector<16x32xf32> to vector<16xf32>
    %463 = vector.shape_cast %462 : vector<16xf32> to vector<16x1xf32>
    %cst_177 = arith.constant 3.200000e+01 : f32
    %464 = vector.broadcast %cst_177 : f32 to vector<16x1xf32>
    %465 = arith.divf %463, %464 : vector<16x1xf32>
    %466 = vector.broadcast %458 : vector<16x1xf32> to vector<16x32xf32>
    %467 = arith.subf %452, %466 : vector<16x32xf32>
    %cst_178 = arith.constant 9.99999996E-13 : f32
    %468 = vector.broadcast %cst_178 : f32 to vector<16x1xf32>
    %469 = arith.addf %465, %468 : vector<16x1xf32>
    %470 = math.rsqrt %469 : vector<16x1xf32>
    %471 = vector.broadcast %470 : vector<16x1xf32> to vector<16x32xf32>
    %472 = arith.mulf %467, %471 : vector<16x32xf32>
    %473 = vector.broadcast %453 : vector<1x32xf32> to vector<16x32xf32>
    %474 = arith.mulf %472, %473 : vector<16x32xf32>
    %475 = vector.broadcast %454 : vector<1x32xf32> to vector<16x32xf32>
    %476 = arith.addf %474, %475 : vector<16x32xf32>
    %477 = arith.truncf %476 : vector<16x32xf32> to vector<16x32xbf16>
    %c656 = arith.constant 656 : index
    %c0_179 = arith.constant 0 : index
    %478 = vector.load %arg3[%c656, %c0_179] : memref<720x32xbf16, #tpu.memory_space<vmem>>, vector<32x32xbf16>
    %cst_180 = arith.constant dense<0.000000e+00> : vector<16x32xf32>
    %479 = tpu.matmul %477, %478, %cst_180 {dimension_numbers = #tpu.dot_dimension_numbers<[1], [0], [0], [1], [0, 0, 1, 1], [], []>} : vector<16x32xbf16>, vector<32x32xbf16>, vector<16x32xf32> -> vector<16x32xf32>
    %c3 = arith.constant 3 : index
    %c0_181 = arith.constant 0 : index
    %480 = vector.load %arg2[%c3, %c0_181] : memref<32x128xf32, #tpu.memory_space<vmem>>, vector<1x32xf32>
    %481 = vector.broadcast %480 : vector<1x32xf32> to vector<16x32xf32>
    %482 = arith.addf %479, %481 : vector<16x32xf32>
    %cst_182 = arith.constant 5.000000e-01 : f32
    %483 = vector.broadcast %cst_182 : f32 to vector<16x32xf32>
    %484 = arith.mulf %483, %482 : vector<16x32xf32>
    %cst_183 = arith.constant 0.707106769 : f32
    %485 = vector.broadcast %cst_183 : f32 to vector<16x32xf32>
    %486 = arith.mulf %482, %485 : vector<16x32xf32>
    %cst_184 = arith.constant 0.000000e+00 : f32
    %487 = vector.broadcast %cst_184 : f32 to vector<16x32xf32>
    %488 = arith.cmpf oge, %486, %487 : vector<16x32xf32>
    %cst_185 = arith.constant 1.000000e+00 : f32
    %cst_186 = arith.constant -1.000000e+00 : f32
    %489 = vector.broadcast %cst_185 : f32 to vector<16x32xf32>
    %490 = vector.broadcast %cst_186 : f32 to vector<16x32xf32>
    %491 = arith.select %488, %489, %490 : vector<16x32xi1>, vector<16x32xf32>
    %492 = math.absf %486 : vector<16x32xf32>
    %cst_187 = arith.constant 0.327591091 : f32
    %493 = vector.broadcast %cst_187 : f32 to vector<16x32xf32>
    %494 = arith.mulf %493, %492 : vector<16x32xf32>
    %cst_188 = arith.constant 1.000000e+00 : f32
    %495 = vector.broadcast %cst_188 : f32 to vector<16x32xf32>
    %496 = arith.addf %495, %494 : vector<16x32xf32>
    %497 = tpu.reciprocal %496 {approx = true} : vector<16x32xf32> -> vector<16x32xf32>
    %cst_189 = arith.constant 1.06140542 : f32
    %498 = vector.broadcast %cst_189 : f32 to vector<16x32xf32>
    %499 = arith.mulf %497, %498 : vector<16x32xf32>
    %cst_190 = arith.constant -1.45315206 : f32
    %500 = vector.broadcast %cst_190 : f32 to vector<16x32xf32>
    %501 = arith.addf %500, %499 : vector<16x32xf32>
    %502 = arith.mulf %497, %501 : vector<16x32xf32>
    %cst_191 = arith.constant 1.42141378 : f32
    %503 = vector.broadcast %cst_191 : f32 to vector<16x32xf32>
    %504 = arith.addf %503, %502 : vector<16x32xf32>
    %505 = arith.mulf %497, %504 : vector<16x32xf32>
    %cst_192 = arith.constant -0.284496725 : f32
    %506 = vector.broadcast %cst_192 : f32 to vector<16x32xf32>
    %507 = arith.addf %506, %505 : vector<16x32xf32>
    %508 = arith.mulf %497, %507 : vector<16x32xf32>
    %cst_193 = arith.constant 0.254829586 : f32
    %509 = vector.broadcast %cst_193 : f32 to vector<16x32xf32>
    %510 = arith.addf %509, %508 : vector<16x32xf32>
    %511 = arith.mulf %497, %510 : vector<16x32xf32>
    %cst_194 = arith.constant 0.000000e+00 : f32
    %512 = vector.broadcast %cst_194 : f32 to vector<16x32xf32>
    %513 = arith.subf %512, %492 : vector<16x32xf32>
    %514 = arith.mulf %513, %492 : vector<16x32xf32>
    %515 = math.exp %514 : vector<16x32xf32>
    %516 = arith.mulf %511, %515 : vector<16x32xf32>
    %cst_195 = arith.constant 1.000000e+00 : f32
    %517 = vector.broadcast %cst_195 : f32 to vector<16x32xf32>
    %518 = arith.subf %517, %516 : vector<16x32xf32>
    %519 = arith.mulf %491, %518 : vector<16x32xf32>
    %cst_196 = arith.constant 1.000000e+00 : f32
    %520 = vector.broadcast %cst_196 : f32 to vector<16x32xf32>
    %521 = arith.addf %520, %519 : vector<16x32xf32>
    %522 = arith.mulf %484, %521 : vector<16x32xf32>
    %c4 = arith.constant 4 : index
    %c0_197 = arith.constant 0 : index
    %523 = vector.load %arg2[%c4, %c0_197] : memref<32x128xf32, #tpu.memory_space<vmem>>, vector<1x32xf32>
    %c5 = arith.constant 5 : index
    %c0_198 = arith.constant 0 : index
    %524 = vector.load %arg2[%c5, %c0_198] : memref<32x128xf32, #tpu.memory_space<vmem>>, vector<1x32xf32>
    %cst_199 = arith.constant dense<0.000000e+00> : vector<16xf32>
    %525 = vector.multi_reduction <add>, %522, %cst_199 [1] : vector<16x32xf32> to vector<16xf32>
    %526 = vector.shape_cast %525 : vector<16xf32> to vector<16x1xf32>
    %cst_200 = arith.constant 3.200000e+01 : f32
    %527 = vector.broadcast %cst_200 : f32 to vector<16x1xf32>
    %528 = arith.divf %526, %527 : vector<16x1xf32>
    %529 = vector.broadcast %528 : vector<16x1xf32> to vector<16x32xf32>
    %530 = arith.subf %522, %529 : vector<16x32xf32>
    %531 = arith.mulf %530, %530 : vector<16x32xf32>
    %cst_201 = arith.constant dense<0.000000e+00> : vector<16xf32>
    %532 = vector.multi_reduction <add>, %531, %cst_201 [1] : vector<16x32xf32> to vector<16xf32>
    %533 = vector.shape_cast %532 : vector<16xf32> to vector<16x1xf32>
    %cst_202 = arith.constant 3.200000e+01 : f32
    %534 = vector.broadcast %cst_202 : f32 to vector<16x1xf32>
    %535 = arith.divf %533, %534 : vector<16x1xf32>
    %536 = vector.broadcast %528 : vector<16x1xf32> to vector<16x32xf32>
    %537 = arith.subf %522, %536 : vector<16x32xf32>
    %cst_203 = arith.constant 9.99999996E-13 : f32
    %538 = vector.broadcast %cst_203 : f32 to vector<16x1xf32>
    %539 = arith.addf %535, %538 : vector<16x1xf32>
    %540 = math.rsqrt %539 : vector<16x1xf32>
    %541 = vector.broadcast %540 : vector<16x1xf32> to vector<16x32xf32>
    %542 = arith.mulf %537, %541 : vector<16x32xf32>
    %543 = vector.broadcast %523 : vector<1x32xf32> to vector<16x32xf32>
    %544 = arith.mulf %542, %543 : vector<16x32xf32>
    %545 = vector.broadcast %524 : vector<1x32xf32> to vector<16x32xf32>
    %546 = arith.addf %544, %545 : vector<16x32xf32>
    %547 = arith.truncf %546 : vector<16x32xf32> to vector<16x32xbf16>
    %c0_204 = arith.constant 0 : index
    %c0_205 = arith.constant 0 : index
    %548 = vector.load %arg4[%c0_204, %c0_205] : memref<32x128xbf16, #tpu.memory_space<vmem>>, vector<32x128xbf16>
    %cst_206 = arith.constant dense<0.000000e+00> : vector<16x128xf32>
    %549 = tpu.matmul %547, %548, %cst_206 {dimension_numbers = #tpu.dot_dimension_numbers<[1], [0], [0], [1], [0, 0, 1, 1], [], []>} : vector<16x32xbf16>, vector<32x128xbf16>, vector<16x128xf32> -> vector<16x128xf32>
    %c0_207 = arith.constant 0 : index
    %c0_208 = arith.constant 0 : index
    %550 = vector.load %arg2[%c0_207, %c0_208] : memref<32x128xf32, #tpu.memory_space<vmem>>, vector<1x128xf32>
    %551 = vector.broadcast %550 : vector<1x128xf32> to vector<16x128xf32>
    %552 = arith.addf %549, %551 : vector<16x128xf32>
    %c0_209 = arith.constant 0 : index
    %c0_210 = arith.constant 0 : index
    %553 = vector.load %arg5[%c0_209, %c0_210] : memref<16x128xf32, #tpu.memory_space<vmem>>, vector<16x128xf32>
    tpu.vector_store %arg5[%c0_209, %c0_210], %552 {strides = array<i32>} : memref<16x128xf32, #tpu.memory_space<vmem>>, vector<16x128xf32>,
    %cst_211 = arith.constant dense<0xFF800000> : vector<16xf32>
    %554 = vector.multi_reduction <maximumf>, %552, %cst_211 [1] : vector<16x128xf32> to vector<16xf32>
    %555 = vector.shape_cast %554 : vector<16xf32> to vector<16x1xf32>
    %556 = tpu.iota {dimensions = array<i32: 1>} : vector<16x128xi32>
    %557 = arith.sitofp %556 : vector<16x128xi32> to vector<16x128xf32>
    %558 = vector.broadcast %555 : vector<16x1xf32> to vector<16x128xf32>
    %559 = arith.cmpf oge, %552, %558 : vector<16x128xf32>
    %cst_212 = arith.constant 1.280000e+02 : f32
    %560 = vector.broadcast %cst_212 : f32 to vector<16x128xf32>
    %561 = arith.select %559, %557, %560 : vector<16x128xi1>, vector<16x128xf32>
    %cst_213 = arith.constant dense<0x7F800000> : vector<16xf32>
    %562 = vector.multi_reduction <minimumf>, %561, %cst_213 [1] : vector<16x128xf32> to vector<16xf32>
    %563 = vector.shape_cast %562 : vector<16xf32> to vector<16x1xf32>
    %564 = arith.fptosi %563 : vector<16x1xf32> to vector<16x1xi32>
    %c0_214 = arith.constant 0 : index
    %c3_215 = arith.constant 3 : index
    %565 = vector.load %arg0[%c0_214, %c3_215] : memref<16x8xi32, #tpu.memory_space<vmem>>, vector<16x1xi32>
    %c0_216 = arith.constant 0 : index
    %c4_217 = arith.constant 4 : index
    %566 = vector.load %arg0[%c0_216, %c4_217] : memref<16x8xi32, #tpu.memory_space<vmem>>, vector<16x1xi32>
    %567 = tpu.iota {dimensions = array<i32: 1>} : vector<16x144xi32>
    %568 = vector.broadcast %564 : vector<16x1xi32> to vector<16x144xi32>
    %569 = arith.cmpi eq, %567, %568 : vector<16x144xi32>
    %c128_i32_218 = arith.constant 128 : i32
    %570 = vector.broadcast %c128_i32_218 : i32 to vector<16x1xi32>
    %571 = arith.addi %565, %570 : vector<16x1xi32>
    %572 = vector.broadcast %571 : vector<16x1xi32> to vector<16x144xi32>
    %573 = arith.cmpi eq, %567, %572 : vector<16x144xi32>
    %574 = arith.ori %569, %573 : vector<16x144xi1>
    %c128_i32_219 = arith.constant 128 : i32
    %575 = vector.broadcast %c128_i32_219 : i32 to vector<16x1xi32>
    %576 = arith.addi %566, %575 : vector<16x1xi32>
    %c8_i32_220 = arith.constant 8 : i32
    %577 = vector.broadcast %c8_i32_220 : i32 to vector<16x1xi32>
    %578 = arith.addi %576, %577 : vector<16x1xi32>
    %579 = vector.broadcast %578 : vector<16x1xi32> to vector<16x144xi32>
    %580 = arith.cmpi eq, %567, %579 : vector<16x144xi32>
    %581 = arith.ori %574, %580 : vector<16x144xi1>
    %582 = arith.extui %581 : vector<16x144xi1> to vector<16x144xi32>
    %583 = arith.sitofp %582 : vector<16x144xi32> to vector<16x144xf32>
    %584 = arith.truncf %583 : vector<16x144xf32> to vector<16x144xbf16>
    %c0_221 = arith.constant 0 : index
    %c0_222 = arith.constant 0 : index
    %585 = vector.load %arg3[%c0_221, %c0_222] : memref<720x32xbf16, #tpu.memory_space<vmem>>, vector<144x32xbf16>
    %cst_223 = arith.constant dense<0.000000e+00> : vector<16x32xf32>
    %586 = tpu.matmul %584, %585, %cst_223 {dimension_numbers = #tpu.dot_dimension_numbers<[1], [0], [0], [1], [0, 0, 1, 1], [], []>} : vector<16x144xbf16>, vector<144x32xbf16>, vector<16x32xf32> -> vector<16x32xf32>
    %c1_224 = arith.constant 1 : index
    %c0_225 = arith.constant 0 : index
    %587 = vector.load %arg2[%c1_224, %c0_225] : memref<32x128xf32, #tpu.memory_space<vmem>>, vector<1x32xf32>
    %c2_226 = arith.constant 2 : index
    %c0_227 = arith.constant 0 : index
    %588 = vector.load %arg2[%c2_226, %c0_227] : memref<32x128xf32, #tpu.memory_space<vmem>>, vector<1x32xf32>
    %cst_228 = arith.constant dense<0.000000e+00> : vector<16xf32>
    %589 = vector.multi_reduction <add>, %586, %cst_228 [1] : vector<16x32xf32> to vector<16xf32>
    %590 = vector.shape_cast %589 : vector<16xf32> to vector<16x1xf32>
    %cst_229 = arith.constant 3.200000e+01 : f32
    %591 = vector.broadcast %cst_229 : f32 to vector<16x1xf32>
    %592 = arith.divf %590, %591 : vector<16x1xf32>
    %593 = vector.broadcast %592 : vector<16x1xf32> to vector<16x32xf32>
    %594 = arith.subf %586, %593 : vector<16x32xf32>
    %595 = arith.mulf %594, %594 : vector<16x32xf32>
    %cst_230 = arith.constant dense<0.000000e+00> : vector<16xf32>
    %596 = vector.multi_reduction <add>, %595, %cst_230 [1] : vector<16x32xf32> to vector<16xf32>
    %597 = vector.shape_cast %596 : vector<16xf32> to vector<16x1xf32>
    %cst_231 = arith.constant 3.200000e+01 : f32
    %598 = vector.broadcast %cst_231 : f32 to vector<16x1xf32>
    %599 = arith.divf %597, %598 : vector<16x1xf32>
    %600 = vector.broadcast %592 : vector<16x1xf32> to vector<16x32xf32>
    %601 = arith.subf %586, %600 : vector<16x32xf32>
    %cst_232 = arith.constant 9.99999996E-13 : f32
    %602 = vector.broadcast %cst_232 : f32 to vector<16x1xf32>
    %603 = arith.addf %599, %602 : vector<16x1xf32>
    %604 = math.rsqrt %603 : vector<16x1xf32>
    %605 = vector.broadcast %604 : vector<16x1xf32> to vector<16x32xf32>
    %606 = arith.mulf %601, %605 : vector<16x32xf32>
    %607 = vector.broadcast %587 : vector<1x32xf32> to vector<16x32xf32>
    %608 = arith.mulf %606, %607 : vector<16x32xf32>
    %609 = vector.broadcast %588 : vector<1x32xf32> to vector<16x32xf32>
    %610 = arith.addf %608, %609 : vector<16x32xf32>
    %611 = arith.truncf %610 : vector<16x32xf32> to vector<16x32xbf16>
    %c144_233 = arith.constant 144 : index
    %c0_234 = arith.constant 0 : index
    %612 = vector.load %arg3[%c144_233, %c0_234] : memref<720x32xbf16, #tpu.memory_space<vmem>>, vector<32x32xbf16>
    %cst_235 = arith.constant dense<0.000000e+00> : vector<16x32xf32>
    %613 = tpu.matmul %611, %612, %cst_235 {dimension_numbers = #tpu.dot_dimension_numbers<[1], [0], [0], [1], [0, 0, 1, 1], [], []>} : vector<16x32xbf16>, vector<32x32xbf16>, vector<16x32xf32> -> vector<16x32xf32>
    %c8_236 = arith.constant 8 : index
    %c0_237 = arith.constant 0 : index
    %614 = vector.load %arg2[%c8_236, %c0_237] : memref<32x128xf32, #tpu.memory_space<vmem>>, vector<1x32xf32>
    %615 = vector.broadcast %614 : vector<1x32xf32> to vector<16x32xf32>
    %616 = arith.addf %613, %615 : vector<16x32xf32>
    %c176_238 = arith.constant 176 : index
    %c0_239 = arith.constant 0 : index
    %617 = vector.load %arg3[%c176_238, %c0_239] : memref<720x32xbf16, #tpu.memory_space<vmem>>, vector<32x32xbf16>
    %cst_240 = arith.constant dense<0.000000e+00> : vector<16x32xf32>
    %618 = tpu.matmul %611, %617, %cst_240 {dimension_numbers = #tpu.dot_dimension_numbers<[1], [0], [0], [1], [0, 0, 1, 1], [], []>} : vector<16x32xbf16>, vector<32x32xbf16>, vector<16x32xf32> -> vector<16x32xf32>
    %c9_241 = arith.constant 9 : index
    %c0_242 = arith.constant 0 : index
    %619 = vector.load %arg2[%c9_241, %c0_242] : memref<32x128xf32, #tpu.memory_space<vmem>>, vector<1x32xf32>
    %620 = vector.broadcast %619 : vector<1x32xf32> to vector<16x32xf32>
    %621 = arith.addf %618, %620 : vector<16x32xf32>
    %c208_243 = arith.constant 208 : index
    %c0_244 = arith.constant 0 : index
    %622 = vector.load %arg3[%c208_243, %c0_244] : memref<720x32xbf16, #tpu.memory_space<vmem>>, vector<32x32xbf16>
    %cst_245 = arith.constant dense<0.000000e+00> : vector<16x32xf32>
    %623 = tpu.matmul %611, %622, %cst_245 {dimension_numbers = #tpu.dot_dimension_numbers<[1], [0], [0], [1], [0, 0, 1, 1], [], []>} : vector<16x32xbf16>, vector<32x32xbf16>, vector<16x32xf32> -> vector<16x32xf32>
    %c10_246 = arith.constant 10 : index
    %c0_247 = arith.constant 0 : index
    %624 = vector.load %arg2[%c10_246, %c0_247] : memref<32x128xf32, #tpu.memory_space<vmem>>, vector<1x32xf32>
    %625 = vector.broadcast %624 : vector<1x32xf32> to vector<16x32xf32>
    %626 = arith.addf %623, %625 : vector<16x32xf32>
    %c11_248 = arith.constant 11 : index
    %c0_249 = arith.constant 0 : index
    %627 = vector.load %arg2[%c11_248, %c0_249] : memref<32x128xf32, #tpu.memory_space<vmem>>, vector<1x32xf32>
    %628 = vector.extract_strided_slice %616 {offsets = [0, 0], sizes = [16, 16], strides = [1, 1]} : vector<16x32xf32> to vector<16x16xf32>
    %629 = vector.extract_strided_slice %621 {offsets = [0, 0], sizes = [16, 16], strides = [1, 1]} : vector<16x32xf32> to vector<16x16xf32>
    %cst_250 = arith.constant dense<0.000000e+00> : vector<16x16xf32>
    %630 = tpu.matmul %628, %629, %cst_250 {dimension_numbers = #tpu.dot_dimension_numbers<[1], [1], [0], [0], [0, 0, 1, 0], [], []>} : vector<16x16xf32>, vector<16x16xf32>, vector<16x16xf32> -> vector<16x16xf32>
    %cst_251 = arith.constant 2.500000e-01 : f32
    %631 = vector.broadcast %cst_251 : f32 to vector<16x16xf32>
    %632 = arith.mulf %630, %631 : vector<16x16xf32>
    %633 = arith.addf %632, %3 : vector<16x16xf32>
    %cst_252 = arith.constant dense<0xFF800000> : vector<16xf32>
    %634 = vector.multi_reduction <maximumf>, %633, %cst_252 [1] : vector<16x16xf32> to vector<16xf32>
    %635 = vector.shape_cast %634 : vector<16xf32> to vector<16x1xf32>
    %636 = vector.broadcast %635 : vector<16x1xf32> to vector<16x16xf32>
    %637 = arith.subf %633, %636 : vector<16x16xf32>
    %638 = math.exp %637 : vector<16x16xf32>
    %cst_253 = arith.constant dense<0.000000e+00> : vector<16xf32>
    %639 = vector.multi_reduction <add>, %638, %cst_253 [1] : vector<16x16xf32> to vector<16xf32>
    %640 = vector.shape_cast %639 : vector<16xf32> to vector<16x1xf32>
    %641 = tpu.reciprocal %640 {approx = true} : vector<16x1xf32> -> vector<16x1xf32>
    %642 = vector.broadcast %641 : vector<16x1xf32> to vector<16x16xf32>
    %643 = arith.mulf %638, %642 : vector<16x16xf32>
    %644 = vector.extract_strided_slice %626 {offsets = [0, 0], sizes = [16, 16], strides = [1, 1]} : vector<16x32xf32> to vector<16x16xf32>
    %cst_254 = arith.constant dense<0.000000e+00> : vector<16x16xf32>
    %645 = tpu.matmul %643, %644, %cst_254 {dimension_numbers = #tpu.dot_dimension_numbers<[1], [0], [0], [1], [0, 0, 1, 1], [], []>} : vector<16x16xf32>, vector<16x16xf32>, vector<16x16xf32> -> vector<16x16xf32>
    %c240_255 = arith.constant 240 : index
    %c0_256 = arith.constant 0 : index
    %646 = vector.load %arg3[%c240_255, %c0_256] : memref<720x32xbf16, #tpu.memory_space<vmem>>, vector<16x32xbf16>
    %647 = arith.truncf %645 : vector<16x16xf32> to vector<16x16xbf16>
    %cst_257 = arith.constant dense<0.000000e+00> : vector<16x32xf32>
    %648 = tpu.matmul %647, %646, %cst_257 {dimension_numbers = #tpu.dot_dimension_numbers<[1], [0], [0], [1], [0, 0, 1, 1], [], []>} : vector<16x16xbf16>, vector<16x32xbf16>, vector<16x32xf32> -> vector<16x32xf32>
    %649 = vector.broadcast %627 : vector<1x32xf32> to vector<16x32xf32>
    %650 = arith.addf %649, %648 : vector<16x32xf32>
    %651 = vector.extract_strided_slice %616 {offsets = [0, 16], sizes = [16, 16], strides = [1, 1]} : vector<16x32xf32> to vector<16x16xf32>
    %652 = vector.extract_strided_slice %621 {offsets = [0, 16], sizes = [16, 16], strides = [1, 1]} : vector<16x32xf32> to vector<16x16xf32>
    %cst_258 = arith.constant dense<0.000000e+00> : vector<16x16xf32>
    %653 = tpu.matmul %651, %652, %cst_258 {dimension_numbers = #tpu.dot_dimension_numbers<[1], [1], [0], [0], [0, 0, 1, 0], [], []>} : vector<16x16xf32>, vector<16x16xf32>, vector<16x16xf32> -> vector<16x16xf32>
    %cst_259 = arith.constant 2.500000e-01 : f32
    %654 = vector.broadcast %cst_259 : f32 to vector<16x16xf32>
    %655 = arith.mulf %653, %654 : vector<16x16xf32>
    %656 = arith.addf %655, %3 : vector<16x16xf32>
    %cst_260 = arith.constant dense<0xFF800000> : vector<16xf32>
    %657 = vector.multi_reduction <maximumf>, %656, %cst_260 [1] : vector<16x16xf32> to vector<16xf32>
    %658 = vector.shape_cast %657 : vector<16xf32> to vector<16x1xf32>
    %659 = vector.broadcast %658 : vector<16x1xf32> to vector<16x16xf32>
    %660 = arith.subf %656, %659 : vector<16x16xf32>
    %661 = math.exp %660 : vector<16x16xf32>
    %cst_261 = arith.constant dense<0.000000e+00> : vector<16xf32>
    %662 = vector.multi_reduction <add>, %661, %cst_261 [1] : vector<16x16xf32> to vector<16xf32>
    %663 = vector.shape_cast %662 : vector<16xf32> to vector<16x1xf32>
    %664 = tpu.reciprocal %663 {approx = true} : vector<16x1xf32> -> vector<16x1xf32>
    %665 = vector.broadcast %664 : vector<16x1xf32> to vector<16x16xf32>
    %666 = arith.mulf %661, %665 : vector<16x16xf32>
    %667 = vector.extract_strided_slice %626 {offsets = [0, 16], sizes = [16, 16], strides = [1, 1]} : vector<16x32xf32> to vector<16x16xf32>
    %cst_262 = arith.constant dense<0.000000e+00> : vector<16x16xf32>
    %668 = tpu.matmul %666, %667, %cst_262 {dimension_numbers = #tpu.dot_dimension_numbers<[1], [0], [0], [1], [0, 0, 1, 1], [], []>} : vector<16x16xf32>, vector<16x16xf32>, vector<16x16xf32> -> vector<16x16xf32>
    %c256_263 = arith.constant 256 : index
    %c0_264 = arith.constant 0 : index
    %669 = vector.load %arg3[%c256_263, %c0_264] : memref<720x32xbf16, #tpu.memory_space<vmem>>, vector<16x32xbf16>
    %670 = arith.truncf %668 : vector<16x16xf32> to vector<16x16xbf16>
    %cst_265 = arith.constant dense<0.000000e+00> : vector<16x32xf32>
    %671 = tpu.matmul %670, %669, %cst_265 {dimension_numbers = #tpu.dot_dimension_numbers<[1], [0], [0], [1], [0, 0, 1, 1], [], []>} : vector<16x16xbf16>, vector<16x32xbf16>, vector<16x32xf32> -> vector<16x32xf32>
    %672 = arith.addf %650, %671 : vector<16x32xf32>
    %673 = arith.addf %610, %672 : vector<16x32xf32>
    %c12_266 = arith.constant 12 : index
    %c0_267 = arith.constant 0 : index
    %674 = vector.load %arg2[%c12_266, %c0_267] : memref<32x128xf32, #tpu.memory_space<vmem>>, vector<1x32xf32>
    %c13_268 = arith.constant 13 : index
    %c0_269 = arith.constant 0 : index
    %675 = vector.load %arg2[%c13_268, %c0_269] : memref<32x128xf32, #tpu.memory_space<vmem>>, vector<1x32xf32>
    %cst_270 = arith.constant dense<0.000000e+00> : vector<16xf32>
    %676 = vector.multi_reduction <add>, %673, %cst_270 [1] : vector<16x32xf32> to vector<16xf32>
    %677 = vector.shape_cast %676 : vector<16xf32> to vector<16x1xf32>
    %cst_271 = arith.constant 3.200000e+01 : f32
    %678 = vector.broadcast %cst_271 : f32 to vector<16x1xf32>
    %679 = arith.divf %677, %678 : vector<16x1xf32>
    %680 = vector.broadcast %679 : vector<16x1xf32> to vector<16x32xf32>
    %681 = arith.subf %673, %680 : vector<16x32xf32>
    %682 = arith.mulf %681, %681 : vector<16x32xf32>
    %cst_272 = arith.constant dense<0.000000e+00> : vector<16xf32>
    %683 = vector.multi_reduction <add>, %682, %cst_272 [1] : vector<16x32xf32> to vector<16xf32>
    %684 = vector.shape_cast %683 : vector<16xf32> to vector<16x1xf32>
    %cst_273 = arith.constant 3.200000e+01 : f32
    %685 = vector.broadcast %cst_273 : f32 to vector<16x1xf32>
    %686 = arith.divf %684, %685 : vector<16x1xf32>
    %687 = vector.broadcast %679 : vector<16x1xf32> to vector<16x32xf32>
    %688 = arith.subf %673, %687 : vector<16x32xf32>
    %cst_274 = arith.constant 9.99999996E-13 : f32
    %689 = vector.broadcast %cst_274 : f32 to vector<16x1xf32>
    %690 = arith.addf %686, %689 : vector<16x1xf32>
    %691 = math.rsqrt %690 : vector<16x1xf32>
    %692 = vector.broadcast %691 : vector<16x1xf32> to vector<16x32xf32>
    %693 = arith.mulf %688, %692 : vector<16x32xf32>
    %694 = vector.broadcast %674 : vector<1x32xf32> to vector<16x32xf32>
    %695 = arith.mulf %693, %694 : vector<16x32xf32>
    %696 = vector.broadcast %675 : vector<1x32xf32> to vector<16x32xf32>
    %697 = arith.addf %695, %696 : vector<16x32xf32>
    %698 = arith.truncf %697 : vector<16x32xf32> to vector<16x32xbf16>
    %c272_275 = arith.constant 272 : index
    %c0_276 = arith.constant 0 : index
    %699 = vector.load %arg3[%c272_275, %c0_276] : memref<720x32xbf16, #tpu.memory_space<vmem>>, vector<32x32xbf16>
    %cst_277 = arith.constant dense<0.000000e+00> : vector<16x32xf32>
    %700 = tpu.matmul %698, %699, %cst_277 {dimension_numbers = #tpu.dot_dimension_numbers<[1], [0], [0], [1], [0, 0, 1, 1], [], []>} : vector<16x32xbf16>, vector<32x32xbf16>, vector<16x32xf32> -> vector<16x32xf32>
    %c14_278 = arith.constant 14 : index
    %c0_279 = arith.constant 0 : index
    %701 = vector.load %arg2[%c14_278, %c0_279] : memref<32x128xf32, #tpu.memory_space<vmem>>, vector<1x32xf32>
    %702 = vector.broadcast %701 : vector<1x32xf32> to vector<16x32xf32>
    %703 = arith.addf %700, %702 : vector<16x32xf32>
    %c304_280 = arith.constant 304 : index
    %c0_281 = arith.constant 0 : index
    %704 = vector.load %arg3[%c304_280, %c0_281] : memref<720x32xbf16, #tpu.memory_space<vmem>>, vector<32x32xbf16>
    %cst_282 = arith.constant dense<0.000000e+00> : vector<16x32xf32>
    %705 = tpu.matmul %698, %704, %cst_282 {dimension_numbers = #tpu.dot_dimension_numbers<[1], [0], [0], [1], [0, 0, 1, 1], [], []>} : vector<16x32xbf16>, vector<32x32xbf16>, vector<16x32xf32> -> vector<16x32xf32>
    %c15_283 = arith.constant 15 : index
    %c0_284 = arith.constant 0 : index
    %706 = vector.load %arg2[%c15_283, %c0_284] : memref<32x128xf32, #tpu.memory_space<vmem>>, vector<1x32xf32>
    %707 = vector.broadcast %706 : vector<1x32xf32> to vector<16x32xf32>
    %708 = arith.addf %705, %707 : vector<16x32xf32>
    %cst_285 = arith.constant 5.000000e-01 : f32
    %709 = vector.broadcast %cst_285 : f32 to vector<16x32xf32>
    %710 = arith.mulf %709, %703 : vector<16x32xf32>
    %cst_286 = arith.constant 0.707106769 : f32
    %711 = vector.broadcast %cst_286 : f32 to vector<16x32xf32>
    %712 = arith.mulf %703, %711 : vector<16x32xf32>
    %cst_287 = arith.constant 0.000000e+00 : f32
    %713 = vector.broadcast %cst_287 : f32 to vector<16x32xf32>
    %714 = arith.cmpf oge, %712, %713 : vector<16x32xf32>
    %cst_288 = arith.constant 1.000000e+00 : f32
    %cst_289 = arith.constant -1.000000e+00 : f32
    %715 = vector.broadcast %cst_288 : f32 to vector<16x32xf32>
    %716 = vector.broadcast %cst_289 : f32 to vector<16x32xf32>
    %717 = arith.select %714, %715, %716 : vector<16x32xi1>, vector<16x32xf32>
    %718 = math.absf %712 : vector<16x32xf32>
    %cst_290 = arith.constant 0.327591091 : f32
    %719 = vector.broadcast %cst_290 : f32 to vector<16x32xf32>
    %720 = arith.mulf %719, %718 : vector<16x32xf32>
    %cst_291 = arith.constant 1.000000e+00 : f32
    %721 = vector.broadcast %cst_291 : f32 to vector<16x32xf32>
    %722 = arith.addf %721, %720 : vector<16x32xf32>
    %723 = tpu.reciprocal %722 {approx = true} : vector<16x32xf32> -> vector<16x32xf32>
    %cst_292 = arith.constant 1.06140542 : f32
    %724 = vector.broadcast %cst_292 : f32 to vector<16x32xf32>
    %725 = arith.mulf %723, %724 : vector<16x32xf32>
    %cst_293 = arith.constant -1.45315206 : f32
    %726 = vector.broadcast %cst_293 : f32 to vector<16x32xf32>
    %727 = arith.addf %726, %725 : vector<16x32xf32>
    %728 = arith.mulf %723, %727 : vector<16x32xf32>
    %cst_294 = arith.constant 1.42141378 : f32
    %729 = vector.broadcast %cst_294 : f32 to vector<16x32xf32>
    %730 = arith.addf %729, %728 : vector<16x32xf32>
    %731 = arith.mulf %723, %730 : vector<16x32xf32>
    %cst_295 = arith.constant -0.284496725 : f32
    %732 = vector.broadcast %cst_295 : f32 to vector<16x32xf32>
    %733 = arith.addf %732, %731 : vector<16x32xf32>
    %734 = arith.mulf %723, %733 : vector<16x32xf32>
    %cst_296 = arith.constant 0.254829586 : f32
    %735 = vector.broadcast %cst_296 : f32 to vector<16x32xf32>
    %736 = arith.addf %735, %734 : vector<16x32xf32>
    %737 = arith.mulf %723, %736 : vector<16x32xf32>
    %cst_297 = arith.constant 0.000000e+00 : f32
    %738 = vector.broadcast %cst_297 : f32 to vector<16x32xf32>
    %739 = arith.subf %738, %718 : vector<16x32xf32>
    %740 = arith.mulf %739, %718 : vector<16x32xf32>
    %741 = math.exp %740 : vector<16x32xf32>
    %742 = arith.mulf %737, %741 : vector<16x32xf32>
    %cst_298 = arith.constant 1.000000e+00 : f32
    %743 = vector.broadcast %cst_298 : f32 to vector<16x32xf32>
    %744 = arith.subf %743, %742 : vector<16x32xf32>
    %745 = arith.mulf %717, %744 : vector<16x32xf32>
    %cst_299 = arith.constant 1.000000e+00 : f32
    %746 = vector.broadcast %cst_299 : f32 to vector<16x32xf32>
    %747 = arith.addf %746, %745 : vector<16x32xf32>
    %748 = arith.mulf %710, %747 : vector<16x32xf32>
    %749 = arith.truncf %748 : vector<16x32xf32> to vector<16x32xbf16>
    %c336_300 = arith.constant 336 : index
    %c0_301 = arith.constant 0 : index
    %750 = vector.load %arg3[%c336_300, %c0_301] : memref<720x32xbf16, #tpu.memory_space<vmem>>, vector<32x32xbf16>
    %cst_302 = arith.constant dense<0.000000e+00> : vector<16x32xf32>
    %751 = tpu.matmul %749, %750, %cst_302 {dimension_numbers = #tpu.dot_dimension_numbers<[1], [0], [0], [1], [0, 0, 1, 1], [], []>} : vector<16x32xbf16>, vector<32x32xbf16>, vector<16x32xf32> -> vector<16x32xf32>
    %cst_303 = arith.constant 5.000000e-01 : f32
    %752 = vector.broadcast %cst_303 : f32 to vector<16x32xf32>
    %753 = arith.mulf %752, %708 : vector<16x32xf32>
    %cst_304 = arith.constant 0.707106769 : f32
    %754 = vector.broadcast %cst_304 : f32 to vector<16x32xf32>
    %755 = arith.mulf %708, %754 : vector<16x32xf32>
    %cst_305 = arith.constant 0.000000e+00 : f32
    %756 = vector.broadcast %cst_305 : f32 to vector<16x32xf32>
    %757 = arith.cmpf oge, %755, %756 : vector<16x32xf32>
    %cst_306 = arith.constant 1.000000e+00 : f32
    %cst_307 = arith.constant -1.000000e+00 : f32
    %758 = vector.broadcast %cst_306 : f32 to vector<16x32xf32>
    %759 = vector.broadcast %cst_307 : f32 to vector<16x32xf32>
    %760 = arith.select %757, %758, %759 : vector<16x32xi1>, vector<16x32xf32>
    %761 = math.absf %755 : vector<16x32xf32>
    %cst_308 = arith.constant 0.327591091 : f32
    %762 = vector.broadcast %cst_308 : f32 to vector<16x32xf32>
    %763 = arith.mulf %762, %761 : vector<16x32xf32>
    %cst_309 = arith.constant 1.000000e+00 : f32
    %764 = vector.broadcast %cst_309 : f32 to vector<16x32xf32>
    %765 = arith.addf %764, %763 : vector<16x32xf32>
    %766 = tpu.reciprocal %765 {approx = true} : vector<16x32xf32> -> vector<16x32xf32>
    %cst_310 = arith.constant 1.06140542 : f32
    %767 = vector.broadcast %cst_310 : f32 to vector<16x32xf32>
    %768 = arith.mulf %766, %767 : vector<16x32xf32>
    %cst_311 = arith.constant -1.45315206 : f32
    %769 = vector.broadcast %cst_311 : f32 to vector<16x32xf32>
    %770 = arith.addf %769, %768 : vector<16x32xf32>
    %771 = arith.mulf %766, %770 : vector<16x32xf32>
    %cst_312 = arith.constant 1.42141378 : f32
    %772 = vector.broadcast %cst_312 : f32 to vector<16x32xf32>
    %773 = arith.addf %772, %771 : vector<16x32xf32>
    %774 = arith.mulf %766, %773 : vector<16x32xf32>
    %cst_313 = arith.constant -0.284496725 : f32
    %775 = vector.broadcast %cst_313 : f32 to vector<16x32xf32>
    %776 = arith.addf %775, %774 : vector<16x32xf32>
    %777 = arith.mulf %766, %776 : vector<16x32xf32>
    %cst_314 = arith.constant 0.254829586 : f32
    %778 = vector.broadcast %cst_314 : f32 to vector<16x32xf32>
    %779 = arith.addf %778, %777 : vector<16x32xf32>
    %780 = arith.mulf %766, %779 : vector<16x32xf32>
    %cst_315 = arith.constant 0.000000e+00 : f32
    %781 = vector.broadcast %cst_315 : f32 to vector<16x32xf32>
    %782 = arith.subf %781, %761 : vector<16x32xf32>
    %783 = arith.mulf %782, %761 : vector<16x32xf32>
    %784 = math.exp %783 : vector<16x32xf32>
    %785 = arith.mulf %780, %784 : vector<16x32xf32>
    %cst_316 = arith.constant 1.000000e+00 : f32
    %786 = vector.broadcast %cst_316 : f32 to vector<16x32xf32>
    %787 = arith.subf %786, %785 : vector<16x32xf32>
    %788 = arith.mulf %760, %787 : vector<16x32xf32>
    %cst_317 = arith.constant 1.000000e+00 : f32
    %789 = vector.broadcast %cst_317 : f32 to vector<16x32xf32>
    %790 = arith.addf %789, %788 : vector<16x32xf32>
    %791 = arith.mulf %753, %790 : vector<16x32xf32>
    %792 = arith.truncf %791 : vector<16x32xf32> to vector<16x32xbf16>
    %c368_318 = arith.constant 368 : index
    %c0_319 = arith.constant 0 : index
    %793 = vector.load %arg3[%c368_318, %c0_319] : memref<720x32xbf16, #tpu.memory_space<vmem>>, vector<32x32xbf16>
    %cst_320 = arith.constant dense<0.000000e+00> : vector<16x32xf32>
    %794 = tpu.matmul %792, %793, %cst_320 {dimension_numbers = #tpu.dot_dimension_numbers<[1], [0], [0], [1], [0, 0, 1, 1], [], []>} : vector<16x32xbf16>, vector<32x32xbf16>, vector<16x32xf32> -> vector<16x32xf32>
    %795 = arith.addf %751, %794 : vector<16x32xf32>
    %c16_321 = arith.constant 16 : index
    %c0_322 = arith.constant 0 : index
    %796 = vector.load %arg2[%c16_321, %c0_322] : memref<32x128xf32, #tpu.memory_space<vmem>>, vector<1x32xf32>
    %797 = vector.broadcast %796 : vector<1x32xf32> to vector<16x32xf32>
    %798 = arith.addf %795, %797 : vector<16x32xf32>
    %799 = arith.addf %697, %798 : vector<16x32xf32>
    %c17_323 = arith.constant 17 : index
    %c0_324 = arith.constant 0 : index
    %800 = vector.load %arg2[%c17_323, %c0_324] : memref<32x128xf32, #tpu.memory_space<vmem>>, vector<1x32xf32>
    %c18_325 = arith.constant 18 : index
    %c0_326 = arith.constant 0 : index
    %801 = vector.load %arg2[%c18_325, %c0_326] : memref<32x128xf32, #tpu.memory_space<vmem>>, vector<1x32xf32>
    %cst_327 = arith.constant dense<0.000000e+00> : vector<16xf32>
    %802 = vector.multi_reduction <add>, %799, %cst_327 [1] : vector<16x32xf32> to vector<16xf32>
    %803 = vector.shape_cast %802 : vector<16xf32> to vector<16x1xf32>
    %cst_328 = arith.constant 3.200000e+01 : f32
    %804 = vector.broadcast %cst_328 : f32 to vector<16x1xf32>
    %805 = arith.divf %803, %804 : vector<16x1xf32>
    %806 = vector.broadcast %805 : vector<16x1xf32> to vector<16x32xf32>
    %807 = arith.subf %799, %806 : vector<16x32xf32>
    %808 = arith.mulf %807, %807 : vector<16x32xf32>
    %cst_329 = arith.constant dense<0.000000e+00> : vector<16xf32>
    %809 = vector.multi_reduction <add>, %808, %cst_329 [1] : vector<16x32xf32> to vector<16xf32>
    %810 = vector.shape_cast %809 : vector<16xf32> to vector<16x1xf32>
    %cst_330 = arith.constant 3.200000e+01 : f32
    %811 = vector.broadcast %cst_330 : f32 to vector<16x1xf32>
    %812 = arith.divf %810, %811 : vector<16x1xf32>
    %813 = vector.broadcast %805 : vector<16x1xf32> to vector<16x32xf32>
    %814 = arith.subf %799, %813 : vector<16x32xf32>
    %cst_331 = arith.constant 9.99999996E-13 : f32
    %815 = vector.broadcast %cst_331 : f32 to vector<16x1xf32>
    %816 = arith.addf %812, %815 : vector<16x1xf32>
    %817 = math.rsqrt %816 : vector<16x1xf32>
    %818 = vector.broadcast %817 : vector<16x1xf32> to vector<16x32xf32>
    %819 = arith.mulf %814, %818 : vector<16x32xf32>
    %820 = vector.broadcast %800 : vector<1x32xf32> to vector<16x32xf32>
    %821 = arith.mulf %819, %820 : vector<16x32xf32>
    %822 = vector.broadcast %801 : vector<1x32xf32> to vector<16x32xf32>
    %823 = arith.addf %821, %822 : vector<16x32xf32>
    %824 = arith.truncf %823 : vector<16x32xf32> to vector<16x32xbf16>
    %c400_332 = arith.constant 400 : index
    %c0_333 = arith.constant 0 : index
    %825 = vector.load %arg3[%c400_332, %c0_333] : memref<720x32xbf16, #tpu.memory_space<vmem>>, vector<32x32xbf16>
    %cst_334 = arith.constant dense<0.000000e+00> : vector<16x32xf32>
    %826 = tpu.matmul %824, %825, %cst_334 {dimension_numbers = #tpu.dot_dimension_numbers<[1], [0], [0], [1], [0, 0, 1, 1], [], []>} : vector<16x32xbf16>, vector<32x32xbf16>, vector<16x32xf32> -> vector<16x32xf32>
    %c20_335 = arith.constant 20 : index
    %c0_336 = arith.constant 0 : index
    %827 = vector.load %arg2[%c20_335, %c0_336] : memref<32x128xf32, #tpu.memory_space<vmem>>, vector<1x32xf32>
    %828 = vector.broadcast %827 : vector<1x32xf32> to vector<16x32xf32>
    %829 = arith.addf %826, %828 : vector<16x32xf32>
    %c432_337 = arith.constant 432 : index
    %c0_338 = arith.constant 0 : index
    %830 = vector.load %arg3[%c432_337, %c0_338] : memref<720x32xbf16, #tpu.memory_space<vmem>>, vector<32x32xbf16>
    %cst_339 = arith.constant dense<0.000000e+00> : vector<16x32xf32>
    %831 = tpu.matmul %824, %830, %cst_339 {dimension_numbers = #tpu.dot_dimension_numbers<[1], [0], [0], [1], [0, 0, 1, 1], [], []>} : vector<16x32xbf16>, vector<32x32xbf16>, vector<16x32xf32> -> vector<16x32xf32>
    %c21_340 = arith.constant 21 : index
    %c0_341 = arith.constant 0 : index
    %832 = vector.load %arg2[%c21_340, %c0_341] : memref<32x128xf32, #tpu.memory_space<vmem>>, vector<1x32xf32>
    %833 = vector.broadcast %832 : vector<1x32xf32> to vector<16x32xf32>
    %834 = arith.addf %831, %833 : vector<16x32xf32>
    %c464_342 = arith.constant 464 : index
    %c0_343 = arith.constant 0 : index
    %835 = vector.load %arg3[%c464_342, %c0_343] : memref<720x32xbf16, #tpu.memory_space<vmem>>, vector<32x32xbf16>
    %cst_344 = arith.constant dense<0.000000e+00> : vector<16x32xf32>
    %836 = tpu.matmul %824, %835, %cst_344 {dimension_numbers = #tpu.dot_dimension_numbers<[1], [0], [0], [1], [0, 0, 1, 1], [], []>} : vector<16x32xbf16>, vector<32x32xbf16>, vector<16x32xf32> -> vector<16x32xf32>
    %c22_345 = arith.constant 22 : index
    %c0_346 = arith.constant 0 : index
    %837 = vector.load %arg2[%c22_345, %c0_346] : memref<32x128xf32, #tpu.memory_space<vmem>>, vector<1x32xf32>
    %838 = vector.broadcast %837 : vector<1x32xf32> to vector<16x32xf32>
    %839 = arith.addf %836, %838 : vector<16x32xf32>
    %c23_347 = arith.constant 23 : index
    %c0_348 = arith.constant 0 : index
    %840 = vector.load %arg2[%c23_347, %c0_348] : memref<32x128xf32, #tpu.memory_space<vmem>>, vector<1x32xf32>
    %841 = vector.extract_strided_slice %829 {offsets = [0, 0], sizes = [16, 16], strides = [1, 1]} : vector<16x32xf32> to vector<16x16xf32>
    %842 = vector.extract_strided_slice %834 {offsets = [0, 0], sizes = [16, 16], strides = [1, 1]} : vector<16x32xf32> to vector<16x16xf32>
    %cst_349 = arith.constant dense<0.000000e+00> : vector<16x16xf32>
    %843 = tpu.matmul %841, %842, %cst_349 {dimension_numbers = #tpu.dot_dimension_numbers<[1], [1], [0], [0], [0, 0, 1, 0], [], []>} : vector<16x16xf32>, vector<16x16xf32>, vector<16x16xf32> -> vector<16x16xf32>
    %cst_350 = arith.constant 2.500000e-01 : f32
    %844 = vector.broadcast %cst_350 : f32 to vector<16x16xf32>
    %845 = arith.mulf %843, %844 : vector<16x16xf32>
    %846 = arith.addf %845, %3 : vector<16x16xf32>
    %cst_351 = arith.constant dense<0xFF800000> : vector<16xf32>
    %847 = vector.multi_reduction <maximumf>, %846, %cst_351 [1] : vector<16x16xf32> to vector<16xf32>
    %848 = vector.shape_cast %847 : vector<16xf32> to vector<16x1xf32>
    %849 = vector.broadcast %848 : vector<16x1xf32> to vector<16x16xf32>
    %850 = arith.subf %846, %849 : vector<16x16xf32>
    %851 = math.exp %850 : vector<16x16xf32>
    %cst_352 = arith.constant dense<0.000000e+00> : vector<16xf32>
    %852 = vector.multi_reduction <add>, %851, %cst_352 [1] : vector<16x16xf32> to vector<16xf32>
    %853 = vector.shape_cast %852 : vector<16xf32> to vector<16x1xf32>
    %854 = tpu.reciprocal %853 {approx = true} : vector<16x1xf32> -> vector<16x1xf32>
    %855 = vector.broadcast %854 : vector<16x1xf32> to vector<16x16xf32>
    %856 = arith.mulf %851, %855 : vector<16x16xf32>
    %857 = vector.extract_strided_slice %839 {offsets = [0, 0], sizes = [16, 16], strides = [1, 1]} : vector<16x32xf32> to vector<16x16xf32>
    %cst_353 = arith.constant dense<0.000000e+00> : vector<16x16xf32>
    %858 = tpu.matmul %856, %857, %cst_353 {dimension_numbers = #tpu.dot_dimension_numbers<[1], [0], [0], [1], [0, 0, 1, 1], [], []>} : vector<16x16xf32>, vector<16x16xf32>, vector<16x16xf32> -> vector<16x16xf32>
    %c496_354 = arith.constant 496 : index
    %c0_355 = arith.constant 0 : index
    %859 = vector.load %arg3[%c496_354, %c0_355] : memref<720x32xbf16, #tpu.memory_space<vmem>>, vector<16x32xbf16>
    %860 = arith.truncf %858 : vector<16x16xf32> to vector<16x16xbf16>
    %cst_356 = arith.constant dense<0.000000e+00> : vector<16x32xf32>
    %861 = tpu.matmul %860, %859, %cst_356 {dimension_numbers = #tpu.dot_dimension_numbers<[1], [0], [0], [1], [0, 0, 1, 1], [], []>} : vector<16x16xbf16>, vector<16x32xbf16>, vector<16x32xf32> -> vector<16x32xf32>
    %862 = vector.broadcast %840 : vector<1x32xf32> to vector<16x32xf32>
    %863 = arith.addf %862, %861 : vector<16x32xf32>
    %864 = vector.extract_strided_slice %829 {offsets = [0, 16], sizes = [16, 16], strides = [1, 1]} : vector<16x32xf32> to vector<16x16xf32>
    %865 = vector.extract_strided_slice %834 {offsets = [0, 16], sizes = [16, 16], strides = [1, 1]} : vector<16x32xf32> to vector<16x16xf32>
    %cst_357 = arith.constant dense<0.000000e+00> : vector<16x16xf32>
    %866 = tpu.matmul %864, %865, %cst_357 {dimension_numbers = #tpu.dot_dimension_numbers<[1], [1], [0], [0], [0, 0, 1, 0], [], []>} : vector<16x16xf32>, vector<16x16xf32>, vector<16x16xf32> -> vector<16x16xf32>
    %cst_358 = arith.constant 2.500000e-01 : f32
    %867 = vector.broadcast %cst_358 : f32 to vector<16x16xf32>
    %868 = arith.mulf %866, %867 : vector<16x16xf32>
    %869 = arith.addf %868, %3 : vector<16x16xf32>
    %cst_359 = arith.constant dense<0xFF800000> : vector<16xf32>
    %870 = vector.multi_reduction <maximumf>, %869, %cst_359 [1] : vector<16x16xf32> to vector<16xf32>
    %871 = vector.shape_cast %870 : vector<16xf32> to vector<16x1xf32>
    %872 = vector.broadcast %871 : vector<16x1xf32> to vector<16x16xf32>
    %873 = arith.subf %869, %872 : vector<16x16xf32>
    %874 = math.exp %873 : vector<16x16xf32>
    %cst_360 = arith.constant dense<0.000000e+00> : vector<16xf32>
    %875 = vector.multi_reduction <add>, %874, %cst_360 [1] : vector<16x16xf32> to vector<16xf32>
    %876 = vector.shape_cast %875 : vector<16xf32> to vector<16x1xf32>
    %877 = tpu.reciprocal %876 {approx = true} : vector<16x1xf32> -> vector<16x1xf32>
    %878 = vector.broadcast %877 : vector<16x1xf32> to vector<16x16xf32>
    %879 = arith.mulf %874, %878 : vector<16x16xf32>
    %880 = vector.extract_strided_slice %839 {offsets = [0, 16], sizes = [16, 16], strides = [1, 1]} : vector<16x32xf32> to vector<16x16xf32>
    %cst_361 = arith.constant dense<0.000000e+00> : vector<16x16xf32>
    %881 = tpu.matmul %879, %880, %cst_361 {dimension_numbers = #tpu.dot_dimension_numbers<[1], [0], [0], [1], [0, 0, 1, 1], [], []>} : vector<16x16xf32>, vector<16x16xf32>, vector<16x16xf32> -> vector<16x16xf32>
    %c512_362 = arith.constant 512 : index
    %c0_363 = arith.constant 0 : index
    %882 = vector.load %arg3[%c512_362, %c0_363] : memref<720x32xbf16, #tpu.memory_space<vmem>>, vector<16x32xbf16>
    %883 = arith.truncf %881 : vector<16x16xf32> to vector<16x16xbf16>
    %cst_364 = arith.constant dense<0.000000e+00> : vector<16x32xf32>
    %884 = tpu.matmul %883, %882, %cst_364 {dimension_numbers = #tpu.dot_dimension_numbers<[1], [0], [0], [1], [0, 0, 1, 1], [], []>} : vector<16x16xbf16>, vector<16x32xbf16>, vector<16x32xf32> -> vector<16x32xf32>
    %885 = arith.addf %863, %884 : vector<16x32xf32>
    %886 = arith.addf %823, %885 : vector<16x32xf32>
    %c24_365 = arith.constant 24 : index
    %c0_366 = arith.constant 0 : index
    %887 = vector.load %arg2[%c24_365, %c0_366] : memref<32x128xf32, #tpu.memory_space<vmem>>, vector<1x32xf32>
    %c25_367 = arith.constant 25 : index
    %c0_368 = arith.constant 0 : index
    %888 = vector.load %arg2[%c25_367, %c0_368] : memref<32x128xf32, #tpu.memory_space<vmem>>, vector<1x32xf32>
    %cst_369 = arith.constant dense<0.000000e+00> : vector<16xf32>
    %889 = vector.multi_reduction <add>, %886, %cst_369 [1] : vector<16x32xf32> to vector<16xf32>
    %890 = vector.shape_cast %889 : vector<16xf32> to vector<16x1xf32>
    %cst_370 = arith.constant 3.200000e+01 : f32
    %891 = vector.broadcast %cst_370 : f32 to vector<16x1xf32>
    %892 = arith.divf %890, %891 : vector<16x1xf32>
    %893 = vector.broadcast %892 : vector<16x1xf32> to vector<16x32xf32>
    %894 = arith.subf %886, %893 : vector<16x32xf32>
    %895 = arith.mulf %894, %894 : vector<16x32xf32>
    %cst_371 = arith.constant dense<0.000000e+00> : vector<16xf32>
    %896 = vector.multi_reduction <add>, %895, %cst_371 [1] : vector<16x32xf32> to vector<16xf32>
    %897 = vector.shape_cast %896 : vector<16xf32> to vector<16x1xf32>
    %cst_372 = arith.constant 3.200000e+01 : f32
    %898 = vector.broadcast %cst_372 : f32 to vector<16x1xf32>
    %899 = arith.divf %897, %898 : vector<16x1xf32>
    %900 = vector.broadcast %892 : vector<16x1xf32> to vector<16x32xf32>
    %901 = arith.subf %886, %900 : vector<16x32xf32>
    %cst_373 = arith.constant 9.99999996E-13 : f32
    %902 = vector.broadcast %cst_373 : f32 to vector<16x1xf32>
    %903 = arith.addf %899, %902 : vector<16x1xf32>
    %904 = math.rsqrt %903 : vector<16x1xf32>
    %905 = vector.broadcast %904 : vector<16x1xf32> to vector<16x32xf32>
    %906 = arith.mulf %901, %905 : vector<16x32xf32>
    %907 = vector.broadcast %887 : vector<1x32xf32> to vector<16x32xf32>
    %908 = arith.mulf %906, %907 : vector<16x32xf32>
    %909 = vector.broadcast %888 : vector<1x32xf32> to vector<16x32xf32>
    %910 = arith.addf %908, %909 : vector<16x32xf32>
    %911 = arith.truncf %910 : vector<16x32xf32> to vector<16x32xbf16>
    %c528_374 = arith.constant 528 : index
    %c0_375 = arith.constant 0 : index
    %912 = vector.load %arg3[%c528_374, %c0_375] : memref<720x32xbf16, #tpu.memory_space<vmem>>, vector<32x32xbf16>
    %cst_376 = arith.constant dense<0.000000e+00> : vector<16x32xf32>
    %913 = tpu.matmul %911, %912, %cst_376 {dimension_numbers = #tpu.dot_dimension_numbers<[1], [0], [0], [1], [0, 0, 1, 1], [], []>} : vector<16x32xbf16>, vector<32x32xbf16>, vector<16x32xf32> -> vector<16x32xf32>
    %c26_377 = arith.constant 26 : index
    %c0_378 = arith.constant 0 : index
    %914 = vector.load %arg2[%c26_377, %c0_378] : memref<32x128xf32, #tpu.memory_space<vmem>>, vector<1x32xf32>
    %915 = vector.broadcast %914 : vector<1x32xf32> to vector<16x32xf32>
    %916 = arith.addf %913, %915 : vector<16x32xf32>
    %c560_379 = arith.constant 560 : index
    %c0_380 = arith.constant 0 : index
    %917 = vector.load %arg3[%c560_379, %c0_380] : memref<720x32xbf16, #tpu.memory_space<vmem>>, vector<32x32xbf16>
    %cst_381 = arith.constant dense<0.000000e+00> : vector<16x32xf32>
    %918 = tpu.matmul %911, %917, %cst_381 {dimension_numbers = #tpu.dot_dimension_numbers<[1], [0], [0], [1], [0, 0, 1, 1], [], []>} : vector<16x32xbf16>, vector<32x32xbf16>, vector<16x32xf32> -> vector<16x32xf32>
    %c27_382 = arith.constant 27 : index
    %c0_383 = arith.constant 0 : index
    %919 = vector.load %arg2[%c27_382, %c0_383] : memref<32x128xf32, #tpu.memory_space<vmem>>, vector<1x32xf32>
    %920 = vector.broadcast %919 : vector<1x32xf32> to vector<16x32xf32>
    %921 = arith.addf %918, %920 : vector<16x32xf32>
    %cst_384 = arith.constant 5.000000e-01 : f32
    %922 = vector.broadcast %cst_384 : f32 to vector<16x32xf32>
    %923 = arith.mulf %922, %916 : vector<16x32xf32>
    %cst_385 = arith.constant 0.707106769 : f32
    %924 = vector.broadcast %cst_385 : f32 to vector<16x32xf32>
    %925 = arith.mulf %916, %924 : vector<16x32xf32>
    %cst_386 = arith.constant 0.000000e+00 : f32
    %926 = vector.broadcast %cst_386 : f32 to vector<16x32xf32>
    %927 = arith.cmpf oge, %925, %926 : vector<16x32xf32>
    %cst_387 = arith.constant 1.000000e+00 : f32
    %cst_388 = arith.constant -1.000000e+00 : f32
    %928 = vector.broadcast %cst_387 : f32 to vector<16x32xf32>
    %929 = vector.broadcast %cst_388 : f32 to vector<16x32xf32>
    %930 = arith.select %927, %928, %929 : vector<16x32xi1>, vector<16x32xf32>
    %931 = math.absf %925 : vector<16x32xf32>
    %cst_389 = arith.constant 0.327591091 : f32
    %932 = vector.broadcast %cst_389 : f32 to vector<16x32xf32>
    %933 = arith.mulf %932, %931 : vector<16x32xf32>
    %cst_390 = arith.constant 1.000000e+00 : f32
    %934 = vector.broadcast %cst_390 : f32 to vector<16x32xf32>
    %935 = arith.addf %934, %933 : vector<16x32xf32>
    %936 = tpu.reciprocal %935 {approx = true} : vector<16x32xf32> -> vector<16x32xf32>
    %cst_391 = arith.constant 1.06140542 : f32
    %937 = vector.broadcast %cst_391 : f32 to vector<16x32xf32>
    %938 = arith.mulf %936, %937 : vector<16x32xf32>
    %cst_392 = arith.constant -1.45315206 : f32
    %939 = vector.broadcast %cst_392 : f32 to vector<16x32xf32>
    %940 = arith.addf %939, %938 : vector<16x32xf32>
    %941 = arith.mulf %936, %940 : vector<16x32xf32>
    %cst_393 = arith.constant 1.42141378 : f32
    %942 = vector.broadcast %cst_393 : f32 to vector<16x32xf32>
    %943 = arith.addf %942, %941 : vector<16x32xf32>
    %944 = arith.mulf %936, %943 : vector<16x32xf32>
    %cst_394 = arith.constant -0.284496725 : f32
    %945 = vector.broadcast %cst_394 : f32 to vector<16x32xf32>
    %946 = arith.addf %945, %944 : vector<16x32xf32>
    %947 = arith.mulf %936, %946 : vector<16x32xf32>
    %cst_395 = arith.constant 0.254829586 : f32
    %948 = vector.broadcast %cst_395 : f32 to vector<16x32xf32>
    %949 = arith.addf %948, %947 : vector<16x32xf32>
    %950 = arith.mulf %936, %949 : vector<16x32xf32>
    %cst_396 = arith.constant 0.000000e+00 : f32
    %951 = vector.broadcast %cst_396 : f32 to vector<16x32xf32>
    %952 = arith.subf %951, %931 : vector<16x32xf32>
    %953 = arith.mulf %952, %931 : vector<16x32xf32>
    %954 = math.exp %953 : vector<16x32xf32>
    %955 = arith.mulf %950, %954 : vector<16x32xf32>
    %cst_397 = arith.constant 1.000000e+00 : f32
    %956 = vector.broadcast %cst_397 : f32 to vector<16x32xf32>
    %957 = arith.subf %956, %955 : vector<16x32xf32>
    %958 = arith.mulf %930, %957 : vector<16x32xf32>
    %cst_398 = arith.constant 1.000000e+00 : f32
    %959 = vector.broadcast %cst_398 : f32 to vector<16x32xf32>
    %960 = arith.addf %959, %958 : vector<16x32xf32>
    %961 = arith.mulf %923, %960 : vector<16x32xf32>
    %962 = arith.truncf %961 : vector<16x32xf32> to vector<16x32xbf16>
    %c592_399 = arith.constant 592 : index
    %c0_400 = arith.constant 0 : index
    %963 = vector.load %arg3[%c592_399, %c0_400] : memref<720x32xbf16, #tpu.memory_space<vmem>>, vector<32x32xbf16>
    %cst_401 = arith.constant dense<0.000000e+00> : vector<16x32xf32>
    %964 = tpu.matmul %962, %963, %cst_401 {dimension_numbers = #tpu.dot_dimension_numbers<[1], [0], [0], [1], [0, 0, 1, 1], [], []>} : vector<16x32xbf16>, vector<32x32xbf16>, vector<16x32xf32> -> vector<16x32xf32>
    %cst_402 = arith.constant 5.000000e-01 : f32
    %965 = vector.broadcast %cst_402 : f32 to vector<16x32xf32>
    %966 = arith.mulf %965, %921 : vector<16x32xf32>
    %cst_403 = arith.constant 0.707106769 : f32
    %967 = vector.broadcast %cst_403 : f32 to vector<16x32xf32>
    %968 = arith.mulf %921, %967 : vector<16x32xf32>
    %cst_404 = arith.constant 0.000000e+00 : f32
    %969 = vector.broadcast %cst_404 : f32 to vector<16x32xf32>
    %970 = arith.cmpf oge, %968, %969 : vector<16x32xf32>
    %cst_405 = arith.constant 1.000000e+00 : f32
    %cst_406 = arith.constant -1.000000e+00 : f32
    %971 = vector.broadcast %cst_405 : f32 to vector<16x32xf32>
    %972 = vector.broadcast %cst_406 : f32 to vector<16x32xf32>
    %973 = arith.select %970, %971, %972 : vector<16x32xi1>, vector<16x32xf32>
    %974 = math.absf %968 : vector<16x32xf32>
    %cst_407 = arith.constant 0.327591091 : f32
    %975 = vector.broadcast %cst_407 : f32 to vector<16x32xf32>
    %976 = arith.mulf %975, %974 : vector<16x32xf32>
    %cst_408 = arith.constant 1.000000e+00 : f32
    %977 = vector.broadcast %cst_408 : f32 to vector<16x32xf32>
    %978 = arith.addf %977, %976 : vector<16x32xf32>
    %979 = tpu.reciprocal %978 {approx = true} : vector<16x32xf32> -> vector<16x32xf32>
    %cst_409 = arith.constant 1.06140542 : f32
    %980 = vector.broadcast %cst_409 : f32 to vector<16x32xf32>
    %981 = arith.mulf %979, %980 : vector<16x32xf32>
    %cst_410 = arith.constant -1.45315206 : f32
    %982 = vector.broadcast %cst_410 : f32 to vector<16x32xf32>
    %983 = arith.addf %982, %981 : vector<16x32xf32>
    %984 = arith.mulf %979, %983 : vector<16x32xf32>
    %cst_411 = arith.constant 1.42141378 : f32
    %985 = vector.broadcast %cst_411 : f32 to vector<16x32xf32>
    %986 = arith.addf %985, %984 : vector<16x32xf32>
    %987 = arith.mulf %979, %986 : vector<16x32xf32>
    %cst_412 = arith.constant -0.284496725 : f32
    %988 = vector.broadcast %cst_412 : f32 to vector<16x32xf32>
    %989 = arith.addf %988, %987 : vector<16x32xf32>
    %990 = arith.mulf %979, %989 : vector<16x32xf32>
    %cst_413 = arith.constant 0.254829586 : f32
    %991 = vector.broadcast %cst_413 : f32 to vector<16x32xf32>
    %992 = arith.addf %991, %990 : vector<16x32xf32>
    %993 = arith.mulf %979, %992 : vector<16x32xf32>
    %cst_414 = arith.constant 0.000000e+00 : f32
    %994 = vector.broadcast %cst_414 : f32 to vector<16x32xf32>
    %995 = arith.subf %994, %974 : vector<16x32xf32>
    %996 = arith.mulf %995, %974 : vector<16x32xf32>
    %997 = math.exp %996 : vector<16x32xf32>
    %998 = arith.mulf %993, %997 : vector<16x32xf32>
    %cst_415 = arith.constant 1.000000e+00 : f32
    %999 = vector.broadcast %cst_415 : f32 to vector<16x32xf32>
    %1000 = arith.subf %999, %998 : vector<16x32xf32>
    %1001 = arith.mulf %973, %1000 : vector<16x32xf32>
    %cst_416 = arith.constant 1.000000e+00 : f32
    %1002 = vector.broadcast %cst_416 : f32 to vector<16x32xf32>
    %1003 = arith.addf %1002, %1001 : vector<16x32xf32>
    %1004 = arith.mulf %966, %1003 : vector<16x32xf32>
    %1005 = arith.truncf %1004 : vector<16x32xf32> to vector<16x32xbf16>
    %c624_417 = arith.constant 624 : index
    %c0_418 = arith.constant 0 : index
    %1006 = vector.load %arg3[%c624_417, %c0_418] : memref<720x32xbf16, #tpu.memory_space<vmem>>, vector<32x32xbf16>
    %cst_419 = arith.constant dense<0.000000e+00> : vector<16x32xf32>
    %1007 = tpu.matmul %1005, %1006, %cst_419 {dimension_numbers = #tpu.dot_dimension_numbers<[1], [0], [0], [1], [0, 0, 1, 1], [], []>} : vector<16x32xbf16>, vector<32x32xbf16>, vector<16x32xf32> -> vector<16x32xf32>
    %1008 = arith.addf %964, %1007 : vector<16x32xf32>
    %c28_420 = arith.constant 28 : index
    %c0_421 = arith.constant 0 : index
    %1009 = vector.load %arg2[%c28_420, %c0_421] : memref<32x128xf32, #tpu.memory_space<vmem>>, vector<1x32xf32>
    %1010 = vector.broadcast %1009 : vector<1x32xf32> to vector<16x32xf32>
    %1011 = arith.addf %1008, %1010 : vector<16x32xf32>
    %1012 = arith.addf %910, %1011 : vector<16x32xf32>
    %c29_422 = arith.constant 29 : index
    %c0_423 = arith.constant 0 : index
    %1013 = vector.load %arg2[%c29_422, %c0_423] : memref<32x128xf32, #tpu.memory_space<vmem>>, vector<1x32xf32>
    %c30_424 = arith.constant 30 : index
    %c0_425 = arith.constant 0 : index
    %1014 = vector.load %arg2[%c30_424, %c0_425] : memref<32x128xf32, #tpu.memory_space<vmem>>, vector<1x32xf32>
    %cst_426 = arith.constant dense<0.000000e+00> : vector<16xf32>
    %1015 = vector.multi_reduction <add>, %1012, %cst_426 [1] : vector<16x32xf32> to vector<16xf32>
    %1016 = vector.shape_cast %1015 : vector<16xf32> to vector<16x1xf32>
    %cst_427 = arith.constant 3.200000e+01 : f32
    %1017 = vector.broadcast %cst_427 : f32 to vector<16x1xf32>
    %1018 = arith.divf %1016, %1017 : vector<16x1xf32>
    %1019 = vector.broadcast %1018 : vector<16x1xf32> to vector<16x32xf32>
    %1020 = arith.subf %1012, %1019 : vector<16x32xf32>
    %1021 = arith.mulf %1020, %1020 : vector<16x32xf32>
    %cst_428 = arith.constant dense<0.000000e+00> : vector<16xf32>
    %1022 = vector.multi_reduction <add>, %1021, %cst_428 [1] : vector<16x32xf32> to vector<16xf32>
    %1023 = vector.shape_cast %1022 : vector<16xf32> to vector<16x1xf32>
    %cst_429 = arith.constant 3.200000e+01 : f32
    %1024 = vector.broadcast %cst_429 : f32 to vector<16x1xf32>
    %1025 = arith.divf %1023, %1024 : vector<16x1xf32>
    %1026 = vector.broadcast %1018 : vector<16x1xf32> to vector<16x32xf32>
    %1027 = arith.subf %1012, %1026 : vector<16x32xf32>
    %cst_430 = arith.constant 9.99999996E-13 : f32
    %1028 = vector.broadcast %cst_430 : f32 to vector<16x1xf32>
    %1029 = arith.addf %1025, %1028 : vector<16x1xf32>
    %1030 = math.rsqrt %1029 : vector<16x1xf32>
    %1031 = vector.broadcast %1030 : vector<16x1xf32> to vector<16x32xf32>
    %1032 = arith.mulf %1027, %1031 : vector<16x32xf32>
    %1033 = vector.broadcast %1013 : vector<1x32xf32> to vector<16x32xf32>
    %1034 = arith.mulf %1032, %1033 : vector<16x32xf32>
    %1035 = vector.broadcast %1014 : vector<1x32xf32> to vector<16x32xf32>
    %1036 = arith.addf %1034, %1035 : vector<16x32xf32>
    %1037 = arith.truncf %1036 : vector<16x32xf32> to vector<16x32xbf16>
    %c656_431 = arith.constant 656 : index
    %c0_432 = arith.constant 0 : index
    %1038 = vector.load %arg3[%c656_431, %c0_432] : memref<720x32xbf16, #tpu.memory_space<vmem>>, vector<32x32xbf16>
    %cst_433 = arith.constant dense<0.000000e+00> : vector<16x32xf32>
    %1039 = tpu.matmul %1037, %1038, %cst_433 {dimension_numbers = #tpu.dot_dimension_numbers<[1], [0], [0], [1], [0, 0, 1, 1], [], []>} : vector<16x32xbf16>, vector<32x32xbf16>, vector<16x32xf32> -> vector<16x32xf32>
    %c3_434 = arith.constant 3 : index
    %c0_435 = arith.constant 0 : index
    %1040 = vector.load %arg2[%c3_434, %c0_435] : memref<32x128xf32, #tpu.memory_space<vmem>>, vector<1x32xf32>
    %1041 = vector.broadcast %1040 : vector<1x32xf32> to vector<16x32xf32>
    %1042 = arith.addf %1039, %1041 : vector<16x32xf32>
    %cst_436 = arith.constant 5.000000e-01 : f32
    %1043 = vector.broadcast %cst_436 : f32 to vector<16x32xf32>
    %1044 = arith.mulf %1043, %1042 : vector<16x32xf32>
    %cst_437 = arith.constant 0.707106769 : f32
    %1045 = vector.broadcast %cst_437 : f32 to vector<16x32xf32>
    %1046 = arith.mulf %1042, %1045 : vector<16x32xf32>
    %cst_438 = arith.constant 0.000000e+00 : f32
    %1047 = vector.broadcast %cst_438 : f32 to vector<16x32xf32>
    %1048 = arith.cmpf oge, %1046, %1047 : vector<16x32xf32>
    %cst_439 = arith.constant 1.000000e+00 : f32
    %cst_440 = arith.constant -1.000000e+00 : f32
    %1049 = vector.broadcast %cst_439 : f32 to vector<16x32xf32>
    %1050 = vector.broadcast %cst_440 : f32 to vector<16x32xf32>
    %1051 = arith.select %1048, %1049, %1050 : vector<16x32xi1>, vector<16x32xf32>
    %1052 = math.absf %1046 : vector<16x32xf32>
    %cst_441 = arith.constant 0.327591091 : f32
    %1053 = vector.broadcast %cst_441 : f32 to vector<16x32xf32>
    %1054 = arith.mulf %1053, %1052 : vector<16x32xf32>
    %cst_442 = arith.constant 1.000000e+00 : f32
    %1055 = vector.broadcast %cst_442 : f32 to vector<16x32xf32>
    %1056 = arith.addf %1055, %1054 : vector<16x32xf32>
    %1057 = tpu.reciprocal %1056 {approx = true} : vector<16x32xf32> -> vector<16x32xf32>
    %cst_443 = arith.constant 1.06140542 : f32
    %1058 = vector.broadcast %cst_443 : f32 to vector<16x32xf32>
    %1059 = arith.mulf %1057, %1058 : vector<16x32xf32>
    %cst_444 = arith.constant -1.45315206 : f32
    %1060 = vector.broadcast %cst_444 : f32 to vector<16x32xf32>
    %1061 = arith.addf %1060, %1059 : vector<16x32xf32>
    %1062 = arith.mulf %1057, %1061 : vector<16x32xf32>
    %cst_445 = arith.constant 1.42141378 : f32
    %1063 = vector.broadcast %cst_445 : f32 to vector<16x32xf32>
    %1064 = arith.addf %1063, %1062 : vector<16x32xf32>
    %1065 = arith.mulf %1057, %1064 : vector<16x32xf32>
    %cst_446 = arith.constant -0.284496725 : f32
    %1066 = vector.broadcast %cst_446 : f32 to vector<16x32xf32>
    %1067 = arith.addf %1066, %1065 : vector<16x32xf32>
    %1068 = arith.mulf %1057, %1067 : vector<16x32xf32>
    %cst_447 = arith.constant 0.254829586 : f32
    %1069 = vector.broadcast %cst_447 : f32 to vector<16x32xf32>
    %1070 = arith.addf %1069, %1068 : vector<16x32xf32>
    %1071 = arith.mulf %1057, %1070 : vector<16x32xf32>
    %cst_448 = arith.constant 0.000000e+00 : f32
    %1072 = vector.broadcast %cst_448 : f32 to vector<16x32xf32>
    %1073 = arith.subf %1072, %1052 : vector<16x32xf32>
    %1074 = arith.mulf %1073, %1052 : vector<16x32xf32>
    %1075 = math.exp %1074 : vector<16x32xf32>
    %1076 = arith.mulf %1071, %1075 : vector<16x32xf32>
    %cst_449 = arith.constant 1.000000e+00 : f32
    %1077 = vector.broadcast %cst_449 : f32 to vector<16x32xf32>
    %1078 = arith.subf %1077, %1076 : vector<16x32xf32>
    %1079 = arith.mulf %1051, %1078 : vector<16x32xf32>
    %cst_450 = arith.constant 1.000000e+00 : f32
    %1080 = vector.broadcast %cst_450 : f32 to vector<16x32xf32>
    %1081 = arith.addf %1080, %1079 : vector<16x32xf32>
    %1082 = arith.mulf %1044, %1081 : vector<16x32xf32>
    %c4_451 = arith.constant 4 : index
    %c0_452 = arith.constant 0 : index
    %1083 = vector.load %arg2[%c4_451, %c0_452] : memref<32x128xf32, #tpu.memory_space<vmem>>, vector<1x32xf32>
    %c5_453 = arith.constant 5 : index
    %c0_454 = arith.constant 0 : index
    %1084 = vector.load %arg2[%c5_453, %c0_454] : memref<32x128xf32, #tpu.memory_space<vmem>>, vector<1x32xf32>
    %cst_455 = arith.constant dense<0.000000e+00> : vector<16xf32>
    %1085 = vector.multi_reduction <add>, %1082, %cst_455 [1] : vector<16x32xf32> to vector<16xf32>
    %1086 = vector.shape_cast %1085 : vector<16xf32> to vector<16x1xf32>
    %cst_456 = arith.constant 3.200000e+01 : f32
    %1087 = vector.broadcast %cst_456 : f32 to vector<16x1xf32>
    %1088 = arith.divf %1086, %1087 : vector<16x1xf32>
    %1089 = vector.broadcast %1088 : vector<16x1xf32> to vector<16x32xf32>
    %1090 = arith.subf %1082, %1089 : vector<16x32xf32>
    %1091 = arith.mulf %1090, %1090 : vector<16x32xf32>
    %cst_457 = arith.constant dense<0.000000e+00> : vector<16xf32>
    %1092 = vector.multi_reduction <add>, %1091, %cst_457 [1] : vector<16x32xf32> to vector<16xf32>
    %1093 = vector.shape_cast %1092 : vector<16xf32> to vector<16x1xf32>
    %cst_458 = arith.constant 3.200000e+01 : f32
    %1094 = vector.broadcast %cst_458 : f32 to vector<16x1xf32>
    %1095 = arith.divf %1093, %1094 : vector<16x1xf32>
    %1096 = vector.broadcast %1088 : vector<16x1xf32> to vector<16x32xf32>
    %1097 = arith.subf %1082, %1096 : vector<16x32xf32>
    %cst_459 = arith.constant 9.99999996E-13 : f32
    %1098 = vector.broadcast %cst_459 : f32 to vector<16x1xf32>
    %1099 = arith.addf %1095, %1098 : vector<16x1xf32>
    %1100 = math.rsqrt %1099 : vector<16x1xf32>
    %1101 = vector.broadcast %1100 : vector<16x1xf32> to vector<16x32xf32>
    %1102 = arith.mulf %1097, %1101 : vector<16x32xf32>
    %1103 = vector.broadcast %1083 : vector<1x32xf32> to vector<16x32xf32>
    %1104 = arith.mulf %1102, %1103 : vector<16x32xf32>
    %1105 = vector.broadcast %1084 : vector<1x32xf32> to vector<16x32xf32>
    %1106 = arith.addf %1104, %1105 : vector<16x32xf32>
    %1107 = arith.truncf %1106 : vector<16x32xf32> to vector<16x32xbf16>
    %c0_460 = arith.constant 0 : index
    %c0_461 = arith.constant 0 : index
    %1108 = vector.load %arg4[%c0_460, %c0_461] : memref<32x128xbf16, #tpu.memory_space<vmem>>, vector<32x128xbf16>
    %cst_462 = arith.constant dense<0.000000e+00> : vector<16x128xf32>
    %1109 = tpu.matmul %1107, %1108, %cst_462 {dimension_numbers = #tpu.dot_dimension_numbers<[1], [0], [0], [1], [0, 0, 1, 1], [], []>} : vector<16x32xbf16>, vector<32x128xbf16>, vector<16x128xf32> -> vector<16x128xf32>
    %c0_463 = arith.constant 0 : index
    %c0_464 = arith.constant 0 : index
    %1110 = vector.load %arg2[%c0_463, %c0_464] : memref<32x128xf32, #tpu.memory_space<vmem>>, vector<1x128xf32>
    %1111 = vector.broadcast %1110 : vector<1x128xf32> to vector<16x128xf32>
    %1112 = arith.addf %1109, %1111 : vector<16x128xf32>
    %c0_465 = arith.constant 0 : index
    %c0_466 = arith.constant 0 : index
    %1113 = vector.load %arg6[%c0_465, %c0_466] : memref<16x128xf32, #tpu.memory_space<vmem>>, vector<16x128xf32>
    tpu.vector_store %arg6[%c0_465, %c0_466], %1112 {strides = array<i32>} : memref<16x128xf32, #tpu.memory_space<vmem>>, vector<16x128xf32>,
    %1114 = arith.truncf %1036 : vector<16x32xf32> to vector<16x32xbf16>
    %c688 = arith.constant 688 : index
    %c0_467 = arith.constant 0 : index
    %1115 = vector.load %arg3[%c688, %c0_467] : memref<720x32xbf16, #tpu.memory_space<vmem>>, vector<32x32xbf16>
    %cst_468 = arith.constant dense<0.000000e+00> : vector<16x32xf32>
    %1116 = tpu.matmul %1114, %1115, %cst_468 {dimension_numbers = #tpu.dot_dimension_numbers<[1], [0], [0], [1], [0, 0, 1, 1], [], []>} : vector<16x32xbf16>, vector<32x32xbf16>, vector<16x32xf32> -> vector<16x32xf32>
    %c6 = arith.constant 6 : index
    %c0_469 = arith.constant 0 : index
    %1117 = vector.load %arg2[%c6, %c0_469] : memref<32x128xf32, #tpu.memory_space<vmem>>, vector<1x32xf32>
    %1118 = vector.broadcast %1117 : vector<1x32xf32> to vector<16x32xf32>
    %1119 = arith.addf %1116, %1118 : vector<16x32xf32>
    %c0_470 = arith.constant 0 : index
    %c5_471 = arith.constant 5 : index
    %1120 = vector.load %arg0[%c0_470, %c5_471] : memref<16x8xi32, #tpu.memory_space<vmem>>, vector<16x1xi32>
    %1121 = arith.sitofp %1120 : vector<16x1xi32> to vector<16x1xf32>
    %1122 = vector.broadcast %1121 : vector<16x1xf32> to vector<16x32xf32>
    %1123 = arith.mulf %1119, %1122 : vector<16x32xf32>
    %cst_472 = arith.constant 0.000000e+00 : f32
    %1124 = vector.broadcast %cst_472 : f32 to vector<16x128xf32>
    %c0_473 = arith.constant 0 : index
    %c0_474 = arith.constant 0 : index
    %1125 = vector.load %arg7[%c0_473, %c0_474] : memref<16x128xf32, #tpu.memory_space<vmem>>, vector<16x128xf32>
    tpu.vector_store %arg7[%c0_473, %c0_474], %1124 {strides = array<i32>} : memref<16x128xf32, #tpu.memory_space<vmem>>, vector<16x128xf32>,
    %c0_475 = arith.constant 0 : index
    %c0_476 = arith.constant 0 : index
    %1126 = vector.load %arg7[%c0_475, %c0_476] : memref<16x128xf32, #tpu.memory_space<vmem>>, vector<16x32xf32>
    tpu.vector_store %arg7[%c0_475, %c0_476], %1036 {strides = array<i32>} : memref<16x128xf32, #tpu.memory_space<vmem>>, vector<16x32xf32>,
    %c0_477 = arith.constant 0 : index
    %c32 = arith.constant 32 : index
    %1127 = vector.load %arg7[%c0_477, %c32] : memref<16x128xf32, #tpu.memory_space<vmem>>, vector<16x32xf32>
    tpu.vector_store %arg7[%c0_477, %c32], %1123 {strides = array<i32>} : memref<16x128xf32, #tpu.memory_space<vmem>>, vector<16x32xf32>,
    %c0_478 = arith.constant 0 : index
    %c64 = arith.constant 64 : index
    %1128 = vector.load %arg7[%c0_478, %c64] : memref<16x128xf32, #tpu.memory_space<vmem>>, vector<16x1xf32>
    tpu.vector_store %arg7[%c0_478, %c64], %563 {strides = array<i32>} : memref<16x128xf32, #tpu.memory_space<vmem>>, vector<16x1xf32>,
    return
  }
}

</mosaic_0001>

<bundles_post_ra>
// kernel: detec_select_pipeline.1
= control target key start
LH: loop header
LB: loop body
LE: loop exit
PB: predicated region body
PF: predicated region fallthrough
CT: control target
= control target key end

     0   :  { %13 = vsyncpa [#allocation3], 0  ;;  %v6991_v3 = vmov 0   ;;  %v6992_v4 = vmov 1   ;;  %v6993_v11 = vmov 2   ;;  %v6994_v13 = vmov 0.0   ;;  %s8317_s0 = inlined_call_operand.vmem [shape: s32[16,8], index: 0, kind: input, shape index: {}]   ;;  %s8318_s1 = inlined_call_operand.vmem [shape: f32[2,16,16], index: 1, kind: input, shape index: {}]   ;;  %s8319_s2 = inlined_call_operand.vmem [shape: f32[32,128], index: 2, kind: input, shape index: {}]   ;;  %s8320_s3 = inlined_call_operand.vmem [shape: bf16[720,32], index: 3, kind: input, shape index: {}]   ;;  %s8321_s4 = inlined_call_operand.vmem [shape: bf16[32,128], index: 4, kind: input, shape index: {}]   ;;  %s8322_s5 = inlined_call_operand.hbm [shape: f32[16,128], index: 5, kind: output, shape index: {0}]   ;;  %s8323_s6 = inlined_call_operand.hbm [shape: f32[16,128], index: 6, kind: output, shape index: {1}]   ;;  %s8324_s7 = inlined_call_operand.vmem [shape: f32[16,128], index: 7, kind: output, shape index: {2}]  }
   0x1   :  { %v31_v0 = vld [vmem:[%s8317_s0] sm:$0xff]  ;;  %v32_v1 = vld [vmem:[%s8317_s0 + $0x8] sm:$0xff]  ;;  %6607 = vset.pattern.permute.xlu0 %v6991_v3  ;;  %6608 = vset.pattern.permute.xlu1 %v6992_v4  ;;  %v6658_v10 = vld [vmem:[%s8320_s3 + $0x10] sm:$0xff]   ;;  %5596 = vst [vmem:[%s8324_s7] sm:$0xff] %v6994_v13 }
   0x2   :  { %v6656_v2 = vld [vmem:[%s8320_s3] sm:$0xff]   ;;  %v46_v5 = vadd.s32 128, %v31_v0  ;;  %37 = vperm.xlu0 %6607, %v31_v0   ;;  %164 = vmatprep.subr.bf16.mxu0 %v6991_v3  ;;  %v47_v6 = vadd.s32 128, %v32_v1  ;;  %v6657_v7 = vld [vmem:[%s8320_s3 + $0x8] sm:$0xff]   ;;  %v6659_v12 = vld [vmem:[%s8320_s3 + $0x18] sm:$0xff]   ;;  %5597 = vst [vmem:[%s8324_s7 + $0x8] sm:$0xff] %v6994_v13 }
   0x3   :  { %165 = vmatpush1.bf16.msra.mxu0 %v6656_v2  ;;  %6083 = vmatprep.subr.bf16.mxu1 %v6994_v13  ;;  %v6660_v14 = vld [vmem:[%s8320_s3 + $0x20] sm:$0xff]   ;;  %v6661_v15 = vld [vmem:[%s8320_s3 + $0x28] sm:$0xff]   ;;  %v6662_v16 = vld [vmem:[%s8320_s3 + $0x30] sm:$0xff]  }
   0x4   :  { %49 = vperm.xlu1 %6608, %v46_v5   ;;  %166 = vmatprep.subr.bf16.mxu0 %v6991_v3  ;;  %v62_v8 = vadd.s32 8, %v46_v5  ;;  %v63_v9 = vadd.s32 8, %v47_v6  ;;  %v6663_v17 = vld [vmem:[%s8320_s3 + $0x38] sm:$0xff]   ;;  %v6664_v18 = vld [vmem:[%s8320_s3 + $0x40] sm:$0xff]  }
   0x6   :  { %40 = vperm.xlu0 %6607, %v32_v1  }
   0x7   :  { %167 = vmatpush1.bf16.msra.mxu0 %v6657_v7 }
   0x8   :  { %52 = vperm.xlu1 %6608, %v47_v6   ;;  %168 = vmatprep.subr.bf16.mxu0 %v6991_v3 }
   0xa   :  { %6609 = vset.pattern.permute.xlu0 %v6993_v11 }
   0xb   :  { %65 = vperm.xlu0 %6609, %v62_v8   ;;  %169 = vmatpush1.bf16.msra.mxu0 %v6658_v10 }
   0xc   :  { %6610 = vset.pattern.permute.xlu1 %v6993_v11  ;;  %170 = vmatprep.subr.bf16.mxu0 %v6991_v3 }
   0xd   :  { %68 = vperm.xlu1 %6610, %v63_v9  }
   0xf   :  { %171 = vmatpush1.bf16.msra.mxu0 %v6659_v12 }
  0x10   :  { %172 = vmatprep.subr.bf16.mxu0 %v6991_v3 }
  0x13   :  { %173 = vmatpush1.bf16.msra.mxu0 %v6660_v14 }
  0x14   :  { %174 = vmatprep.subr.bf16.mxu0 %v6991_v3 }
  0x17   :  { %175 = vmatpush1.bf16.msra.mxu0 %v6661_v15 }
  0x18   :  { %176 = vmatprep.subr.bf16.mxu0 %v6991_v3 }
  0x1b   :  { %177 = vmatpush1.bf16.msra.mxu0 %v6662_v16 }
  0x1c   :  { %178 = vmatprep.subr.bf16.mxu0 %v6991_v3 }
  0x1f   :  { %179 = vmatpush1.bf16.msra.mxu0 %v6663_v17 }
  0x20   :  { %180 = vmatprep.subr.bf16.mxu0 %v6991_v3 }
  0x23   :  { %181 = vmatpush1.bf16.msra.mxu0 %v6664_v18 }
  0x24   :  { %14 = vsyncpa [#allocation5], 0  ;;  %v33_v19 = vlaneseq  ;;  %v8331_v26 = vmov 0  ;;  %v6995_v32 = vmov 1.0|1.0   ;;  %v6665_v49 = vld [vmem:[%s8320_s3 + $0x48] sm:$0xff]  }
  0x25   :  { %6084 = vmatpush3.bf16.msra.mxu1 %v6665_v49  ;;  %v6666_v50 = vld [vmem:[%s8320_s3 + $0x50] sm:$0xff]   ;;  %v5668_v58 = vld [vmem:[%s8319_s2 + $0x1] ss:$0 sm:$0xff]  ;;  %v5669_v63 = vld [vmem:[%s8319_s2 + $0x2] ss:$0 sm:$0xff]  ;;  %s6997_s30 = smov 112  }
  0x26   :  { %v7099_v20 = vand.u32 127, %v33_v19  ;;  %6085 = vmatprep.subr.bf16.mxu1 %v6994_v13  ;;  %v6667_v4 = vld [vmem:[%s8320_s3 + $0x58] sm:$0xff]   ;;  %v6668_v6 = vld [vmem:[%s8320_s3 + $0x60] sm:$0xff]   ;;  %v6669_v7 = vld [vmem:[%s8320_s3 + $0x68] sm:$0xff]  }
  0x27   :  { %v6670_v8 = vld [vmem:[%s8320_s3 + $0x70] sm:$0xff]   ;;  %v5670_v9 = vld [vmem:[%s8319_s2 + $0x8] ss:$0 sm:$0xff]  ;;  %v5674_v16 = vld [vmem:[%s8319_s2 + $0x9] ss:$0 sm:$0xff] }
  0x28   :  { %v7102_v22 = vadd.s32 128, %v7099_v20 }
  0x29   :  { %6086 = vmatpush3.bf16.msra.mxu1 %v6666_v50 }
  0x2a   :  { %6091 = vmatprep.subr.bf16.mxu1 %v6994_v13 }
  0x81   :  { %v38_v21 = vpop.permute.xlu0 %37 }
  0x82   :  { %vm42_vm0 = vcmp.eq.s32.totalorder %v7099_v20, %v38_v21  ;;  %vm43_vm2 = vcmp.eq.s32.totalorder %v7102_v22, %v38_v21 }
  0x83   :  { %v50_v23 = vpop.permute.xlu1 %49 }
  0x84   :  { %vm54_vm1 = vcmp.eq.s32.totalorder %v7099_v20, %v50_v23  ;;  %vm55_vm3 = vcmp.eq.s32.totalorder %v7102_v22, %v50_v23 }
  0x85   :  { %v41_v24 = vpop.permute.xlu0 %40  ;;  %vm7110_vm6 = vmor %vm42_vm0, %vm54_vm1 }
  0x86   :  { %vm44_vm4 = vcmp.eq.s32.totalorder %v7099_v20, %v41_v24  ;;  %v8332_v26 = vsel %vm7110_vm6, 4294967295, %v8331_v26  ;;  %vm45_vm7 = vcmp.eq.s32.totalorder %v7102_v22, %v41_v24  ;;  %vm59_vm9 = vmor %vm43_vm2, %vm55_vm3  ;;  %vm8328_vm2 = vcmask 130048  }
  0x87   :  { %v53_v25 = vpop.permute.xlu1 %52  ;;  %vm8333_vm3 = vnez %v8332_v26 }
  0x88   :  { %vm56_vm5 = vcmp.eq.s32.totalorder %v7099_v20, %v53_v25  ;;  %vm57_vm8 = vcmp.eq.s32.totalorder %v7102_v22, %v53_v25  ;;  %v8334_v25 = vmov 0 }
  0x89   :  { %vm60_vm10 = vmor %vm44_vm4, %vm56_vm5 }
  0x8a   :  { %v66_v27 = vpop.permute.xlu0 %65  ;;  %vm61_vm11 = vmor %vm45_vm7, %vm57_vm8  ;;  %vm8327_vm7 = vcmask 261120  }
  0x8b   :  { %vm71_vm12 = vcmp.eq.s32.totalorder %v7102_v22, %v66_v27  ;;  %vm70_vm13 = vcmp.eq.s32.totalorder %v7099_v20, %v66_v27  ;;  %vm7183_vm8 = vmpackc.low %vm8328_vm2, %vm8328_vm2 }
  0x8c   :  { %v69_v28 = vpop.permute.xlu1 %68  ;;  %vm75_vm0 = vmor %vm59_vm9, %vm71_vm12  ;;  %v8335_v25 = vsel %vm7183_vm8, 4294967295, %v8334_v25 }
  0x8d   :  { %vm72_vm14 = vcmp.eq.s32.totalorder %v7099_v20, %v69_v28  ;;  %vm73_vm15 = vcmp.eq.s32.totalorder %v7102_v22, %v69_v28  ;;  %v5653_v29 = vsel %vm75_vm0, 1.0, %v6994_v13  ;;  %vm74_vm4 = vmor %vm8333_vm3, %vm70_vm13  ;;  %v5678_v28 = vld [vmem:[%s8319_s2 + $0xa] ss:$0 sm:$0xff] }
  0x8e   :  { %vm76_vm1 = vmor %vm60_vm10, %vm72_vm14 }
  0x8f   :  { %vm77_vm6 = vmor %vm61_vm11, %vm73_vm15 }
  0x90   :  { %v5655_v30 = vsel %vm77_vm6, 1.0, %v6994_v13  ;;  %vm5666_vm5 = vmpackc.low %vm76_vm1, %vm74_vm4  ;;  %vm8325_vm6 = vmmov 0  }
  0x91   :  { %v87_v31 = vpack.c.bf16 %v5655_v30, %v5653_v29  ;;  %6087 = vmatprep.mubr.msk.bf16.mxu1 %vm8325_vm6, %v6994_v13 }
  0x93   :  { %5665 = vmatprep.mubr.msk.bf16.mxu0 %vm8328_vm2, %v87_v31 }
  0x94   :  { %5667 = vmatmul.mubr.msk.bf16.vlgmr.msra.gmra.mrb[0].mxu0 %vm5666_vm5, %v6995_v32 }
 0x167   :  { %v198_v33 = vpop.f32.mrb[0].mxu0 }
 0x168   :  { %v200_v34 = vpop.f32.mrb[1].mxu0  ;;  %v208_v35 = vsel %vm8327_vm7, %v198_v33, 0.0 }
 0x169   :  { %209 = vadd.xlane.f32.xlu1 %v208_v35  ;;  %v201_v36 = vpop.f32.mrb[2].mxu0 }
 0x16a   :  { %v203_v37 = vpop.f32.mrb[3].mxu0  ;;  %v211_v38 = vsel %vm8327_vm7, %v201_v36, 0.0 }
 0x16b   :  { %212 = vadd.xlane.f32.xlu0 %v211_v38 }
 0x1f6   :  { %v210_v39 = vpop.xlane.xlu1 %209 }
 0x1f7   :  { %v215_v40 = vmul.f32 0.03125, %v210_v39 }
 0x1f8   :  { %v213_v41 = vpop.xlane.xlu0 %212 }
 0x1f9   :  { %v217_v42 = vsub.f32 %v198_v33, %v215_v40  ;;  %v216_v43 = vmul.f32 0.03125, %v213_v41  ;;  %v7207_v40 = vld [vmem:[%s8318_s1 + $0x8] sm:$0xff] }
 0x1fb   :  { %v218_v44 = vsub.f32 %v201_v36, %v216_v43  ;;  %v219_v45 = vmul.f32 %v217_v42, %v217_v42  ;;  %v7212_v43 = vld [vmem:[%s8318_s1] sm:$0xff] }
 0x1fd   :  { %v221_v46 = vsel %vm8327_vm7, %v219_v45, 0.0  ;;  %v220_v47 = vmul.f32 %v218_v44, %v218_v44 }
 0x1fe   :  { %222 = vadd.xlane.f32.xlu0 %v221_v46 }
 0x1ff   :  { %v224_v48 = vsel %vm8327_vm7, %v220_v47, 0.0 }
 0x200   :  { %225 = vadd.xlane.f32.xlu1 %v224_v48 }
 0x28b   :  { %v223_v51 = vpop.xlane.xlu0 %222 }
 0x28c   :  { %v227_v52 = vmul.f32 0.03125, %v223_v51 }
 0x28d   :  { %v226_v53 = vpop.xlane.xlu1 %225 }
 0x28e   :  { %v229_v54 = vadd.f32 1e-12, %v227_v52  ;;  %v228_v55 = vmul.f32 0.03125, %v226_v53 }
 0x290   :  { %6748 = vrsqrt.f32 %v229_v54  ;;  %v230_v56 = vadd.f32 1e-12, %v228_v55 }
 0x292   :  { %6750 = vrsqrt.f32 %v230_v56 }
 0x29a   :  { %v6749_v57 = vpop.eup %6748 }
 0x29b   :  { %v233_v59 = vmul.f32 %v6749_v57, %v217_v42 }
 0x29c   :  { %v6751_v60 = vpop.eup %6750 }
 0x29d   :  { %v234_v61 = vmul.f32 %v6751_v60, %v218_v44  ;;  %v239_v62 = vmul.f32 %v5668_v58, %v233_v59 }
 0x29f   :  { %v240_v0 = vmul.f32 %v5668_v58, %v234_v61  ;;  %v7146_v1 = vadd.f32 %v5669_v63, %v239_v62 }
 0x2a1   :  { %v7148_v2 = vadd.f32 %v5669_v63, %v240_v0 }
 0x2a3   :  { %v247_v5 = vpack.c.bf16 %v7148_v2, %v7146_v1 }
 0x2a5   :  { %6088 = vmatmul.mubr.msk.bf16.vlgmr.msra.gmra.mrb[0].mxu1 %vm8327_vm7, %v247_v5 }
 0x2a6   :  { %6092 = vmatpush3.bf16.msra.mxu1 %v6667_v4  ;;  %6095 = vmatprep.mubr.msk.bf16.mxu1 %vm8325_vm6, %v6994_v13 }
 0x2a7   :  { %6093 = vmatprep.subr.bf16.mxu1 %v6994_v13 }
 0x2aa   :  { %6094 = vmatpush3.bf16.msra.mxu1 %v6668_v6  ;;  %v6671_v6 = vld [vmem:[%s8320_s3 + $0x78] sm:$0xff]  }
 0x2ab   :  { %6099 = vmatprep.subr.bf16.mxu1 %v6994_v13 }
 0x2ad   :  { %6096 = vmatmul.mubr.msk.bf16.vlgmr.msra.gmra.mrb[4].mxu1 %vm8327_vm7, %v247_v5 }
 0x2ae   :  { %6100 = vmatpush3.bf16.msra.mxu1 %v6669_v7  ;;  %6103 = vmatprep.mubr.msk.bf16.mxu1 %vm8325_vm6, %v6994_v13 }
 0x2af   :  { %6101 = vmatprep.subr.bf16.mxu1 %v6994_v13 }
 0x2b2   :  { %6102 = vmatpush3.bf16.msra.mxu1 %v6670_v8 }
 0x2b5   :  { %6104 = vmatmul.mubr.msk.bf16.vlgmr.msra.gmra.mrb[8].mxu1 %vm8327_vm7, %v247_v5 }
 0x378   :  { %v306_v10 = vpop.f32.mrb[0].mxu1 }
 0x379   :  { %v307_v11 = vadd.f32 %v5670_v9, %v306_v10  ;;  %v6089_v12 = vpop.f32.mrb[1].mxu1 }
 0x37a   :  { %v309_v14 = vpop.f32.mrb[2].mxu1 }
 0x37b   :  { %v6090_v15 = vpop.f32.mrb[3].mxu1  ;;  %6111 = vmatprep.mubr.msk.f32.mxu1 %vm8328_vm2, %v307_v11  ;;  %v310_v36 = vadd.f32 %v5670_v9, %v309_v14 }
 0x380   :  { %v368_v17 = vpop.f32.mrb[4].mxu1 }
 0x381   :  { %v6097_v18 = vpop.f32.mrb[5].mxu1  ;;  %v369_v21 = vadd.f32 %v5674_v16, %v368_v17 }
 0x382   :  { %v371_v19 = vpop.f32.mrb[6].mxu1 }
 0x383   :  { %v372_v23 = vadd.f32 %v5674_v16, %v371_v19  ;;  %v6098_v24 = vpop.f32.mrb[7].mxu1 }
 0x385   :  { %v6611_v26 = vpack.i.bf16 %v372_v23, %v369_v21  ;;  %v6507_v27 = vpack.c.bf16 %v372_v23, %v369_v21 }
 0x387   :  { %6509 = vmatprep.subr.msk.bf16.mxu1 %vm7183_vm8, %v6507_v27 }
 0x388   :  { %v430_v29 = vpop.f32.mrb[8].mxu1  ;;  %6512 = vmatpush3.bf16.xpose.msk.msra.mxu1 %vm7183_vm8, %v6507_v27 }
 0x389   :  { %v6105_v30 = vpop.f32.mrb[9].mxu1  ;;  %v7194_v33 = vadd.f32 %v5678_v28, %v430_v29 }
 0x38a   :  { %v433_v31 = vpop.f32.mrb[10].mxu1 }
 0x38b   :  { %v7196_v34 = vadd.f32 %v5678_v28, %v433_v31  ;;  %v6106_v35 = vpop.f32.mrb[11].mxu1 }
 0x38d   :  { %v6616_v37 = vpack.i.bf16 %v7196_v34, %v7194_v33  ;;  %v6513_v38 = vpack.c.bf16 %v7196_v34, %v7194_v33 }
 0x38f   :  { %6112 = vmatmul.mubr.msk.f32.vlgmr.msra.gmra.mrb[12].mxu1 %vm8328_vm2, %v310_v36  ;;  %6514 = vmatprep.subr.bf16.mxu1 %v6513_v38 }
 0x390   :  { %6516 = vmatpush3.bf16.msra.mxu1 %v6513_v38 }
 0x391   :  { %6121 = vmatprep.subr.bf16.mxu1 %v6994_v13 }
 0x462   :  { %v6113_v39 = vpop.f32.mrb[12].mxu1 }
 0x463   :  { %v526_v41 = vmul.f32 0.25, %v6113_v39  ;;  %v516_v42 = vpop.f32.mrb[13].mxu1 }
 0x464   :  { %v525_v44 = vmul.f32 0.25, %v516_v42 }
 0x465   :  { %v528_v45 = vadd.f32 %v526_v41, %v7207_v40 }
 0x466   :  { %v527_v46 = vadd.f32 %v525_v44, %v7212_v43 }
 0x467   :  { %v532_v47 = vsel %vm8328_vm2, %v528_v45, -inf }
 0x468   :  { %533 = vmax.xlane.f32.xlu1 %v532_v47  ;;  %v529_v48 = vsel %vm8328_vm2, %v527_v46, -inf }
 0x469   :  { %530 = vmax.xlane.f32.xlu0 %v529_v48 }
 0x4f5   :  { %v534_v49 = vpop.xlane.xlu1 %533 }
 0x4f6   :  { %v536_v50 = vsub.f32 %v528_v45, %v534_v49  ;;  %v531_v51 = vpop.xlane.xlu0 %530 }
 0x4f7   :  { %v535_v52 = vsub.f32 %v527_v46, %v531_v51 }
 0x4f8   :  { %v539_v53 = vmul.f32 1.442695, %v536_v50 }
 0x4f9   :  { %v537_v54 = vmul.f32 1.442695, %v535_v52 }
 0x4fa   :  { %6752 = vpow2.f32 %v539_v53  ;;  %v6672_v53 = vld [vmem:[%s8320_s3 + $0x80] sm:$0xff]  }
 0x4fb   :  { %6754 = vpow2.f32 %v537_v54 }
 0x504   :  { %v6753_v55 = vpop.eup %6752 }
 0x505   :  { %v6755_v56 = vpop.eup %6754  ;;  %v544_v57 = vsel %vm8328_vm2, %v6753_v55, 0.0 }
 0x506   :  { %545 = vadd.xlane.f32.xlu1 %v544_v57  ;;  %v541_v58 = vsel %vm8328_vm2, %v6755_v56, 0.0  ;;  %v5690_v57 = vld [vmem:[%s8319_s2 + $0xb] ss:$0 sm:$0xff] }
 0x507   :  { %542 = vadd.xlane.f32.xlu0 %v541_v58 }
 0x517   :  { %691 = vrot.lane.b32.xlu1 %v307_v11, %s6997_s30 }
 0x51b   :  { %693 = vrot.lane.b32.xlu1 %v310_v36, %s6997_s30 }
 0x51d   :  { %6612 = vrot.lane.b32.xlu0 %v6611_v26, %s6997_s30 }
 0x593   :  { %v546_v59 = vpop.xlane.xlu1 %545 }
 0x594   :  { %6756 = vrcp.f32 %v546_v59  ;;  %v543_v60 = vpop.xlane.xlu0 %542 }
 0x595   :  { %6758 = vrcp.f32 %v543_v60 }
 0x597   :  { %v692_v12 = vpop.permute.xlu1 %691 }
 0x598   :  { %v6613_v61 = vpop.permute.xlu0 %6612 }
 0x599   :  { %v6615_v0 = vunpack.i.h.bf16 %v6613_v61  ;;  %v6614_v4 = vunpack.i.l.bf16 %v6613_v61 }
 0x59b   :  { %v6517_v8 = vpack.c.bf16 %v6615_v0, %v6614_v4  ;;  %v694_v14 = vpop.permute.xlu1 %693 }
 0x59e   :  { %v6757_v62 = vpop.eup %6756 }
 0x59f   :  { %v6759_v63 = vpop.eup %6758  ;;  %v550_v7 = vmul.f32 %v6757_v62, %v6753_v55 }
 0x5a0   :  { %v549_v5 = vmul.f32 %v6759_v63, %v6755_v56 }
 0x5a2   :  { %6118 = vmatprep.mubr.msk.f32.mxu1 %vm8328_vm2, %v549_v5 }
 0x5a3   :  { %6119 = vmatmul.mubr.msk.f32.vlgmr.msra.gmra.mrb[14].mxu1 %vm8328_vm2, %v550_v7 }
 0x5a4   :  { %6122 = vmatpush3.bf16.msra.mxu1 %v6671_v6  ;;  %6123 = vmatprep.mubr.msk.bf16.mxu1 %vm8325_vm6, %v6994_v13 }
 0x5a5   :  { %6519 = vmatprep.subr.msk.bf16.mxu1 %vm7183_vm8, %v6517_v8 }
 0x676   :  { %v6120_v9 = vpop.f32.mrb[14].mxu1 }
 0x677   :  { %v623_v10 = vpop.f32.mrb[15].mxu1 }
 0x678   :  { %v634_v11 = vpack.c.bf16 %v6120_v9, %v623_v10 }
 0x67a   :  { %6124 = vmatmul.mubr.msk.bf16.vlgmr.msra.gmra.mrb[16].mxu1 %vm8328_vm2, %v634_v11 }
 0x67b   :  { %6522 = vmatpush3.bf16.xpose.msk.msra.mxu1 %vm7183_vm8, %v6517_v8  ;;  %6131 = vmatprep.mubr.msk.f32.mxu1 %vm8328_vm2, %v692_v12 }
 0x67c   :  { %6141 = vmatprep.subr.bf16.mxu1 %v6994_v13 }
 0x682   :  { %6132 = vmatmul.mubr.msk.f32.vlgmr.msra.gmra.mrb[20].mxu1 %vm8328_vm2, %v694_v14 }
 0x683   :  { %6143 = vmatprep.mubr.msk.bf16.mxu1 %vm8325_vm6, %v6994_v13  ;;  %6142 = vmatpush3.bf16.msra.mxu1 %v6672_v53 }
 0x684   :  { %6155 = vmatprep.subr.bf16.mxu1 %v6994_v13 }
 0x74d   :  { %v678_v15 = vpop.f32.mrb[16].mxu1 }
 0x74e   :  { %v6125_v16 = vpop.f32.mrb[17].mxu1  ;;  %v689_v58 = vadd.f32 %v5690_v57, %v678_v15 }
 0x74f   :  { %v681_v17 = vpop.f32.mrb[18].mxu1 }
 0x750   :  { %v6126_v18 = vpop.f32.mrb[19].mxu1  ;;  %v690_v60 = vadd.f32 %v5690_v57, %v681_v17 }
 0x755   :  { %v6133_v19 = vpop.f32.mrb[20].mxu1 }
 0x756   :  { %v783_v21 = vmul.f32 0.25, %v6133_v19  ;;  %v773_v23 = vpop.f32.mrb[21].mxu1  ;;  %v6674_v19 = vld [vmem:[%s8320_s3 + $0x98] sm:$0xff]  }
 0x757   :  { %v782_v24 = vmul.f32 0.25, %v773_v23  ;;  %v6676_v23 = vld [vmem:[%s8320_s3 + $0xa0] sm:$0xff]  }
 0x758   :  { %v785_v26 = vadd.f32 %v783_v21, %v7207_v40  ;;  %v6675_v21 = vld [vmem:[%s8320_s3 + $0x90] sm:$0xff]  }
 0x759   :  { %v784_v27 = vadd.f32 %v782_v24, %v7212_v43 }
 0x75a   :  { %v789_v28 = vsel %vm8328_vm2, %v785_v26, -inf }
 0x75b   :  { %790 = vmax.xlane.f32.xlu1 %v789_v28  ;;  %v786_v29 = vsel %vm8328_vm2, %v784_v27, -inf }
 0x75c   :  { %787 = vmax.xlane.f32.xlu0 %v786_v29 }
 0x76c   :  { %6617 = vrot.lane.b32.xlu1 %v6616_v37, %s6997_s30 }
 0x7e8   :  { %v791_v30 = vpop.xlane.xlu1 %790 }
 0x7e9   :  { %v793_v31 = vsub.f32 %v785_v26, %v791_v30  ;;  %v788_v35 = vpop.xlane.xlu0 %787 }
 0x7ea   :  { %v792_v36 = vsub.f32 %v784_v27, %v788_v35 }
 0x7eb   :  { %v796_v38 = vmul.f32 1.442695, %v793_v31 }
 0x7ec   :  { %v794_v39 = vmul.f32 1.442695, %v792_v36  ;;  %v6618_v41 = vpop.permute.xlu1 %6617  ;;  %v5699_v36 = vld [vmem:[%s8319_s2 + $0xc] ss:$0 sm:$0xff] }
 0x7ed   :  { %v6620_v42 = vunpack.i.h.bf16 %v6618_v41  ;;  %v6619_v44 = vunpack.i.l.bf16 %v6618_v41 }
 0x7ee   :  { %6760 = vpow2.f32 %v794_v39 }
 0x7ef   :  { %v6523_v45 = vpack.c.bf16 %v6620_v42, %v6619_v44  ;;  %6762 = vpow2.f32 %v796_v38  ;;  %v5700_v42 = vld [vmem:[%s8319_s2 + $0xd] ss:$0 sm:$0xff] }
 0x7f1   :  { %6524 = vmatprep.subr.bf16.mxu0 %v6523_v45 }
 0x7f2   :  { %6526 = vmatpush3.bf16.msra.mxu0 %v6523_v45 }
 0x7f3   :  { %6147 = vmatprep.subr.bf16.mxu0 %v6994_v13 }
 0x7f8   :  { %v6761_v46 = vpop.eup %6760 }
 0x7f9   :  { %v798_v33 = vsel %vm8328_vm2, %v6761_v46, 0.0  ;;  %v6763_v34 = vpop.eup %6762 }
 0x7fa   :  { %799 = vadd.xlane.f32.xlu0 %v798_v33  ;;  %v801_v37 = vsel %vm8328_vm2, %v6763_v34, 0.0 }
 0x7fe   :  { %802 = vadd.xlane.f32.xlu0 %v801_v37  ;;  %v6678_v37 = vld [vmem:[%s8320_s3 + $0xa8] sm:$0xff]  }
 0x887   :  { %v800_v47 = vpop.xlane.xlu0 %799 }
 0x888   :  { %6764 = vrcp.f32 %v800_v47  ;;  %v6679_v47 = vld [vmem:[%s8320_s3 + $0xc0] sm:$0xff]  }
 0x88b   :  { %v803_v48 = vpop.xlane.xlu0 %802 }
 0x88c   :  { %6766 = vrcp.f32 %v803_v48  ;;  %v6680_v48 = vld [vmem:[%s8320_s3 + $0xb0] sm:$0xff]  }
 0x892   :  { %v6765_v49 = vpop.eup %6764 }
 0x893   :  { %v806_v50 = vmul.f32 %v6765_v49, %v6761_v46  ;;  %v5701_v49 = vld [vmem:[%s8319_s2 + $0xe] ss:$0 sm:$0xff] }
 0x895   :  { %6138 = vmatprep.mubr.msk.f32.mxu0 %vm8328_vm2, %v806_v50  ;;  %v5705_v50 = vld [vmem:[%s8319_s2 + $0xf] ss:$0 sm:$0xff] }
 0x896   :  { %v6767_v51 = vpop.eup %6766 }
 0x897   :  { %v807_v52 = vmul.f32 %v6767_v51, %v6763_v34  ;;  %v6677_v34 = vld [vmem:[%s8320_s3 + $0xb8] sm:$0xff]  }
 0x899   :  { %6139 = vmatmul.mubr.msk.f32.vlgmr.msra.gmra.mrb[4].mxu0 %vm8328_vm2, %v807_v52 }
 0x89a   :  { %6151 = vmatprep.mubr.msk.bf16.mxu0 %vm8325_vm6, %v6994_v13 }
 0x96c   :  { %v6140_v54 = vpop.f32.mrb[4].mxu0 }
 0x96d   :  { %v888_v55 = vpop.f32.mrb[5].mxu0 }
 0x96e   :  { %v899_v56 = vpack.c.bf16 %v6140_v54, %v888_v55 }
 0x970   :  { %6144 = vmatmul.mubr.msk.bf16.vlgmr.msra.gmra.mrb[24].mxu1 %vm8328_vm2, %v899_v56 }
 0x971   :  { %6159 = vmatprep.mubr.msk.bf16.mxu1 %vm8325_vm6, %v6994_v13  ;;  %6156 = vmatpush3.bf16.msra.mxu1 %v6674_v19 }
 0x972   :  { %6157 = vmatprep.subr.bf16.mxu1 %v6994_v13 }
 0x975   :  { %6158 = vmatpush3.bf16.msra.mxu1 %v6676_v23 }
 0x976   :  { %6171 = vmatprep.subr.bf16.mxu1 %v6994_v13 }
 0xa43   :  { %v943_v59 = vpop.f32.mrb[24].mxu1 }
 0xa44   :  { %v950_v61 = vadd.f32 %v943_v59, %v689_v58  ;;  %v6145_v62 = vpop.f32.mrb[25].mxu1 }
 0xa45   :  { %v946_v63 = vpop.f32.mrb[26].mxu1 }
 0xa46   :  { %v951_v0 = vadd.f32 %v946_v63, %v690_v60  ;;  %v6146_v4 = vpop.f32.mrb[27].mxu1  ;;  %v952_v5 = vadd.f32 %v950_v61, %v7146_v1 }
 0xa48   :  { %v956_v6 = vsel %vm8327_vm7, %v952_v5, 0.0  ;;  %v953_v7 = vadd.f32 %v951_v0, %v7148_v2  ;;  %v6673_v2 = vld [vmem:[%s8320_s3 + $0x88] sm:$0xff]  }
 0xa49   :  { %957 = vadd.xlane.f32.xlu0 %v956_v6  ;;  %6148 = vmatpush3.bf16.msra.mxu0 %v6673_v2 }
 0xa4a   :  { %v959_v8 = vsel %vm8327_vm7, %v953_v7, 0.0  ;;  %6149 = vmatprep.subr.bf16.mxu0 %v6994_v13 }
 0xa4d   :  { %960 = vadd.xlane.f32.xlu0 %v959_v8  ;;  %6150 = vmatpush3.bf16.msra.mxu0 %v6675_v21 }
 0xa4e   :  { %6163 = vmatprep.subr.bf16.mxu0 %v6994_v13 }
 0xad6   :  { %v958_v9 = vpop.xlane.xlu0 %957 }
 0xad7   :  { %v962_v10 = vmul.f32 0.03125, %v958_v9 }
 0xad9   :  { %v964_v11 = vsub.f32 %v952_v5, %v962_v10 }
 0xada   :  { %v961_v12 = vpop.xlane.xlu0 %960 }
 0xadb   :  { %v963_v14 = vmul.f32 0.03125, %v961_v12  ;;  %v966_v15 = vmul.f32 %v964_v11, %v964_v11 }
 0xadd   :  { %v965_v16 = vsub.f32 %v953_v7, %v963_v14  ;;  %v968_v17 = vsel %vm8327_vm7, %v966_v15, 0.0 }
 0xade   :  { %969 = vadd.xlane.f32.xlu0 %v968_v17 }
 0xadf   :  { %v967_v18 = vmul.f32 %v965_v16, %v965_v16 }
 0xae1   :  { %v971_v1 = vsel %vm8327_vm7, %v967_v18, 0.0 }
 0xae2   :  { %972 = vadd.xlane.f32.xlu0 %v971_v1 }
 0xb6b   :  { %v970_v24 = vpop.xlane.xlu0 %969 }
 0xb6c   :  { %v974_v26 = vmul.f32 0.03125, %v970_v24 }
 0xb6e   :  { %v976_v27 = vadd.f32 1e-12, %v974_v26 }
 0xb6f   :  { %v973_v28 = vpop.xlane.xlu0 %972 }
 0xb70   :  { %6768 = vrsqrt.f32 %v976_v27  ;;  %v975_v29 = vmul.f32 0.03125, %v973_v28 }
 0xb72   :  { %v977_v30 = vadd.f32 1e-12, %v975_v29 }
 0xb74   :  { %6770 = vrsqrt.f32 %v977_v30 }
 0xb7a   :  { %v6769_v31 = vpop.eup %6768 }
 0xb7b   :  { %v980_v35 = vmul.f32 %v6769_v31, %v964_v11 }
 0xb7d   :  { %v986_v39 = vmul.f32 %v5699_v36, %v980_v35 }
 0xb7e   :  { %v6771_v38 = vpop.eup %6770 }
 0xb7f   :  { %v981_v41 = vmul.f32 %v6771_v38, %v965_v16  ;;  %v7293_v45 = vadd.f32 %v5700_v42, %v986_v39 }
 0xb81   :  { %v987_v44 = vmul.f32 %v5699_v36, %v981_v41 }
 0xb83   :  { %v7295_v46 = vadd.f32 %v5700_v42, %v987_v44 }
 0xb85   :  { %v994_v33 = vpack.c.bf16 %v7295_v46, %v7293_v45 }
 0xb87   :  { %6152 = vmatmul.mubr.msk.bf16.vlgmr.msra.gmra.mrb[8].mxu0 %vm8327_vm7, %v994_v33  ;;  %6160 = vmatmul.mubr.msk.bf16.vlgmr.msra.gmra.mrb[28].mxu1 %vm8327_vm7, %v994_v33 }
 0xb88   :  { %6167 = vmatprep.mubr.msk.bf16.mxu0 %vm8325_vm6, %v6994_v13  ;;  %6175 = vmatprep.mubr.msk.bf16.mxu1 %vm8325_vm6, %v6994_v13 }
 0xb89   :  { %6164 = vmatpush3.bf16.msra.mxu0 %v6677_v34  ;;  %6172 = vmatpush3.bf16.msra.mxu1 %v6678_v37 }
 0xb8a   :  { %6165 = vmatprep.subr.bf16.mxu0 %v6994_v13  ;;  %6173 = vmatprep.subr.bf16.mxu1 %v6994_v13 }
 0xb8d   :  { %6166 = vmatpush3.bf16.msra.mxu0 %v6679_v47  ;;  %6174 = vmatpush3.bf16.msra.mxu1 %v6680_v48 }
 0xb8e   :  { %6179 = vmatprep.subr.bf16.mxu0 %v6994_v13  ;;  %6187 = vmatprep.subr.bf16.mxu1 %v6994_v13 }
 0xc5a   :  { %v1053_v51 = vpop.f32.mrb[8].mxu0  ;;  %v1115_v52 = vpop.f32.mrb[28].mxu1 }
 0xc5b   :  { %v7327_v53 = vadd.f32 %v5701_v49, %v1053_v51  ;;  %v7329_v54 = vadd.f32 %v5705_v50, %v1115_v52  ;;  %v6153_v55 = vpop.f32.mrb[9].mxu0  ;;  %v6161_v56 = vpop.f32.mrb[29].mxu1 }
 0xc5c   :  { %v1056_v57 = vpop.f32.mrb[10].mxu0  ;;  %v1118_v58 = vpop.f32.mrb[30].mxu1 }
 0xc5d   :  { %v7332_v13 = vmul.f32 0.70710677, %v7327_v53  ;;  %v7335_v59 = vmul.f32 0.70710677, %v7329_v54  ;;  %v7337_v60 = vadd.f32 %v5701_v49, %v1056_v57  ;;  %v7339_v61 = vadd.f32 %v5705_v50, %v1118_v58  ;;  %v6154_v62 = vpop.f32.mrb[11].mxu0  ;;  %v6162_v63 = vpop.f32.mrb[31].mxu1 }
 0xc5f   :  { %v1130_v0 = vand.u32 2147483647, %v7332_v13  ;;  %v1187_v4 = vand.u32 2147483647, %v7335_v59  ;;  %v7344_v5 = vmul.f32 0.70710677, %v7337_v60 }
 0xc60   :  { %v7348_v9 = vmul.f32 0.70710677, %v7339_v61  ;;  %vm1126_vm9 = vcmp.ge.f32.partialorder %v7332_v13, 0.0  ;;  %vm1183_vm10 = vcmp.ge.f32.partialorder %v7335_v59, 0.0 }
 0xc61   :  { %v1132_v6 = vmul.f32 0.3275911, %v1130_v0  ;;  %v1189_v7 = vmul.f32 0.3275911, %v1187_v4  ;;  %v1131_v8 = vand.u32 2147483647, %v7344_v5 }
 0xc62   :  { %v1188_v15 = vand.u32 2147483647, %v7348_v9  ;;  %v1156_v18 = vsub.f32 0.0, %v1130_v0  ;;  %v1213_v1 = vsub.f32 0.0, %v1187_v4  ;;  %vm1127_vm11 = vcmp.ge.f32.partialorder %v7344_v5, 0.0 }
 0xc63   :  { %v1134_v10 = vadd.f32 1.0, %v1132_v6  ;;  %v1191_v11 = vadd.f32 1.0, %v1189_v7  ;;  %v1133_v12 = vmul.f32 0.3275911, %v1131_v8  ;;  %v1157_v21 = vsub.f32 0.0, %v1131_v8 }
 0xc64   :  { %v1190_v16 = vmul.f32 0.3275911, %v1188_v15  ;;  %v1158_v19 = vmul.f32 %v1156_v18, %v1130_v0  ;;  %v1215_v26 = vmul.f32 %v1213_v1, %v1187_v4  ;;  %v1214_v29 = vsub.f32 0.0, %v1188_v15 }
 0xc65   :  { %6772 = vrcp.f32 %v1134_v10  ;;  %v1135_v14 = vadd.f32 1.0, %v1133_v12  ;;  %v1159_v36 = vmul.f32 %v1157_v21, %v1131_v8  ;;  %vm1184_vm12 = vcmp.ge.f32.partialorder %v7348_v9, 0.0 }
 0xc66   :  { %6774 = vrcp.f32 %v1191_v11  ;;  %v1192_v17 = vadd.f32 1.0, %v1190_v16  ;;  %v1160_v31 = vmul.f32 1.442695, %v1158_v19  ;;  %v1217_v39 = vmul.f32 1.442695, %v1215_v26 }
 0xc67   :  { %6776 = vrcp.f32 %v1135_v14  ;;  %v1216_v37 = vmul.f32 %v1214_v29, %v1188_v15  ;;  %v1162_v48 = vmul.f32 1.442695, %v1159_v36 }
 0xc68   :  { %6778 = vrcp.f32 %v1192_v17 }
 0xc69   :  { %6780 = vpow2.f32 %v1160_v31  ;;  %v1219_v58 = vmul.f32 1.442695, %v1216_v37  ;;  %v6998_v31 = vmov -1.0  }
 0xc6a   :  { %6782 = vpow2.f32 %v1217_v39 }
 0xc6b   :  { %6784 = vpow2.f32 %v1162_v48  ;;  %v1122_v48 = vmul.f32 0.5, %v7327_v53 }
 0xc6c   :  { %6786 = vpow2.f32 %v1219_v58 }
 0xc6f   :  { %v6773_v2 = vpop.eup %6772 }
 0xc70   :  { %v6775_v23 = vpop.eup %6774  ;;  %v1138_v24 = vmul.f32 1.0614054, %v6773_v2 }
 0xc71   :  { %v1195_v27 = vmul.f32 1.0614054, %v6775_v23  ;;  %v6777_v30 = vpop.eup %6776 }
 0xc72   :  { %v1140_v28 = vadd.f32 -1.4531521, %v1138_v24  ;;  %v1139_v41 = vmul.f32 1.0614054, %v6777_v30  ;;  %v6779_v44 = vpop.eup %6778 }
 0xc73   :  { %v1197_v35 = vadd.f32 -1.4531521, %v1195_v27  ;;  %v1196_v49 = vmul.f32 1.0614054, %v6779_v44  ;;  %v6781_v16 = vpop.eup %6780 }
 0xc74   :  { %v1142_v38 = vmul.f32 %v6773_v2, %v1140_v28  ;;  %v1141_v34 = vadd.f32 -1.4531521, %v1139_v41  ;;  %v6783_v1 = vpop.eup %6782  ;;  %v1185_v41 = vsel %vm1183_vm10, 1.0, %v6998_v31 }
 0xc75   :  { %v1199_v42 = vmul.f32 %v6775_v23, %v1197_v35  ;;  %v1198_v55 = vadd.f32 -1.4531521, %v1196_v49  ;;  %v6785_v29 = vpop.eup %6784  ;;  %v1128_v35 = vsel %vm1126_vm9, 1.0, %v6998_v31  ;;  %v1123_v49 = vmul.f32 0.5, %v7337_v60  ;;  %v7367_v60 = vld [vmem:[%s8324_s7] sm:$0xff] }
 0xc76   :  { %v1144_v33 = vadd.f32 1.4214138, %v1142_v38  ;;  %v1143_v51 = vmul.f32 %v6777_v30, %v1141_v34  ;;  %v6787_v13 = vpop.eup %6786 }
 0xc77   :  { %v1201_v47 = vadd.f32 1.4214138, %v1199_v42  ;;  %v1200_v63 = vmul.f32 %v6779_v44, %v1198_v55 }
 0xc78   :  { %v1146_v50 = vmul.f32 %v6773_v2, %v1144_v33  ;;  %v1145_v57 = vadd.f32 1.4214138, %v1143_v51 }
 0xc79   :  { %v1203_v52 = vmul.f32 %v6775_v23, %v1201_v47  ;;  %v1202_v7 = vadd.f32 1.4214138, %v1200_v63 }
 0xc7a   :  { %v1148_v56 = vadd.f32 -0.28449672, %v1146_v50  ;;  %v1147_v4 = vmul.f32 %v6777_v30, %v1145_v57  ;;  %v1180_v57 = vmul.f32 0.5, %v7339_v61 }
 0xc7b   :  { %v1205_v62 = vadd.f32 -0.28449672, %v1203_v52  ;;  %v1204_v12 = vmul.f32 %v6779_v44, %v1202_v7 }
 0xc7c   :  { %v1150_v0 = vmul.f32 %v6773_v2, %v1148_v56  ;;  %v1149_v10 = vadd.f32 -0.28449672, %v1147_v4  ;;  %v1179_v56 = vmul.f32 0.5, %v7329_v54 }
 0xc7d   :  { %v1207_v6 = vmul.f32 %v6775_v23, %v1205_v62  ;;  %v1206_v18 = vadd.f32 -0.28449672, %v1204_v12 }
 0xc7e   :  { %v1152_v8 = vadd.f32 0.2548296, %v1150_v0  ;;  %v1151_v15 = vmul.f32 %v6777_v30, %v1149_v10 }
 0xc7f   :  { %v1209_v11 = vadd.f32 0.2548296, %v1207_v6  ;;  %v1208_v26 = vmul.f32 %v6779_v44, %v1206_v18  ;;  %v5715_v6 = vld [vmem:[%s8319_s2 + $0x10] ss:$0 sm:$0xff] }
 0xc80   :  { %v1154_v14 = vmul.f32 %v6773_v2, %v1152_v8  ;;  %v1153_v21 = vadd.f32 0.2548296, %v1151_v15 }
 0xc81   :  { %v1211_v17 = vmul.f32 %v6775_v23, %v1209_v11  ;;  %v1210_v36 = vadd.f32 0.2548296, %v1208_v26 }
 0xc82   :  { %v1164_v19 = vmul.f32 %v6781_v16, %v1154_v14  ;;  %v1155_v28 = vmul.f32 %v6777_v30, %v1153_v21  ;;  %v1129_v30 = vsel %vm1127_vm11, 1.0, %v6998_v31 }
 0xc83   :  { %v1221_v24 = vmul.f32 %v6783_v1, %v1211_v17  ;;  %v1212_v39 = vmul.f32 %v6779_v44, %v1210_v36  ;;  %v1186_v44 = vsel %vm1184_vm12, 1.0, %v6998_v31 }
 0xc84   :  { %v1166_v27 = vsub.f32 1.0, %v1164_v19  ;;  %v1165_v23 = vmul.f32 %v6785_v29, %v1155_v28 }
 0xc85   :  { %v1223_v2 = vsub.f32 1.0, %v1221_v24  ;;  %v1222_v34 = vmul.f32 %v6787_v13, %v1212_v39  ;;  %v6684_v39 = vld [vmem:[%s8320_s3 + $0xe0] sm:$0xff]  }
 0xc86   :  { %v1168_v38 = vmul.f32 %v1166_v27, %v1128_v35  ;;  %v1167_v42 = vsub.f32 1.0, %v1165_v23  ;;  %v6683_v23 = vld [vmem:[%s8320_s3 + $0xd0] sm:$0xff]  }
 0xc87   :  { %v1225_v33 = vmul.f32 %v1223_v2, %v1185_v41  ;;  %v1224_v59 = vsub.f32 1.0, %v1222_v34 }
 0xc88   :  { %v1170_v37 = vadd.f32 1.0, %v1168_v38  ;;  %v1169_v47 = vmul.f32 %v1167_v42, %v1129_v30  ;;  %v6682_v38 = vld [vmem:[%s8320_s3 + $0xd8] sm:$0xff]  }
 0xc89   :  { %v1227_v50 = vadd.f32 1.0, %v1225_v33  ;;  %v1226_v51 = vmul.f32 %v1224_v59, %v1186_v44  ;;  %v5716_v59 = vld [vmem:[%s8319_s2 + $0x11] ss:$0 sm:$0xff]  ;;  %v5717_v44 = vld [vmem:[%s8319_s2 + $0x12] ss:$0 sm:$0xff] }
 0xc8a   :  { %v1171_v5 = vadd.f32 1.0, %v1169_v47  ;;  %v1172_v52 = vmul.f32 %v1170_v37, %v1122_v48 }
 0xc8b   :  { %v1228_v9 = vadd.f32 1.0, %v1226_v51  ;;  %v1229_v62 = vmul.f32 %v1227_v50, %v1179_v56 }
 0xc8c   :  { %v1173_v55 = vmul.f32 %v1171_v5, %v1123_v49 }
 0xc8d   :  { %v1230_v63 = vmul.f32 %v1228_v9, %v1180_v57  ;;  %v6686_v57 = vld [vmem:[%s8320_s3 + $0xf0] sm:$0xff]  }
 0xc8e   :  { %v1174_v58 = vpack.c.bf16 %v1173_v55, %v1172_v52  ;;  %v6685_v55 = vld [vmem:[%s8320_s3 + $0xe8] sm:$0xff]   ;;  %v5718_v9 = vld [vmem:[%s8319_s2 + $0x14] ss:$0 sm:$0xff] }
 0xc8f   :  { %v1231_v53 = vpack.c.bf16 %v1230_v63, %v1229_v62  ;;  %v5722_v62 = vld [vmem:[%s8319_s2 + $0x15] ss:$0 sm:$0xff] }
 0xc90   :  { %6176 = vmatmul.mubr.msk.bf16.vlgmr.msra.gmra.mrb[32].mxu1 %vm8327_vm7, %v1174_v58 }
 0xc91   :  { %6191 = vmatprep.mubr.msk.bf16.mxu1 %vm8325_vm6, %v7367_v60  ;;  %6168 = vmatmul.mubr.msk.bf16.vlgmr.msra.gmra.mrb[12].mxu0 %vm8327_vm7, %v1231_v53 }
 0xc92   :  { %6183 = vmatprep.mubr.msk.bf16.mxu0 %vm8325_vm6, %v7367_v60  ;;  %6188 = vmatpush3.bf16.msra.mxu1 %v6682_v38 }
 0xc93   :  { %6189 = vmatprep.subr.bf16.mxu1 %v7367_v60 }
 0xc96   :  { %6190 = vmatpush3.bf16.msra.mxu1 %v6684_v39 }
 0xd63   :  { %v1341_v54 = vpop.f32.mrb[32].mxu1 }
 0xd64   :  { %v6177_v61 = vpop.f32.mrb[33].mxu1  ;;  %v1285_v4 = vpop.f32.mrb[12].mxu0 }
 0xd65   :  { %v1344_v0 = vpop.f32.mrb[34].mxu1  ;;  %v1342_v8 = vadd.f32 %v1341_v54, %v1285_v4  ;;  %v6169_v10 = vpop.f32.mrb[13].mxu0 }
 0xd66   :  { %v6178_v7 = vpop.f32.mrb[35].mxu1  ;;  %v1288_v11 = vpop.f32.mrb[14].mxu0 }
 0xd67   :  { %v1353_v12 = vadd.f32 %v5715_v6, %v1342_v8  ;;  %v1345_v14 = vadd.f32 %v1344_v0, %v1288_v11  ;;  %v6170_v15 = vpop.f32.mrb[15].mxu0 }
 0xd69   :  { %v1354_v16 = vadd.f32 %v5715_v6, %v1345_v14  ;;  %v1355_v17 = vadd.f32 %v1353_v12, %v7293_v45  ;;  %v5726_v14 = vld [vmem:[%s8319_s2 + $0x16] ss:$0 sm:$0xff] }
 0xd6b   :  { %v1359_v18 = vsel %vm8327_vm7, %v1355_v17, 0.0  ;;  %v1356_v1 = vadd.f32 %v1354_v16, %v7295_v46  ;;  %v6681_v46 = vld [vmem:[%s8320_s3 + $0xc8] sm:$0xff]  }
 0xd6c   :  { %1360 = vadd.xlane.f32.xlu1 %v1359_v18  ;;  %6180 = vmatpush3.bf16.msra.mxu0 %v6681_v46 }
 0xd6d   :  { %v1362_v19 = vsel %vm8327_vm7, %v1356_v1, 0.0  ;;  %6181 = vmatprep.subr.bf16.mxu0 %v7367_v60 }
 0xd6e   :  { %1363 = vadd.xlane.f32.xlu0 %v1362_v19 }
 0xd70   :  { %6182 = vmatpush3.bf16.msra.mxu0 %v6683_v23 }
 0xd71   :  { %6195 = vmatprep.subr.bf16.mxu0 %v7367_v60 }
 0xdf9   :  { %v1361_v21 = vpop.xlane.xlu1 %1360 }
 0xdfa   :  { %v1365_v24 = vmul.f32 0.03125, %v1361_v21 }
 0xdfb   :  { %v1364_v26 = vpop.xlane.xlu0 %1363 }
 0xdfc   :  { %v1367_v27 = vsub.f32 %v1355_v17, %v1365_v24  ;;  %v1366_v28 = vmul.f32 0.03125, %v1364_v26 }
 0xdfe   :  { %v1368_v29 = vsub.f32 %v1356_v1, %v1366_v28  ;;  %v1369_v35 = vmul.f32 %v1367_v27, %v1367_v27 }
 0xe00   :  { %v1371_v2 = vsel %vm8327_vm7, %v1369_v35, 0.0  ;;  %v1370_v36 = vmul.f32 %v1368_v29, %v1368_v29 }
 0xe01   :  { %1372 = vadd.xlane.f32.xlu0 %v1371_v2 }
 0xe02   :  { %v1374_v45 = vsel %vm8327_vm7, %v1370_v36, 0.0 }
 0xe05   :  { %1375 = vadd.xlane.f32.xlu0 %v1374_v45 }
 0xe8e   :  { %v1373_v13 = vpop.xlane.xlu0 %1372 }
 0xe8f   :  { %v1377_v41 = vmul.f32 0.03125, %v1373_v13 }
 0xe91   :  { %v1379_v42 = vadd.f32 1e-12, %v1377_v41 }
 0xe92   :  { %v1376_v33 = vpop.xlane.xlu0 %1375 }
 0xe93   :  { %6788 = vrsqrt.f32 %v1379_v42  ;;  %v1378_v30 = vmul.f32 0.03125, %v1376_v33 }
 0xe95   :  { %v1380_v34 = vadd.f32 1e-12, %v1378_v30 }
 0xe97   :  { %6790 = vrsqrt.f32 %v1380_v34 }
 0xe9d   :  { %v6789_v37 = vpop.eup %6788 }
 0xe9e   :  { %v1383_v47 = vmul.f32 %v6789_v37, %v1367_v27 }
 0xea0   :  { %v1389_v49 = vmul.f32 %v5716_v59, %v1383_v47 }
 0xea1   :  { %v6791_v48 = vpop.eup %6790 }
 0xea2   :  { %v1384_v5 = vmul.f32 %v6791_v48, %v1368_v29  ;;  %v7404_v51 = vadd.f32 %v5717_v44, %v1389_v49 }
 0xea4   :  { %v1390_v50 = vmul.f32 %v5716_v59, %v1384_v5 }
 0xea6   :  { %v7406_v52 = vadd.f32 %v5717_v44, %v1390_v50 }
 0xea8   :  { %v1397_v56 = vpack.c.bf16 %v7406_v52, %v7404_v51 }
 0xeaa   :  { %6184 = vmatmul.mubr.msk.bf16.vlgmr.msra.gmra.mrb[16].mxu0 %vm8327_vm7, %v1397_v56  ;;  %6192 = vmatmul.mubr.msk.bf16.vlgmr.msra.gmra.mrb[36].mxu1 %vm8327_vm7, %v1397_v56 }
 0xeab   :  { %6196 = vmatpush3.bf16.msra.mxu0 %v6685_v55  ;;  %6199 = vmatprep.mubr.msk.bf16.mxu0 %vm8325_vm6, %v7367_v60 }
 0xeac   :  { %6197 = vmatprep.subr.bf16.mxu0 %v7367_v60 }
 0xeaf   :  { %6198 = vmatpush3.bf16.msra.mxu0 %v6686_v57 }
 0xeb0   :  { %6217 = vmatprep.subr.bf16.mxu0 %v7367_v60 }
 0xeb2   :  { %6200 = vmatmul.mubr.msk.bf16.vlgmr.msra.gmra.mrb[20].mxu0 %vm8327_vm7, %v1397_v56 }
 0xeb3   :  { %6219 = vmatprep.mubr.msk.bf16.mxu0 %vm8325_vm6, %v7367_v60 }
 0xf7d   :  { %v1456_v58 = vpop.f32.mrb[16].mxu0  ;;  %v1518_v63 = vpop.f32.mrb[36].mxu1 }
 0xf7e   :  { %v1457_v53 = vadd.f32 %v5718_v9, %v1456_v58  ;;  %v6185_v54 = vpop.f32.mrb[17].mxu0  ;;  %v6193_v61 = vpop.f32.mrb[37].mxu1  ;;  %v1519_v6 = vadd.f32 %v5722_v62, %v1518_v63 }
 0xf7f   :  { %v1459_v0 = vpop.f32.mrb[18].mxu0  ;;  %v1521_v4 = vpop.f32.mrb[38].mxu1 }
 0xf80   :  { %v1522_v7 = vadd.f32 %v5722_v62, %v1521_v4  ;;  %1841 = vrot.lane.b32.xlu1 %v1457_v53, %s6997_s30  ;;  %v6186_v8 = vpop.f32.mrb[19].mxu0  ;;  %v6194_v10 = vpop.f32.mrb[39].mxu1  ;;  %6207 = vmatprep.mubr.msk.f32.mxu1 %vm8328_vm2, %v1457_v53  ;;  %v1460_v21 = vadd.f32 %v5718_v9, %v1459_v0  ;;  %v6687_v62 = vld [vmem:[%s8320_s3 + $0xf8] sm:$0xff]  }
 0xf81   :  { %6218 = vmatpush3.bf16.msra.mxu0 %v6687_v62 }
 0xf82   :  { %v6621_v11 = vpack.i.bf16 %v1522_v7, %v1519_v6  ;;  %v6527_v12 = vpack.c.bf16 %v1522_v7, %v1519_v6 }
 0xf84   :  { %6529 = vmatprep.subr.msk.bf16.mxu1 %vm7183_vm8, %v6527_v12 }
 0xf85   :  { %v1580_v15 = vpop.f32.mrb[20].mxu0  ;;  %6532 = vmatpush3.bf16.xpose.msk.msra.mxu1 %vm7183_vm8, %v6527_v12 }
 0xf86   :  { %v6201_v16 = vpop.f32.mrb[21].mxu0  ;;  %v7440_v18 = vadd.f32 %v5726_v14, %v1580_v15 }
 0xf87   :  { %v1583_v17 = vpop.f32.mrb[22].mxu0 }
 0xf88   :  { %v7442_v1 = vadd.f32 %v5726_v14, %v1583_v17  ;;  %v6202_v19 = vpop.f32.mrb[23].mxu0 }
 0xf8a   :  { %v6626_v24 = vpack.i.bf16 %v7442_v1, %v7440_v18  ;;  %v6533_v26 = vpack.c.bf16 %v7442_v1, %v7440_v18 }
 0xf8c   :  { %6208 = vmatmul.mubr.msk.f32.vlgmr.msra.gmra.mrb[22].mxu1 %vm8328_vm2, %v1460_v21  ;;  %6534 = vmatprep.subr.bf16.mxu1 %v6533_v26 }
 0xf8d   :  { %6536 = vmatpush3.bf16.msra.mxu1 %v6533_v26 }
 0xff2   :  { %v1842_v9 = vpop.permute.xlu1 %1841 }
0x105f   :  { %v6209_v27 = vpop.f32.mrb[22].mxu1 }
0x1060   :  { %v1666_v28 = vpop.f32.mrb[23].mxu1  ;;  %v1676_v29 = vmul.f32 0.25, %v6209_v27 }
0x1061   :  { %v1675_v35 = vmul.f32 0.25, %v1666_v28 }
0x1062   :  { %v1678_v45 = vadd.f32 %v1676_v29, %v7207_v40 }
0x1063   :  { %v1677_v2 = vadd.f32 %v1675_v35, %v7212_v43 }
0x1064   :  { %v1682_v46 = vsel %vm8328_vm2, %v1678_v45, -inf }
0x1065   :  { %v1679_v36 = vsel %vm8328_vm2, %v1677_v2, -inf }
0x1066   :  { %1680 = vmax.xlane.f32.xlu0 %v1679_v36 }
0x106a   :  { %1683 = vmax.xlane.f32.xlu0 %v1682_v46 }
0x10f3   :  { %v1681_v38 = vpop.xlane.xlu0 %1680 }
0x10f4   :  { %v1685_v23 = vsub.f32 %v1677_v2, %v1681_v38 }
0x10f6   :  { %v1687_v41 = vmul.f32 1.442695, %v1685_v23 }
0x10f7   :  { %v1684_v39 = vpop.xlane.xlu0 %1683 }
0x10f8   :  { %v1686_v13 = vsub.f32 %v1678_v45, %v1684_v39 }
0x10fa   :  { %v1689_v42 = vmul.f32 1.442695, %v1686_v13 }
0x10fc   :  { %6792 = vpow2.f32 %v1689_v42 }
0x10fd   :  { %6794 = vpow2.f32 %v1687_v41 }
0x1106   :  { %v6793_v33 = vpop.eup %6792 }
0x1107   :  { %v1694_v30 = vsel %vm8328_vm2, %v6793_v33, 0.0  ;;  %v6795_v34 = vpop.eup %6794 }
0x1108   :  { %1695 = vadd.xlane.f32.xlu0 %v1694_v30  ;;  %v1691_v37 = vsel %vm8328_vm2, %v6795_v34, 0.0  ;;  %v5738_v30 = vld [vmem:[%s8319_s2 + $0x17] ss:$0 sm:$0xff] }
0x110c   :  { %1692 = vadd.xlane.f32.xlu0 %v1691_v37 }
0x1122   :  { %6622 = vrot.lane.b32.xlu0 %v6621_v11, %s6997_s30 }
0x1126   :  { %1843 = vrot.lane.b32.xlu0 %v1460_v21, %s6997_s30 }
0x1195   :  { %v1696_v47 = vpop.xlane.xlu0 %1695 }
0x1196   :  { %6796 = vrcp.f32 %v1696_v47 }
0x1199   :  { %v1693_v59 = vpop.xlane.xlu0 %1692 }
0x119a   :  { %6798 = vrcp.f32 %v1693_v59 }
0x119d   :  { %v6623_v48 = vpop.permute.xlu0 %6622 }
0x119e   :  { %v6625_v49 = vunpack.i.h.bf16 %v6623_v48  ;;  %v6624_v5 = vunpack.i.l.bf16 %v6623_v48 }
0x11a0   :  { %v6537_v44 = vpack.c.bf16 %v6625_v49, %v6624_v5  ;;  %v6797_v50 = vpop.eup %6796 }
0x11a1   :  { %v1700_v57 = vmul.f32 %v6797_v50, %v6793_v33  ;;  %v1844_v58 = vpop.permute.xlu0 %1843 }
0x11a2   :  { %6539 = vmatprep.subr.msk.bf16.mxu1 %vm7183_vm8, %v6537_v44 }
0x11a4   :  { %v6799_v55 = vpop.eup %6798 }
0x11a5   :  { %v1699_v56 = vmul.f32 %v6799_v55, %v6795_v34 }
0x11a7   :  { %6214 = vmatprep.mubr.msk.f32.mxu1 %vm8328_vm2, %v1699_v56 }
0x11a8   :  { %6215 = vmatmul.mubr.msk.f32.vlgmr.msra.gmra.mrb[40].mxu1 %vm8328_vm2, %v1700_v57 }
0x11a9   :  { %6542 = vmatpush3.bf16.xpose.msk.msra.mxu1 %vm7183_vm8, %v6537_v44  ;;  %6227 = vmatprep.mubr.msk.f32.mxu1 %vm8328_vm2, %v1842_v9 }
0x11aa   :  { %6237 = vmatprep.subr.bf16.mxu1 %v7367_v60 }
0x11b0   :  { %6228 = vmatmul.mubr.msk.f32.vlgmr.msra.gmra.mrb[42].mxu1 %vm8328_vm2, %v1844_v58 }
0x11b1   :  { %6239 = vmatprep.mubr.msk.bf16.mxu1 %vm8325_vm6, %v7367_v60 }
0x127b   :  { %v6216_v63 = vpop.f32.mrb[40].mxu1 }
0x127c   :  { %v1773_v53 = vpop.f32.mrb[41].mxu1 }
0x127d   :  { %v1784_v54 = vpack.c.bf16 %v6216_v63, %v1773_v53 }
0x127f   :  { %6220 = vmatmul.mubr.msk.bf16.vlgmr.msra.gmra.mrb[24].mxu0 %vm8328_vm2, %v1784_v54 }
0x1283   :  { %v6229_v61 = vpop.f32.mrb[42].mxu1 }
0x1284   :  { %v1933_v0 = vmul.f32 0.25, %v6229_v61  ;;  %v1923_v4 = vpop.f32.mrb[43].mxu1 }
0x1285   :  { %v1932_v6 = vmul.f32 0.25, %v1923_v4 }
0x1286   :  { %v1935_v7 = vadd.f32 %v1933_v0, %v7207_v40 }
0x1287   :  { %v1934_v8 = vadd.f32 %v1932_v6, %v7212_v43  ;;  %v6690_v6 = vld [vmem:[%s8320_s3 + $0x118] sm:$0xff]  }
0x1288   :  { %v1939_v10 = vsel %vm8328_vm2, %v1935_v7, -inf }
0x1289   :  { %1940 = vmax.xlane.f32.xlu0 %v1939_v10  ;;  %v1936_v11 = vsel %vm8328_vm2, %v1934_v8, -inf }
0x128a   :  { %1937 = vmax.xlane.f32.xlu1 %v1936_v11 }
0x1316   :  { %v1941_v12 = vpop.xlane.xlu0 %1940 }
0x1317   :  { %v1943_v14 = vsub.f32 %v1935_v7, %v1941_v12  ;;  %v1938_v15 = vpop.xlane.xlu1 %1937  ;;  %v6691_v7 = vld [vmem:[%s8320_s3 + $0x110] sm:$0xff]  }
0x1318   :  { %v1942_v16 = vsub.f32 %v1934_v8, %v1938_v15  ;;  %v6692_v8 = vld [vmem:[%s8320_s3 + $0x120] sm:$0xff]  }
0x1319   :  { %v1946_v17 = vmul.f32 1.442695, %v1943_v14 }
0x131a   :  { %v1944_v19 = vmul.f32 1.442695, %v1942_v16 }
0x131b   :  { %6800 = vpow2.f32 %v1946_v17 }
0x131c   :  { %6802 = vpow2.f32 %v1944_v19 }
0x1325   :  { %v6801_v21 = vpop.eup %6800 }
0x1326   :  { %v6803_v26 = vpop.eup %6802  ;;  %v1951_v40 = vsel %vm8328_vm2, %v6801_v21, 0.0 }
0x1327   :  { %1952 = vadd.xlane.f32.xlu1 %v1951_v40  ;;  %v1948_v43 = vsel %vm8328_vm2, %v6803_v26, 0.0 }
0x1328   :  { %1949 = vadd.xlane.f32.xlu0 %v1948_v43 }
0x133e   :  { %6627 = vrot.lane.b32.xlu0 %v6626_v24, %s6997_s30  ;;  %v6688_v24 = vld [vmem:[%s8320_s3 + $0x100] sm:$0xff]  }
0x133f   :  { %6238 = vmatpush3.bf16.msra.mxu1 %v6688_v24 }
0x1340   :  { %6251 = vmatprep.subr.bf16.mxu1 %v7367_v60 }
0x1352   :  { %v1828_v27 = vpop.f32.mrb[24].mxu0 }
0x1353   :  { %v6221_v28 = vpop.f32.mrb[25].mxu0  ;;  %v1839_v34 = vadd.f32 %v5738_v30, %v1828_v27  ;;  %v5748_v27 = vld [vmem:[%s8319_s2 + $0x19] ss:$0 sm:$0xff] }
0x1354   :  { %v1831_v29 = vpop.f32.mrb[26].mxu0 }
0x1355   :  { %v6222_v35 = vpop.f32.mrb[27].mxu0  ;;  %v1840_v47 = vadd.f32 %v5738_v30, %v1831_v29 }
0x13b4   :  { %v1953_v2 = vpop.xlane.xlu1 %1952 }
0x13b5   :  { %6804 = vrcp.f32 %v1953_v2  ;;  %v1950_v36 = vpop.xlane.xlu0 %1949 }
0x13b6   :  { %6806 = vrcp.f32 %v1950_v36  ;;  %v6693_v36 = vld [vmem:[%s8320_s3 + $0x138] sm:$0xff]  }
0x13b9   :  { %v6628_v45 = vpop.permute.xlu0 %6627 }
0x13ba   :  { %v6630_v46 = vunpack.i.h.bf16 %v6628_v45  ;;  %v6629_v38 = vunpack.i.l.bf16 %v6628_v45  ;;  %v6694_v45 = vld [vmem:[%s8320_s3 + $0x128] sm:$0xff]  }
0x13bc   :  { %v6543_v23 = vpack.c.bf16 %v6630_v46, %v6629_v38  ;;  %v6695_v46 = vld [vmem:[%s8320_s3 + $0x140] sm:$0xff]   ;;  %v6696_v38 = vld [vmem:[%s8320_s3 + $0x130] sm:$0xff]  }
0x13be   :  { %6544 = vmatprep.subr.bf16.mxu0 %v6543_v23 }
0x13bf   :  { %v6805_v39 = vpop.eup %6804  ;;  %6546 = vmatpush3.bf16.msra.mxu0 %v6543_v23  ;;  %v5749_v23 = vld [vmem:[%s8319_s2 + $0x1a] ss:$0 sm:$0xff] }
0x13c0   :  { %v6807_v13 = vpop.eup %6806  ;;  %6243 = vmatprep.subr.bf16.mxu0 %v7367_v60  ;;  %v1957_v1 = vmul.f32 %v6805_v39, %v6801_v21  ;;  %v5747_v21 = vld [vmem:[%s8319_s2 + $0x18] ss:$0 sm:$0xff]  ;;  %v5753_v39 = vld [vmem:[%s8319_s2 + $0x1b] ss:$0 sm:$0xff] }
0x13c1   :  { %v1956_v18 = vmul.f32 %v6807_v13, %v6803_v26 }
0x13c3   :  { %6234 = vmatprep.mubr.msk.f32.mxu0 %vm8328_vm2, %v1956_v18 }
0x13c4   :  { %6235 = vmatmul.mubr.msk.f32.vlgmr.msra.gmra.mrb[6].mxu0 %vm8328_vm2, %v1957_v1 }
0x13c5   :  { %6247 = vmatprep.mubr.msk.bf16.mxu0 %vm8325_vm6, %v7367_v60 }
0x1497   :  { %v6236_v41 = vpop.f32.mrb[6].mxu0 }
0x1498   :  { %v2038_v42 = vpop.f32.mrb[7].mxu0 }
0x1499   :  { %v2049_v33 = vpack.c.bf16 %v6236_v41, %v2038_v42 }
0x149b   :  { %6240 = vmatmul.mubr.msk.bf16.vlgmr.msra.gmra.mrb[44].mxu1 %vm8328_vm2, %v2049_v33 }
0x149c   :  { %6255 = vmatprep.mubr.msk.bf16.mxu1 %vm8325_vm6, %v7367_v60  ;;  %6252 = vmatpush3.bf16.msra.mxu1 %v6690_v6 }
0x149d   :  { %6253 = vmatprep.subr.bf16.mxu1 %v7367_v60 }
0x14a0   :  { %6254 = vmatpush3.bf16.msra.mxu1 %v6692_v8 }
0x14a1   :  { %6267 = vmatprep.subr.bf16.mxu1 %v7367_v60 }
0x156e   :  { %v2093_v37 = vpop.f32.mrb[44].mxu1 }
0x156f   :  { %v2100_v59 = vadd.f32 %v2093_v37, %v1839_v34  ;;  %v6241_v48 = vpop.f32.mrb[45].mxu1 }
0x1570   :  { %v2096_v49 = vpop.f32.mrb[46].mxu1 }
0x1571   :  { %v2101_v5 = vadd.f32 %v2096_v49, %v1840_v47  ;;  %v6242_v44 = vpop.f32.mrb[47].mxu1  ;;  %v2102_v50 = vadd.f32 %v2100_v59, %v7404_v51 }
0x1573   :  { %v2106_v55 = vsel %vm8327_vm7, %v2102_v50, 0.0  ;;  %v2103_v56 = vadd.f32 %v2101_v5, %v7406_v52  ;;  %v6689_v52 = vld [vmem:[%s8320_s3 + $0x108] sm:$0xff]  }
0x1574   :  { %2107 = vadd.xlane.f32.xlu1 %v2106_v55  ;;  %6244 = vmatpush3.bf16.msra.mxu0 %v6689_v52 }
0x1575   :  { %v2109_v57 = vsel %vm8327_vm7, %v2103_v56, 0.0  ;;  %6245 = vmatprep.subr.bf16.mxu0 %v7367_v60 }
0x1578   :  { %2110 = vadd.xlane.f32.xlu1 %v2109_v57  ;;  %6246 = vmatpush3.bf16.msra.mxu0 %v6691_v7 }
0x1579   :  { %6259 = vmatprep.subr.bf16.mxu0 %v7367_v60 }
0x1601   :  { %v2108_v9 = vpop.xlane.xlu1 %2107 }
0x1602   :  { %v2112_v58 = vmul.f32 0.03125, %v2108_v9 }
0x1604   :  { %v2114_v62 = vsub.f32 %v2102_v50, %v2112_v58 }
0x1605   :  { %v2111_v63 = vpop.xlane.xlu1 %2110 }
0x1606   :  { %v2113_v53 = vmul.f32 0.03125, %v2111_v63  ;;  %v2116_v54 = vmul.f32 %v2114_v62, %v2114_v62 }
0x1608   :  { %v2115_v61 = vsub.f32 %v2103_v56, %v2113_v53  ;;  %v2118_v0 = vsel %vm8327_vm7, %v2116_v54, 0.0 }
0x1609   :  { %2119 = vadd.xlane.f32.xlu1 %v2118_v0 }
0x160a   :  { %v2117_v4 = vmul.f32 %v2115_v61, %v2115_v61 }
0x160c   :  { %v2121_v51 = vsel %vm8327_vm7, %v2117_v4, 0.0 }
0x160d   :  { %2122 = vadd.xlane.f32.xlu1 %v2121_v51 }
0x1696   :  { %v2120_v10 = vpop.xlane.xlu1 %2119 }
0x1697   :  { %v2124_v11 = vmul.f32 0.03125, %v2120_v10 }
0x1699   :  { %v2126_v12 = vadd.f32 1e-12, %v2124_v11 }
0x169a   :  { %v2123_v14 = vpop.xlane.xlu1 %2122 }
0x169b   :  { %6808 = vrsqrt.f32 %v2126_v12  ;;  %v2125_v15 = vmul.f32 0.03125, %v2123_v14 }
0x169d   :  { %v2127_v16 = vadd.f32 1e-12, %v2125_v15 }
0x169f   :  { %6810 = vrsqrt.f32 %v2127_v16 }
0x16a5   :  { %v6809_v17 = vpop.eup %6808 }
0x16a6   :  { %v2130_v19 = vmul.f32 %v6809_v17, %v2114_v62 }
0x16a8   :  { %v2136_v40 = vmul.f32 %v5747_v21, %v2130_v19 }
0x16a9   :  { %v6811_v26 = vpop.eup %6810 }
0x16aa   :  { %v2131_v43 = vmul.f32 %v6811_v26, %v2115_v61  ;;  %v7525_v29 = vadd.f32 %v5748_v27, %v2136_v40 }
0x16ac   :  { %v2137_v28 = vmul.f32 %v5747_v21, %v2131_v43 }
0x16ae   :  { %v7527_v35 = vadd.f32 %v5748_v27, %v2137_v28 }
0x16b0   :  { %v2144_v2 = vpack.c.bf16 %v7527_v35, %v7525_v29 }
0x16b2   :  { %6248 = vmatmul.mubr.msk.bf16.vlgmr.msra.gmra.mrb[28].mxu0 %vm8327_vm7, %v2144_v2  ;;  %6256 = vmatmul.mubr.msk.bf16.vlgmr.msra.gmra.mrb[48].mxu1 %vm8327_vm7, %v2144_v2 }
0x16b3   :  { %6263 = vmatprep.mubr.msk.bf16.mxu0 %vm8325_vm6, %v7367_v60  ;;  %6271 = vmatprep.mubr.msk.bf16.mxu1 %vm8325_vm6, %v7367_v60 }
0x16b4   :  { %6260 = vmatpush3.bf16.msra.mxu0 %v6693_v36  ;;  %6268 = vmatpush3.bf16.msra.mxu1 %v6694_v45 }
0x16b5   :  { %6261 = vmatprep.subr.bf16.mxu0 %v7367_v60  ;;  %6269 = vmatprep.subr.bf16.mxu1 %v7367_v60 }
0x16b8   :  { %6262 = vmatpush3.bf16.msra.mxu0 %v6695_v46  ;;  %6270 = vmatpush3.bf16.msra.mxu1 %v6696_v38 }
0x16b9   :  { %6275 = vmatprep.subr.bf16.mxu0 %v7367_v60  ;;  %6283 = vmatprep.subr.bf16.mxu1 %v7367_v60 }
0x1785   :  { %v2203_v13 = vpop.f32.mrb[28].mxu0  ;;  %v2265_v18 = vpop.f32.mrb[48].mxu1 }
0x1786   :  { %v7559_v1 = vadd.f32 %v5749_v23, %v2203_v13  ;;  %v7561_v24 = vadd.f32 %v5753_v39, %v2265_v18  ;;  %v6249_v41 = vpop.f32.mrb[29].mxu0  ;;  %v6257_v42 = vpop.f32.mrb[49].mxu1 }
0x1787   :  { %v2206_v33 = vpop.f32.mrb[30].mxu0  ;;  %v2268_v30 = vpop.f32.mrb[50].mxu1 }
0x1788   :  { %v7564_v34 = vmul.f32 0.70710677, %v7559_v1  ;;  %v7567_v37 = vmul.f32 0.70710677, %v7561_v24  ;;  %v7569_v47 = vadd.f32 %v5749_v23, %v2206_v33  ;;  %v7571_v59 = vadd.f32 %v5753_v39, %v2268_v30  ;;  %v6250_v48 = vpop.f32.mrb[31].mxu0  ;;  %v6258_v49 = vpop.f32.mrb[51].mxu1 }
0x178a   :  { %v2280_v5 = vand.u32 2147483647, %v7564_v34  ;;  %v2337_v44 = vand.u32 2147483647, %v7567_v37  ;;  %v7576_v50 = vmul.f32 0.70710677, %v7569_v47 }
0x178b   :  { %v7580_v9 = vmul.f32 0.70710677, %v7571_v59  ;;  %vm2276_vm13 = vcmp.ge.f32.partialorder %v7564_v34, 0.0  ;;  %vm2333_vm14 = vcmp.ge.f32.partialorder %v7567_v37, 0.0 }
0x178c   :  { %v2282_v55 = vmul.f32 0.3275911, %v2280_v5  ;;  %v2339_v56 = vmul.f32 0.3275911, %v2337_v44  ;;  %v2281_v57 = vand.u32 2147483647, %v7576_v50 }
0x178d   :  { %v2338_v54 = vand.u32 2147483647, %v7580_v9  ;;  %v2306_v4 = vsub.f32 0.0, %v2280_v5  ;;  %v2363_v51 = vsub.f32 0.0, %v2337_v44  ;;  %vm2277_vm15 = vcmp.ge.f32.partialorder %v7576_v50, 0.0 }
0x178e   :  { %v2284_v58 = vadd.f32 1.0, %v2282_v55  ;;  %v2341_v62 = vadd.f32 1.0, %v2339_v56  ;;  %v2283_v63 = vmul.f32 0.3275911, %v2281_v57  ;;  %v2307_v7 = vsub.f32 0.0, %v2281_v57 }
0x178f   :  { %v2340_v61 = vmul.f32 0.3275911, %v2338_v54  ;;  %v2308_v6 = vmul.f32 %v2306_v4, %v2280_v5  ;;  %v2365_v11 = vmul.f32 %v2363_v51, %v2337_v44  ;;  %v2364_v15 = vsub.f32 0.0, %v2338_v54 }
0x1790   :  { %6812 = vrcp.f32 %v2284_v58  ;;  %v2285_v53 = vadd.f32 1.0, %v2283_v63  ;;  %v2309_v21 = vmul.f32 %v2307_v7, %v2281_v57  ;;  %v2335_v34 = vsel %vm2333_vm14, 1.0, %v6998_v31 }
0x1791   :  { %6814 = vrcp.f32 %v2341_v62  ;;  %v2342_v0 = vadd.f32 1.0, %v2340_v61  ;;  %v2310_v17 = vmul.f32 1.442695, %v2308_v6  ;;  %v2367_v40 = vmul.f32 1.442695, %v2365_v11 }
0x1792   :  { %6816 = vrcp.f32 %v2285_v53  ;;  %v2366_v45 = vmul.f32 %v2364_v15, %v2338_v54  ;;  %v2312_v38 = vmul.f32 1.442695, %v2309_v21  ;;  %vm2334_vm0 = vcmp.ge.f32.partialorder %v7580_v9, 0.0 }
0x1793   :  { %6818 = vrcp.f32 %v2342_v0 }
0x1794   :  { %6820 = vpow2.f32 %v2310_v17  ;;  %v2369_v30 = vmul.f32 1.442695, %v2366_v45  ;;  %v2278_v17 = vsel %vm2276_vm13, 1.0, %v6998_v31 }
0x1795   :  { %6822 = vpow2.f32 %v2367_v40 }
0x1796   :  { %6824 = vpow2.f32 %v2312_v38  ;;  %v2273_v38 = vmul.f32 0.5, %v7569_v47 }
0x1797   :  { %6826 = vpow2.f32 %v2369_v30 }
0x179a   :  { %v6813_v52 = vpop.eup %6812 }
0x179b   :  { %v6815_v8 = vpop.eup %6814  ;;  %v2288_v10 = vmul.f32 1.0614054, %v6813_v52 }
0x179c   :  { %v2345_v12 = vmul.f32 1.0614054, %v6815_v8  ;;  %v6817_v16 = vpop.eup %6816 }
0x179d   :  { %v2290_v14 = vadd.f32 -1.4531521, %v2288_v10  ;;  %v2289_v43 = vmul.f32 1.0614054, %v6817_v16  ;;  %v6819_v28 = vpop.eup %6818 }
0x179e   :  { %v2347_v19 = vadd.f32 -1.4531521, %v2345_v12  ;;  %v2346_v23 = vmul.f32 1.0614054, %v6819_v28  ;;  %v6821_v61 = vpop.eup %6820 }
0x179f   :  { %v2292_v26 = vmul.f32 %v6813_v52, %v2290_v14  ;;  %v2291_v36 = vadd.f32 -1.4531521, %v2289_v43  ;;  %v6823_v51 = vpop.eup %6822 }
0x17a0   :  { %v2349_v27 = vmul.f32 %v6815_v8, %v2347_v19  ;;  %v2348_v41 = vadd.f32 -1.4531521, %v2346_v23  ;;  %v6825_v15 = vpop.eup %6824 }
0x17a1   :  { %v2294_v2 = vadd.f32 1.4214138, %v2292_v26  ;;  %v2293_v13 = vmul.f32 %v6817_v16, %v2291_v36  ;;  %v6827_v40 = vpop.eup %6826 }
0x17a2   :  { %v2351_v46 = vadd.f32 1.4214138, %v2349_v27  ;;  %v2350_v49 = vmul.f32 %v6819_v28, %v2348_v41  ;;  %v2329_v41 = vmul.f32 0.5, %v7561_v24 }
0x17a3   :  { %v2296_v39 = vmul.f32 %v6813_v52, %v2294_v2  ;;  %v2295_v33 = vadd.f32 1.4214138, %v2293_v13  ;;  %v2279_v2 = vsel %vm2277_vm15, 1.0, %v6998_v31 }
0x17a4   :  { %v2353_v18 = vmul.f32 %v6815_v8, %v2351_v46  ;;  %v2352_v56 = vadd.f32 1.4214138, %v2350_v49  ;;  %v2272_v46 = vmul.f32 0.5, %v7559_v1 }
0x17a5   :  { %v2298_v42 = vadd.f32 -0.28449672, %v2296_v39  ;;  %v2297_v44 = vmul.f32 %v6817_v16, %v2295_v33 }
0x17a6   :  { %v2355_v48 = vadd.f32 -0.28449672, %v2353_v18  ;;  %v2354_v63 = vmul.f32 %v6819_v28, %v2352_v56 }
0x17a7   :  { %v2300_v5 = vmul.f32 %v6813_v52, %v2298_v42  ;;  %v2299_v58 = vadd.f32 -0.28449672, %v2297_v44  ;;  %v2330_v42 = vmul.f32 0.5, %v7571_v59  ;;  %v5763_v59 = vld [vmem:[%s8319_s2 + $0x1c] ss:$0 sm:$0xff] }
0x17a8   :  { %v2357_v55 = vmul.f32 %v6815_v8, %v2355_v48  ;;  %v2356_v4 = vadd.f32 -0.28449672, %v2354_v63 }
0x17a9   :  { %v2302_v57 = vadd.f32 0.2548296, %v2300_v5  ;;  %v2301_v54 = vmul.f32 %v6817_v16, %v2299_v58 }
0x17aa   :  { %v2359_v62 = vadd.f32 0.2548296, %v2357_v55  ;;  %v2358_v11 = vmul.f32 %v6819_v28, %v2356_v4 }
0x17ab   :  { %v2304_v53 = vmul.f32 %v6813_v52, %v2302_v57  ;;  %v2303_v7 = vadd.f32 0.2548296, %v2301_v54 }
0x17ac   :  { %v2361_v0 = vmul.f32 %v6815_v8, %v2359_v62  ;;  %v2360_v52 = vadd.f32 0.2548296, %v2358_v11 }
0x17ad   :  { %v2314_v6 = vmul.f32 %v6821_v61, %v2304_v53  ;;  %v2305_v14 = vmul.f32 %v6817_v16, %v2303_v7 }
0x17ae   :  { %v2371_v10 = vmul.f32 %v6823_v51, %v2361_v0  ;;  %v2362_v26 = vmul.f32 %v6819_v28, %v2360_v52  ;;  %v2336_v28 = vsel %vm2334_vm0, 1.0, %v6998_v31 }
0x17af   :  { %v2316_v12 = vsub.f32 1.0, %v2314_v6  ;;  %v2315_v8 = vmul.f32 %v6825_v15, %v2305_v14 }
0x17b0   :  { %v2373_v19 = vsub.f32 1.0, %v2371_v10  ;;  %v2372_v16 = vmul.f32 %v6827_v40, %v2362_v26 }
0x17b1   :  { %v2318_v21 = vmul.f32 %v2316_v12, %v2278_v17  ;;  %v2317_v43 = vsub.f32 1.0, %v2315_v8 }
0x17b2   :  { %v2375_v27 = vmul.f32 %v2373_v19, %v2335_v34  ;;  %v2374_v37 = vsub.f32 1.0, %v2372_v16  ;;  %v6698_v19 = vld [vmem:[%s8320_s3 + $0x150] sm:$0xff]  }
0x17b3   :  { %v2320_v36 = vadd.f32 1.0, %v2318_v21  ;;  %v2319_v45 = vmul.f32 %v2317_v43, %v2279_v2 }
0x17b4   :  { %v2377_v23 = vadd.f32 1.0, %v2375_v27  ;;  %v2376_v39 = vmul.f32 %v2374_v37, %v2336_v28  ;;  %v5766_v28 = vld [vmem:[%s8319_s2 + $0x3] ss:$0 sm:$0xff] }
0x17b5   :  { %v2321_v50 = vadd.f32 1.0, %v2319_v45  ;;  %v2322_v13 = vmul.f32 %v2320_v36, %v2272_v46  ;;  %v5765_v45 = vld [vmem:[%s8319_s2 + $0x1e] ss:$0 sm:$0xff] }
0x17b6   :  { %v2378_v9 = vadd.f32 1.0, %v2376_v39  ;;  %v2379_v30 = vmul.f32 %v2377_v23, %v2329_v41 }
0x17b7   :  { %v2323_v18 = vmul.f32 %v2321_v50, %v2273_v38 }
0x17b8   :  { %v2380_v48 = vmul.f32 %v2378_v9, %v2330_v42 }
0x17b9   :  { %v2324_v33 = vpack.c.bf16 %v2323_v18, %v2322_v13 }
0x17ba   :  { %v2381_v1 = vpack.c.bf16 %v2380_v48, %v2379_v30 }
0x17bb   :  { %6272 = vmatmul.mubr.msk.bf16.vlgmr.msra.gmra.mrb[52].mxu1 %vm8327_vm7, %v2324_v33 }
0x17bc   :  { %6287 = vmatprep.mubr.msk.bf16.mxu1 %vm8325_vm6, %v7367_v60  ;;  %6264 = vmatmul.mubr.msk.bf16.vlgmr.msra.gmra.mrb[32].mxu0 %vm8327_vm7, %v2381_v1 }
0x17bd   :  { %6279 = vmatprep.mubr.msk.bf16.mxu0 %vm8325_vm6, %v7367_v60 }
0x188e   :  { %v2491_v47 = vpop.f32.mrb[52].mxu1 }
0x188f   :  { %v6273_v49 = vpop.f32.mrb[53].mxu1  ;;  %v2435_v5 = vpop.f32.mrb[32].mxu0 }
0x1890   :  { %v2494_v24 = vpop.f32.mrb[54].mxu1  ;;  %v2492_v55 = vadd.f32 %v2491_v47, %v2435_v5  ;;  %v6265_v56 = vpop.f32.mrb[33].mxu0 }
0x1891   :  { %v6274_v44 = vpop.f32.mrb[55].mxu1  ;;  %v2438_v57 = vpop.f32.mrb[34].mxu0 }
0x1892   :  { %v2503_v58 = vadd.f32 %v5763_v59, %v2492_v55  ;;  %v2495_v62 = vadd.f32 %v2494_v24, %v2438_v57  ;;  %v6266_v63 = vpop.f32.mrb[35].mxu0 }
0x1894   :  { %v2504_v53 = vadd.f32 %v5763_v59, %v2495_v62  ;;  %v2505_v54 = vadd.f32 %v2503_v58, %v7525_v29 }
0x1896   :  { %v2509_v61 = vsel %vm8327_vm7, %v2505_v54, 0.0  ;;  %v2506_v0 = vadd.f32 %v2504_v53, %v7527_v35  ;;  %v6697_v35 = vld [vmem:[%s8320_s3 + $0x148] sm:$0xff]  }
0x1897   :  { %2510 = vadd.xlane.f32.xlu1 %v2509_v61  ;;  %6276 = vmatpush3.bf16.msra.mxu0 %v6697_v35 }
0x1898   :  { %v2512_v4 = vsel %vm8327_vm7, %v2506_v0, 0.0  ;;  %6277 = vmatprep.subr.bf16.mxu0 %v7367_v60  ;;  %v5764_v60 = vld [vmem:[%s8319_s2 + $0x1d] ss:$0 sm:$0xff] }
0x1899   :  { %2513 = vadd.xlane.f32.xlu0 %v2512_v4 }
0x189b   :  { %6278 = vmatpush3.bf16.msra.mxu0 %v6698_v19 }
0x189c   :  { %2911 = vmatprep.subr.bf16.mxu0 %v6991_v3 }
0x1924   :  { %v2511_v51 = vpop.xlane.xlu1 %2510 }
0x1925   :  { %v2515_v6 = vmul.f32 0.03125, %v2511_v51 }
0x1926   :  { %v2514_v7 = vpop.xlane.xlu0 %2513 }
0x1927   :  { %v2517_v10 = vsub.f32 %v2505_v54, %v2515_v6  ;;  %v2516_v11 = vmul.f32 0.03125, %v2514_v7 }
0x1929   :  { %v2518_v12 = vsub.f32 %v2506_v0, %v2516_v11  ;;  %v2519_v14 = vmul.f32 %v2517_v10, %v2517_v10 }
0x192b   :  { %v2521_v15 = vsel %vm8327_vm7, %v2519_v14, 0.0  ;;  %v2520_v17 = vmul.f32 %v2518_v12, %v2518_v12 }
0x192c   :  { %2522 = vadd.xlane.f32.xlu1 %v2521_v15 }
0x192d   :  { %v2524_v29 = vsel %vm8327_vm7, %v2520_v17, 0.0 }
0x1930   :  { %2525 = vadd.xlane.f32.xlu1 %v2524_v29 }
0x19b9   :  { %v2523_v52 = vpop.xlane.xlu1 %2522 }
0x19ba   :  { %v2527_v21 = vmul.f32 0.03125, %v2523_v52 }
0x19bc   :  { %v2529_v8 = vadd.f32 1e-12, %v2527_v21 }
0x19bd   :  { %v2526_v26 = vpop.xlane.xlu1 %2525 }
0x19be   :  { %6828 = vrsqrt.f32 %v2529_v8  ;;  %v2528_v40 = vmul.f32 0.03125, %v2526_v26 }
0x19c0   :  { %v2530_v34 = vadd.f32 1e-12, %v2528_v40 }
0x19c2   :  { %6830 = vrsqrt.f32 %v2530_v34 }
0x19c8   :  { %v6829_v43 = vpop.eup %6828 }
0x19c9   :  { %v2533_v27 = vmul.f32 %v6829_v43, %v2517_v10 }
0x19cb   :  { %v2539_v16 = vmul.f32 %v5764_v60, %v2533_v27 }
0x19cc   :  { %v6831_v2 = vpop.eup %6830 }
0x19cd   :  { %v2534_v36 = vmul.f32 %v6831_v2, %v2518_v12  ;;  %v2545_v46 = vadd.f32 %v5765_v45, %v2539_v16 }
0x19cf   :  { %v2540_v37 = vmul.f32 %v5764_v60, %v2534_v36 }
0x19d1   :  { %v2546_v38 = vadd.f32 %v5765_v45, %v2540_v37 }
0x19d3   :  { %v2547_v50 = vpack.c.bf16 %v2546_v38, %v2545_v46 }
0x19d5   :  { %6280 = vmatmul.mubr.msk.bf16.vlgmr.msra.gmra.mrb[36].mxu0 %vm8327_vm7, %v2547_v50 }
0x1aa8   :  { %v2606_v23 = vpop.f32.mrb[36].mxu0 }
0x1aa9   :  { %v2607_v39 = vadd.f32 %v5766_v28, %v2606_v23  ;;  %v6281_v13 = vpop.f32.mrb[37].mxu0 }
0x1aaa   :  { %v2609_v18 = vpop.f32.mrb[38].mxu0 }
0x1aab   :  { %v2615_v41 = vmul.f32 0.70710677, %v2607_v39  ;;  %v2610_v42 = vadd.f32 %v5766_v28, %v2609_v18  ;;  %v6282_v9 = vpop.f32.mrb[39].mxu0  ;;  %v2613_v60 = vmul.f32 0.5, %v2607_v39 }
0x1aad   :  { %v2621_v33 = vand.u32 2147483647, %v2615_v41  ;;  %v2616_v30 = vmul.f32 0.70710677, %v2610_v42  ;;  %vm2617_vm1 = vcmp.ge.f32.partialorder %v2615_v41, 0.0  ;;  %v2614_v37 = vmul.f32 0.5, %v2610_v42 }
0x1aae   :  { %v2619_v40 = vsel %vm2617_vm1, 1.0, %v6998_v31 }
0x1aaf   :  { %v2623_v48 = vmul.f32 0.3275911, %v2621_v33  ;;  %v2622_v1 = vand.u32 2147483647, %v2616_v30  ;;  %v2647_v5 = vsub.f32 0.0, %v2621_v33  ;;  %vm2618_vm3 = vcmp.ge.f32.partialorder %v2616_v30, 0.0 }
0x1ab0   :  { %v2620_v2 = vsel %vm2618_vm3, 1.0, %v6998_v31 }
0x1ab1   :  { %v2625_v47 = vadd.f32 1.0, %v2623_v48  ;;  %v2624_v49 = vmul.f32 0.3275911, %v2622_v1  ;;  %v2648_v59 = vsub.f32 0.0, %v2622_v1  ;;  %v2649_v55 = vmul.f32 %v2647_v5, %v2621_v33 }
0x1ab3   :  { %6832 = vrcp.f32 %v2625_v47  ;;  %v2626_v24 = vadd.f32 1.0, %v2624_v49  ;;  %v2650_v58 = vmul.f32 %v2648_v59, %v2622_v1  ;;  %v2651_v63 = vmul.f32 1.442695, %v2649_v55  ;;  %v6699_v1 = vld [vmem:[%s8321_s4] sm:$0xff]   ;;  %v6700_v47 = vld [vmem:[%s8321_s4 + $0x8] sm:$0xff]  }
0x1ab4   :  { %6284 = vmatpush3.bf16.msra.mxu1 %v6699_v1  ;;  %v7643_v49 = vld [vmem:[%s8324_s7] sm:$0xff] }
0x1ab5   :  { %6834 = vrcp.f32 %v2626_v24  ;;  %v2653_v0 = vmul.f32 1.442695, %v2650_v58  ;;  %6285 = vmatprep.subr.bf16.mxu1 %v7643_v49 }
0x1ab6   :  { %6836 = vpow2.f32 %v2651_v63 }
0x1ab7   :  { %6838 = vpow2.f32 %v2653_v0 }
0x1ab8   :  { %6286 = vmatpush3.bf16.msra.mxu1 %v6700_v47 }
0x1ab9   :  { %6291 = vmatprep.subr.bf16.mxu1 %v7643_v49 }
0x1abd   :  { %v6833_v44 = vpop.eup %6832 }
0x1abe   :  { %v2629_v56 = vmul.f32 1.0614054, %v6833_v44 }
0x1abf   :  { %v6835_v57 = vpop.eup %6834 }
0x1ac0   :  { %v2631_v62 = vadd.f32 -1.4531521, %v2629_v56  ;;  %v2630_v53 = vmul.f32 1.0614054, %v6835_v57  ;;  %v6837_v35 = vpop.eup %6836 }
0x1ac1   :  { %v6839_v8 = vpop.eup %6838 }
0x1ac2   :  { %v2633_v54 = vmul.f32 %v6833_v44, %v2631_v62  ;;  %v2632_v61 = vadd.f32 -1.4531521, %v2630_v53  ;;  %v5770_v62 = vld [vmem:[%s8319_s2 + $0x4] ss:$0 sm:$0xff] }
0x1ac4   :  { %v2635_v4 = vadd.f32 1.4214138, %v2633_v54  ;;  %v2634_v51 = vmul.f32 %v6835_v57, %v2632_v61  ;;  %v5771_v61 = vld [vmem:[%s8319_s2 + $0x5] ss:$0 sm:$0xff] }
0x1ac6   :  { %v2637_v6 = vmul.f32 %v6833_v44, %v2635_v4  ;;  %v2636_v7 = vadd.f32 1.4214138, %v2634_v51 }
0x1ac8   :  { %v2639_v10 = vadd.f32 -0.28449672, %v2637_v6  ;;  %v2638_v11 = vmul.f32 %v6835_v57, %v2636_v7  ;;  %v6999_v7 = vmov 3  }
0x1ac9   :  { %6632 = vset.pattern.permute.xlu1 %v6999_v7  ;;  %6631 = vset.pattern.permute.xlu0 %v6999_v7 }
0x1aca   :  { %v2641_v12 = vmul.f32 %v6833_v44, %v2639_v10  ;;  %v2640_v14 = vadd.f32 -0.28449672, %v2638_v11  ;;  %v5772_v10 = vld [vmem:[%s8319_s2] ss:$0 sm:$0xff] }
0x1acc   :  { %v2643_v15 = vadd.f32 0.2548296, %v2641_v12  ;;  %v2642_v17 = vmul.f32 %v6835_v57, %v2640_v14 }
0x1ace   :  { %v2645_v29 = vmul.f32 %v6833_v44, %v2643_v15  ;;  %v2644_v19 = vadd.f32 0.2548296, %v2642_v17 }
0x1ad0   :  { %v2655_v52 = vmul.f32 %v6837_v35, %v2645_v29  ;;  %v2646_v21 = vmul.f32 %v6835_v57, %v2644_v19  ;;  %v2789_v35 = vld [vmem:[%s8317_s0 + $0x8] sm:$0xff]  ;;  %v2788_v19 = vld [vmem:[%s8317_s0] sm:$0xff] }
0x1ad2   :  { %v2657_v26 = vsub.f32 1.0, %v2655_v52  ;;  %v2656_v34 = vmul.f32 %v6839_v8, %v2646_v21  ;;  %v2795_v52 = vadd.s32 128, %v2789_v35  ;;  %v2794_v21 = vadd.s32 128, %v2788_v19 }
0x1ad4   :  { %v2659_v43 = vmul.f32 %v2657_v26, %v2619_v40  ;;  %v2658_v27 = vsub.f32 1.0, %v2656_v34  ;;  %v2810_v8 = vadd.s32 8, %v2794_v21  ;;  %v7000_v26 = vmov 4   ;;  %v6701_v40 = vld [vmem:[%s8320_s3] sm:$0xff]   ;;  %v6702_v34 = vld [vmem:[%s8320_s3 + $0x8] sm:$0xff]  }
0x1ad5   :  { %2912 = vmatpush1.bf16.msra.mxu0 %v6701_v40 }
0x1ad6   :  { %v2661_v16 = vadd.f32 1.0, %v2659_v43  ;;  %v2660_v36 = vmul.f32 %v2658_v27, %v2620_v2  ;;  %2913 = vmatprep.subr.bf16.mxu0 %v6991_v3  ;;  %v6703_v43 = vld [vmem:[%s8320_s3 + $0x10] sm:$0xff]   ;;  %v6704_v27 = vld [vmem:[%s8320_s3 + $0x18] sm:$0xff]   ;;  %v2777_v2 = vcvt.s32.f32 %v7099_v20 }
0x1ad8   :  { %v2663_v45 = vmul.f32 %v2661_v16, %v2613_v60  ;;  %v2662_v46 = vadd.f32 1.0, %v2660_v36  ;;  %v6705_v60 = vld [vmem:[%s8320_s3 + $0x20] sm:$0xff]  }
0x1ad9   :  { %2914 = vmatpush1.bf16.msra.mxu0 %v6702_v34  ;;  %v6712_v34 = vld [vmem:[%s8320_s3 + $0x58] sm:$0xff]  }
0x1ada   :  { %v2667_v38 = vsel %vm8327_vm7, %v2663_v45, 0.0  ;;  %v2664_v50 = vmul.f32 %v2662_v46, %v2614_v37  ;;  %2915 = vmatprep.subr.bf16.mxu0 %v6991_v3  ;;  %v6706_v46 = vld [vmem:[%s8320_s3 + $0x28] sm:$0xff]  }
0x1adb   :  { %2668 = vadd.xlane.f32.xlu1 %v2667_v38  ;;  %v2811_v38 = vadd.s32 8, %v2795_v52 }
0x1adc   :  { %v2670_v28 = vsel %vm8327_vm7, %v2664_v50, 0.0 }
0x1add   :  { %2916 = vmatpush1.bf16.msra.mxu0 %v6703_v43 }
0x1ade   :  { %2917 = vmatprep.subr.bf16.mxu0 %v6991_v3 }
0x1adf   :  { %2671 = vadd.xlane.f32.xlu1 %v2670_v28  ;;  %v6708_v28 = vld [vmem:[%s8320_s3 + $0x38] sm:$0xff]  }
0x1ae1   :  { %2918 = vmatpush1.bf16.msra.mxu0 %v6704_v27  ;;  %v6713_v27 = vld [vmem:[%s8320_s3 + $0x60] sm:$0xff]  }
0x1ae2   :  { %2919 = vmatprep.subr.bf16.mxu0 %v6991_v3 }
0x1ae5   :  { %2920 = vmatpush1.bf16.msra.mxu0 %v6705_v60  ;;  %v6714_v60 = vld [vmem:[%s8320_s3 + $0x68] sm:$0xff]  }
0x1ae6   :  { %2921 = vmatprep.subr.bf16.mxu0 %v6991_v3 }
0x1ae9   :  { %2922 = vmatpush1.bf16.msra.mxu0 %v6706_v46 }
0x1aea   :  { %2923 = vmatprep.subr.bf16.mxu0 %v6991_v3 }
0x1b68   :  { %v2669_v23 = vpop.xlane.xlu1 %2668 }
0x1b69   :  { %v2673_v13 = vmul.f32 0.03125, %v2669_v23  ;;  %v6709_v23 = vld [vmem:[%s8320_s3 + $0x40] sm:$0xff]  }
0x1b6b   :  { %v2675_v18 = vsub.f32 %v2663_v45, %v2673_v13 }
0x1b6c   :  { %v2672_v41 = vpop.xlane.xlu1 %2671 }
0x1b6d   :  { %v2674_v9 = vmul.f32 0.03125, %v2672_v41  ;;  %v2677_v39 = vmul.f32 %v2675_v18, %v2675_v18 }
0x1b6f   :  { %v2676_v33 = vsub.f32 %v2664_v50, %v2674_v9  ;;  %v2679_v30 = vsel %vm8327_vm7, %v2677_v39, 0.0  ;;  %v6707_v50 = vld [vmem:[%s8320_s3 + $0x30] sm:$0xff]  }
0x1b70   :  { %2680 = vadd.xlane.f32.xlu1 %v2679_v30  ;;  %2924 = vmatpush1.bf16.msra.mxu0 %v6707_v50  ;;  %v5798_v50 = vld [vmem:[%s8319_s2 + $0x9] ss:$0 sm:$0xff] }
0x1b71   :  { %v2678_v48 = vmul.f32 %v2676_v33, %v2676_v33  ;;  %2925 = vmatprep.subr.bf16.mxu0 %v6991_v3 }
0x1b73   :  { %v2682_v42 = vsel %vm8327_vm7, %v2678_v48, 0.0 }
0x1b74   :  { %2683 = vadd.xlane.f32.xlu1 %v2682_v42  ;;  %2926 = vmatpush1.bf16.msra.mxu0 %v6708_v28 }
0x1b75   :  { %2927 = vmatprep.subr.bf16.mxu0 %v6991_v3 }
0x1b78   :  { %2928 = vmatpush1.bf16.msra.mxu0 %v6709_v23 }
0x1bfd   :  { %v2681_v24 = vpop.xlane.xlu1 %2680 }
0x1bfe   :  { %v2685_v5 = vmul.f32 0.03125, %v2681_v24 }
0x1c00   :  { %v2687_v59 = vadd.f32 1e-12, %v2685_v5 }
0x1c01   :  { %v2684_v44 = vpop.xlane.xlu1 %2683 }
0x1c02   :  { %6840 = vrsqrt.f32 %v2687_v59  ;;  %v2686_v55 = vmul.f32 0.03125, %v2684_v44 }
0x1c04   :  { %v2688_v56 = vadd.f32 1e-12, %v2686_v55 }
0x1c06   :  { %6842 = vrsqrt.f32 %v2688_v56 }
0x1c0c   :  { %v6841_v57 = vpop.eup %6840 }
0x1c0d   :  { %v2691_v58 = vmul.f32 %v6841_v57, %v2675_v18 }
0x1c0f   :  { %v2697_v53 = vmul.f32 %v5770_v62, %v2691_v58 }
0x1c10   :  { %v6843_v63 = vpop.eup %6842 }
0x1c11   :  { %v2692_v54 = vmul.f32 %v6843_v63, %v2676_v33  ;;  %v2703_v4 = vadd.f32 %v5771_v61, %v2697_v53 }
0x1c13   :  { %v2698_v0 = vmul.f32 %v5770_v62, %v2692_v54 }
0x1c15   :  { %v2704_v51 = vadd.f32 %v5771_v61, %v2698_v0 }
0x1c17   :  { %v2705_v6 = vpack.c.bf16 %v2704_v51, %v2703_v4  ;;  %v6710_v4 = vld [vmem:[%s8320_s3 + $0x48] sm:$0xff]   ;;  %v6711_v51 = vld [vmem:[%s8320_s3 + $0x50] sm:$0xff]  }
0x1c19   :  { %6288 = vmatmul.mubr.msk.bf16.vlgmr.msra.gmra.mrb[56].mxu1 %vm8327_vm7, %v2705_v6 }
0x1c1a   :  { %6295 = vmatprep.mubr.msk.bf16.mxu1 %vm8325_vm6, %v7643_v49  ;;  %6292 = vmatpush3.bf16.msra.mxu1 %v6710_v4 }
0x1c1b   :  { %6293 = vmatprep.subr.bf16.mxu1 %v7643_v49 }
0x1c1e   :  { %6294 = vmatpush3.bf16.msra.mxu1 %v6711_v51 }
0x1c1f   :  { %6299 = vmatprep.subr.bf16.mxu1 %v7643_v49 }
0x1cec   :  { %v2764_v11 = vpop.f32.mrb[56].mxu1 }
0x1ced   :  { %v2765_v12 = vadd.f32 %v5772_v10, %v2764_v11  ;;  %v6289_v14 = vpop.f32.mrb[57].mxu1 }
0x1cee   :  { %v2767_v15 = vpop.f32.mrb[58].mxu1 }
0x1cef   :  { %2771 = vst [vmem:[#allocation2] sm:$0xff] %v2765_v12  ;;  %v2768_v17 = vadd.f32 %v5772_v10, %v2767_v15  ;;  %2773 = vmax.xlane.f32.xlu1 %v2765_v12  ;;  %v6290_v29 = vpop.f32.mrb[59].mxu1 }
0x1cf0   :  { %v5792_v29 = vld [vmem:[%s8319_s2 + $0x1] ss:$0 sm:$0xff] }
0x1cf1   :  { %2772 = vst [vmem:[#allocation2 + $0x8] sm:$0xff] %v2768_v17 }
0x1cf3   :  { %2775 = vmax.xlane.f32.xlu1 %v2768_v17 }
0x1d04   :  { %2800 = vperm.xlu1 %6632, %v2795_v52  }
0x1d08   :  { %6633 = vset.pattern.permute.xlu1 %v7000_v26 }
0x1d09   :  { %2813 = vperm.xlu1 %6633, %v2810_v8  }
0x1d7c   :  { %v2774_v16 = vpop.xlane.xlu1 %2773 }
0x1d7d   :  { %vm2778_vm4 = vcmp.ge.f32.partialorder %v2765_v12, %v2774_v16  ;;  %v5794_v16 = vld [vmem:[%s8319_s2 + $0x8] ss:$0 sm:$0xff] }
0x1d7e   :  { %v2780_v36 = vsel %vm2778_vm4, %v2777_v2, 128.0 }
0x1d7f   :  { %2782 = vmin.xlane.f32.xlu0 %v2780_v36 }
0x1d80   :  { %v2776_v45 = vpop.xlane.xlu1 %2775 }
0x1d81   :  { %vm2779_vm5 = vcmp.ge.f32.partialorder %v2768_v17, %v2776_v45 }
0x1d82   :  { %v2781_v37 = vsel %vm2779_vm5, %v2777_v2, 128.0  ;;  %v6715_v2 = vld [vmem:[%s8320_s3 + $0x70] sm:$0xff]  }
0x1d83   :  { %2784 = vmin.xlane.f32.xlu1 %v2781_v37 }
0x1d84   :  { %v2801_v13 = vpop.permute.xlu1 %2800 }
0x1d85   :  { %vm2804_vm3 = vcmp.eq.s32.totalorder %v7099_v20, %v2801_v13  ;;  %vm2805_vm5 = vcmp.eq.s32.totalorder %v7102_v22, %v2801_v13 }
0x1d88   :  { %v2814_v18 = vpop.permute.xlu1 %2813 }
0x1d89   :  { %vm2819_vm15 = vcmp.eq.s32.totalorder %v7102_v22, %v2814_v18  ;;  %vm2818_vm2 = vcmp.eq.s32.totalorder %v7099_v20, %v2814_v18 }
0x1d94   :  { %2816 = vperm.xlu1 %6633, %v2811_v38  }
0x1d95   :  { %2797 = vperm.xlu0 %6631, %v2794_v21   ;;  %v5793_v21 = vld [vmem:[%s8319_s2 + $0x2] ss:$0 sm:$0xff] }
0x1e0c   :  { %v7701_v41 = vpop.xlane.xlu0 %2782 }
0x1e0d   :  { %v6587_v9 = vtrunc.f32 %v7701_v41 }
0x1e0f   :  { %v6588_v30 = vcvt.f32.s32 %v6587_v9 }
0x1e10   :  { %v7704_v39 = vpop.xlane.xlu1 %2784 }
0x1e11   :  { %v6589_v33 = vtrunc.f32 %v7704_v39  ;;  %vm2791_vm11 = vcmp.eq.s32.totalorder %v7102_v22, %v6588_v30  ;;  %vm2790_vm13 = vcmp.eq.s32.totalorder %v7099_v20, %v6588_v30 }
0x1e13   :  { %v6590_v48 = vcvt.f32.s32 %v6589_v33 }
0x1e14   :  { %v2798_v42 = vpop.permute.xlu0 %2797  ;;  %v2817_v3 = vpop.permute.xlu1 %2816 }
0x1e15   :  { %vm2802_vm9 = vcmp.eq.s32.totalorder %v7099_v20, %v2798_v42  ;;  %vm2803_vm10 = vcmp.eq.s32.totalorder %v7102_v22, %v2798_v42  ;;  %vm2792_vm12 = vcmp.eq.s32.totalorder %v7099_v20, %v6590_v48  ;;  %vm2793_vm0 = vcmp.eq.s32.totalorder %v7102_v22, %v6590_v48  ;;  %v5802_v42 = vld [vmem:[%s8319_s2 + $0xa] ss:$0 sm:$0xff] }
0x1e16   :  { %vm2807_vm14 = vmor %vm2791_vm11, %vm2803_vm10  ;;  %vm2821_vm7 = vcmp.eq.s32.totalorder %v7102_v22, %v2817_v3  ;;  %vm2820_vm10 = vcmp.eq.s32.totalorder %v7099_v20, %v2817_v3 }
0x1e17   :  { %vm2806_vm1 = vmor %vm2790_vm13, %vm2802_vm9 }
0x1e18   :  { %vm2823_vm4 = vmor %vm2807_vm14, %vm2819_vm15  ;;  %vm8336_vm15 = vcmask 130048  }
0x1e19   :  { %vm2808_vm6 = vmor %vm2792_vm12, %vm2804_vm3  ;;  %v5777_v1 = vsel %vm2823_vm4, 1.0, %v7643_v49  ;;  %vm8337_vm12 = vcmask 261120  }
0x1e1a   :  { %vm2809_vm8 = vmor %vm2793_vm0, %vm2805_vm5  ;;  %vm8342_vm0 = vmmov 0   ;;  %vm8346_vm5 = vnez %v8335_v25 }
0x1e1b   :  { %vm2822_vm11 = vmor %vm2806_vm1, %vm2818_vm2 }
0x1e1c   :  { %vm2825_vm9 = vmor %vm2809_vm8, %vm2821_vm7 }
0x1e1d   :  { %vm2824_vm13 = vmor %vm2808_vm6, %vm2820_vm10  ;;  %v5779_v47 = vsel %vm2825_vm9, 1.0, %v7643_v49 }
0x1e1e   :  { %v2835_v24 = vpack.c.bf16 %v5779_v47, %v5777_v1  ;;  %vm5790_vm14 = vmpackc.low %vm2824_vm13, %vm2822_vm11 }
0x1e1f   :  { %vm8338_vm2 = vmmov %vm8337_vm12 }
0x1e20   :  { %5789 = vmatprep.mubr.msk.bf16.mxu0 %vm8336_vm15, %v2835_v24  ;;  %vm8339_vm7 = vmmov %vm8338_vm2 }
0x1e21   :  { %5791 = vmatmul.mubr.msk.bf16.vlgmr.msra.gmra.mrb[40].mxu0 %vm5790_vm14, %v6995_v32  ;;  %vm8340_vm6 = vmmov %vm8338_vm2 }
0x1e22   :  { %vm8341_vm8 = vmmov %vm8338_vm2 }
0x1e23   :  { %vm8343_vm1 = vmmov %vm8338_vm2 }
0x1e24   :  { %vm8344_vm3 = vmmov %vm8343_vm1 }
0x1e25   :  { %vm8345_vm4 = vmmov %vm8336_vm15 }
0x1e26   :  { %vm8347_vm10 = vmmov %vm8345_vm4 }
0x1e27   :  { %vm8348_vm11 = vmmov %vm8345_vm4 }
0x1e28   :  { %vm8349_vm9 = vmmov %vm8345_vm4 }
0x1e29   :  { %vm8350_vm13 = vmmov %vm8345_vm4 }
0x1e2a   :  { %vm8351_vm14 = vmmov %vm8345_vm4 }
0x1e2b   :  { %vm8352_vm15 = vmmov %vm8345_vm4 }
0x1ef4   :  { %v2945_v5 = vpop.f32.mrb[40].mxu0 }
0x1ef5   :  { %v2947_v22 = vpop.f32.mrb[41].mxu0  ;;  %v2954_v59 = vsel %vm8337_vm12, %v2945_v5, 0.0  ;;  %vm8353_vm12 = vmmov %vm8345_vm4 }
0x1ef6   :  { %2955 = vadd.xlane.f32.xlu1 %v2954_v59  ;;  %v2948_v44 = vpop.f32.mrb[42].mxu0 }
0x1ef7   :  { %v2950_v20 = vpop.f32.mrb[43].mxu0  ;;  %v2957_v55 = vsel %vm8338_vm2, %v2948_v44, 0.0  ;;  %vm8354_vm2 = vmmov %vm8345_vm4 }
0x1ef8   :  { %2958 = vadd.xlane.f32.xlu0 %v2957_v55 }
0x1f83   :  { %v2956_v56 = vpop.xlane.xlu1 %2955 }
0x1f84   :  { %v2960_v57 = vmul.f32 0.03125, %v2956_v56 }
0x1f85   :  { %v2959_v58 = vpop.xlane.xlu0 %2958 }
0x1f86   :  { %v2962_v62 = vsub.f32 %v2945_v5, %v2960_v57  ;;  %v2961_v63 = vmul.f32 0.03125, %v2959_v58 }
0x1f88   :  { %v2963_v53 = vsub.f32 %v2948_v44, %v2961_v63  ;;  %v2964_v54 = vmul.f32 %v2962_v62, %v2962_v62 }
0x1f8a   :  { %v2966_v61 = vsel %vm8339_vm7, %v2964_v54, 0.0  ;;  %v2965_v32 = vmul.f32 %v2963_v53, %v2963_v53  ;;  %v7805_v54 = vld [vmem:[%s8318_s1 + $0x18] sm:$0xff]  ;;  %vm8355_vm7 = vmmov %vm8354_vm2 }
0x1f8b   :  { %2967 = vadd.xlane.f32.xlu1 %v2966_v61 }
0x1f8c   :  { %v2969_v0 = vsel %vm8340_vm6, %v2965_v32, 0.0  ;;  %vm8356_vm6 = vmmov %vm8354_vm2 }
0x1f8f   :  { %2970 = vadd.xlane.f32.xlu1 %v2969_v0  ;;  %v7810_v0 = vld [vmem:[%s8318_s1 + $0x10] sm:$0xff]  ;;  %s7003_s1 = smov [#allocation2]  }
0x1f90   :  { %s5619_s12 = sshll.u32 %s7003_s1, 4  ;;  %s5620_s12 = int_to_ptr.vmem [resolvable:$true] %s5619_s12 }
0x1f91   :  { %s6943_s13 = scalar_lea.vmem %s5620_s12, 256  ;;  %p6948_p1 = scmp.lt.s32.totalorder %s5620_s12, %s5620_s12 }
0x1f92   :  { %p6944_p0 = scmp.ne.s32.totalorder %s5620_s12, %s6943_s13  ;;  %p6949_p2 = scmp.lt.s32.totalorder %s6943_s13, %s6943_s13 }
0x1f94   :  { %p6950_p3 = por %p6949_p2, %p6948_p1 }
0x1f96   :  { %p6951_p4 = pnand %p6950_p3, %p6944_p0 }
0x2018   :  { %v2968_v6 = vpop.xlane.xlu1 %2967 }
0x2019   :  { %v2972_v7 = vmul.f32 0.03125, %v2968_v6 }
0x201b   :  { %v2974_v10 = vadd.f32 1e-12, %v2972_v7 }
0x201c   :  { %v2971_v11 = vpop.xlane.xlu1 %2970 }
0x201d   :  { %6844 = vrsqrt.f32 %v2974_v10  ;;  %v2973_v12 = vmul.f32 0.03125, %v2971_v11 }
0x201f   :  { %v2975_v14 = vadd.f32 1e-12, %v2973_v12 }
0x2021   :  { %6846 = vrsqrt.f32 %v2975_v14 }
0x2027   :  { %v6845_v15 = vpop.eup %6844 }
0x2028   :  { %v2978_v17 = vmul.f32 %v6845_v15, %v2962_v62 }
0x202a   :  { %v2984_v19 = vmul.f32 %v5792_v29, %v2978_v17 }
0x202b   :  { %v6847_v35 = vpop.eup %6846 }
0x202c   :  { %v2979_v52 = vmul.f32 %v6847_v35, %v2963_v53  ;;  %v7741_v26 = vadd.f32 %v5793_v21, %v2984_v19 }
0x202e   :  { %v2985_v8 = vmul.f32 %v5792_v29, %v2979_v52 }
0x2030   :  { %v7743_v40 = vadd.f32 %v5793_v21, %v2985_v8 }
0x2032   :  { %v2992_v43 = vpack.c.bf16 %v7743_v40, %v7741_v26 }
0x2034   :  { %6296 = vmatmul.mubr.msk.bf16.vlgmr.msra.gmra.mrb[60].mxu1 %vm8341_vm8, %v2992_v43  ;;  %vm8357_vm8 = vmmov %vm8354_vm2 }
0x2035   :  { %6300 = vmatpush3.bf16.msra.mxu1 %v6712_v34  ;;  %6303 = vmatprep.mubr.msk.bf16.mxu1 %vm8342_vm0, %v7643_v49 }
0x2036   :  { %6301 = vmatprep.subr.bf16.mxu1 %v7643_v49 }
0x2039   :  { %6302 = vmatpush3.bf16.msra.mxu1 %v6713_v27 }
0x203a   :  { %6307 = vmatprep.subr.bf16.mxu1 %v7643_v49 }
0x203c   :  { %6304 = vmatmul.mubr.msk.bf16.vlgmr.msra.gmra.mrb[64].mxu1 %vm8343_vm1, %v2992_v43  ;;  %vm8358_vm1 = vmmov %vm8354_vm2 }
0x203d   :  { %6308 = vmatpush3.bf16.msra.mxu1 %v6714_v60  ;;  %6311 = vmatprep.mubr.msk.bf16.mxu1 %vm8342_vm0, %v7643_v49 }
0x203e   :  { %6309 = vmatprep.subr.bf16.mxu1 %v7643_v49 }
0x2041   :  { %6310 = vmatpush3.bf16.msra.mxu1 %v6715_v2 }
0x2044   :  { %6312 = vmatmul.mubr.msk.bf16.vlgmr.msra.gmra.mrb[68].mxu1 %vm8344_vm3, %v2992_v43  ;;  %vm8359_vm3 = vmmov %vm8358_vm1 }
0x2107   :  { %v3051_v36 = vpop.f32.mrb[60].mxu1 }
0x2108   :  { %v3052_v45 = vadd.f32 %v5794_v16, %v3051_v36  ;;  %v6297_v37 = vpop.f32.mrb[61].mxu1 }
0x2109   :  { %v3054_v46 = vpop.f32.mrb[62].mxu1 }
0x210a   :  { %3436 = vrot.lane.b32.xlu0 %v3052_v45, %s6997_s30  ;;  %v6298_v38 = vpop.f32.mrb[63].mxu1  ;;  %6319 = vmatprep.mubr.msk.f32.mxu1 %vm8345_vm4, %v3052_v45  ;;  %v3055_v1 = vadd.f32 %v5794_v16, %v3054_v46  ;;  %vm8360_vm4 = vmmov %vm8358_vm1 }
0x210f   :  { %v3113_v28 = vpop.f32.mrb[64].mxu1 }
0x2110   :  { %v6305_v23 = vpop.f32.mrb[65].mxu1  ;;  %v3114_v18 = vadd.f32 %v5798_v50, %v3113_v28 }
0x2111   :  { %v3116_v13 = vpop.f32.mrb[66].mxu1 }
0x2112   :  { %v3117_v9 = vadd.f32 %v5798_v50, %v3116_v13  ;;  %v6306_v33 = vpop.f32.mrb[67].mxu1 }
0x2114   :  { %v6634_v30 = vpack.i.bf16 %v3117_v9, %v3114_v18  ;;  %v6547_v48 = vpack.c.bf16 %v3117_v9, %v3114_v18 }
0x2116   :  { %6635 = vrot.lane.b32.xlu1 %v6634_v30, %s6997_s30  ;;  %6549 = vmatprep.subr.msk.bf16.mxu1 %vm8346_vm5, %v6547_v48 }
0x2117   :  { %v3175_v3 = vpop.f32.mrb[68].mxu1  ;;  %6552 = vmatpush3.bf16.xpose.msk.msra.mxu1 %vm8346_vm5, %v6547_v48 }
0x2118   :  { %v6313_v47 = vpop.f32.mrb[69].mxu1  ;;  %v7785_v5 = vadd.f32 %v5802_v42, %v3175_v3 }
0x2119   :  { %v3178_v24 = vpop.f32.mrb[70].mxu1  ;;  %v6716_v47 = vld [vmem:[%s8320_s3 + $0x78] sm:$0xff]  }
0x211a   :  { %v7787_v22 = vadd.f32 %v5802_v42, %v3178_v24  ;;  %3438 = vrot.lane.b32.xlu1 %v3055_v1, %s6997_s30  ;;  %v6314_v59 = vpop.f32.mrb[71].mxu1 }
0x211c   :  { %v6639_v44 = vpack.i.bf16 %v7787_v22, %v7785_v5  ;;  %v6553_v20 = vpack.c.bf16 %v7787_v22, %v7785_v5 }
0x211e   :  { %6320 = vmatmul.mubr.msk.f32.vlgmr.msra.gmra.mrb[72].mxu1 %vm8347_vm10, %v3055_v1  ;;  %6554 = vmatprep.subr.bf16.mxu1 %v6553_v20  ;;  %vm8361_vm10 = vmmov %vm8358_vm1 }
0x211f   :  { %6556 = vmatpush3.bf16.msra.mxu1 %v6553_v20 }
0x2120   :  { %6329 = vmatprep.subr.bf16.mxu1 %v7643_v49 }
0x217c   :  { %v3437_v55 = vpop.permute.xlu0 %3436 }
0x217d   :  { %6339 = vmatprep.mubr.msk.f32.mxu0 %vm8348_vm11, %v3437_v55  ;;  %vm8362_vm11 = vmmov %vm8358_vm1 }
0x2188   :  { %v6636_v56 = vpop.permute.xlu1 %6635 }
0x2189   :  { %v6638_v57 = vunpack.i.h.bf16 %v6636_v56  ;;  %v6637_v58 = vunpack.i.l.bf16 %v6636_v56 }
0x218b   :  { %v6557_v62 = vpack.c.bf16 %v6638_v57, %v6637_v58 }
0x218c   :  { %v3439_v63 = vpop.permute.xlu1 %3438 }
0x218d   :  { %6559 = vmatprep.subr.msk.bf16.mxu0 %vm8346_vm5, %v6557_v62 }
0x218e   :  { %6562 = vmatpush3.bf16.xpose.msk.msra.mxu0 %vm8346_vm5, %v6557_v62 }
0x2195   :  { %6340 = vmatmul.mubr.msk.f32.vlgmr.msra.gmra.mrb[44].mxu0 %vm8349_vm9, %v3439_v63  ;;  %vm8363_vm9 = vmmov %vm8358_vm1 }
0x21f1   :  { %v6321_v53 = vpop.f32.mrb[72].mxu1 }
0x21f2   :  { %v3271_v61 = vmul.f32 0.25, %v6321_v53  ;;  %v3261_v32 = vpop.f32.mrb[73].mxu1  ;;  %v6717_v53 = vld [vmem:[%s8320_s3 + $0x80] sm:$0xff]  }
0x21f3   :  { %v3270_v4 = vmul.f32 0.25, %v3261_v32 }
0x21f4   :  { %v3273_v51 = vadd.f32 %v7805_v54, %v3271_v61 }
0x21f5   :  { %v3272_v6 = vadd.f32 %v7810_v0, %v3270_v4 }
0x21f6   :  { %v3277_v7 = vsel %vm8350_vm13, %v3273_v51, -inf  ;;  %vm8364_vm13 = vcmask 261120  }
0x21f7   :  { %3278 = vmax.xlane.f32.xlu0 %v3277_v7  ;;  %v3274_v10 = vsel %vm8351_vm14, %v3272_v6, -inf  ;;  %vm8365_vm14 = vmmov %vm8364_vm13 }
0x21f8   :  { %3275 = vmax.xlane.f32.xlu1 %v3274_v10 }
0x2268   :  { %v6341_v11 = vpop.f32.mrb[44].mxu0 }
0x2269   :  { %v3528_v12 = vmul.f32 0.25, %v6341_v11  ;;  %v3518_v14 = vpop.f32.mrb[45].mxu0 }
0x226a   :  { %v3527_v15 = vmul.f32 0.25, %v3518_v14 }
0x226b   :  { %v3530_v17 = vadd.f32 %v7805_v54, %v3528_v12  ;;  %v5814_v12 = vld [vmem:[%s8319_s2 + $0xb] ss:$0 sm:$0xff] }
0x226c   :  { %v3529_v29 = vadd.f32 %v7810_v0, %v3527_v15 }
0x226d   :  { %v3534_v35 = vsel %vm8352_vm15, %v3530_v17, -inf  ;;  %vm8366_vm15 = vmmov %vm8364_vm13 }
0x226e   :  { %3535 = vmax.xlane.f32.xlu0 %v3534_v35  ;;  %v3531_v19 = vsel %vm8353_vm12, %v3529_v29, -inf  ;;  %vm8367_vm12 = vmmov %vm8364_vm13 }
0x226f   :  { %3532 = vmax.xlane.f32.xlu1 %v3531_v19 }
0x2284   :  { %v3279_v52 = vpop.xlane.xlu0 %3278 }
0x2285   :  { %v3281_v21 = vsub.f32 %v3273_v51, %v3279_v52  ;;  %v3276_v8 = vpop.xlane.xlu1 %3275 }
0x2286   :  { %v3280_v34 = vsub.f32 %v3272_v6, %v3276_v8 }
0x2287   :  { %v3284_v43 = vmul.f32 1.442695, %v3281_v21 }
0x2288   :  { %v3282_v27 = vmul.f32 1.442695, %v3280_v34 }
0x2289   :  { %6848 = vpow2.f32 %v3284_v43 }
0x228a   :  { %6850 = vpow2.f32 %v3282_v27 }
0x2293   :  { %v6849_v60 = vpop.eup %6848 }
0x2294   :  { %v6851_v2 = vpop.eup %6850  ;;  %v3289_v16 = vsel %vm8354_vm2, %v6849_v60, 0.0  ;;  %vm8368_vm2 = vmmov %vm8367_vm12 }
0x2295   :  { %3290 = vadd.xlane.f32.xlu0 %v3289_v16  ;;  %v3286_v36 = vsel %vm8355_vm7, %v6851_v2, 0.0  ;;  %vm8369_vm7 = vmmov %vm8368_vm2 }
0x2296   :  { %3287 = vadd.xlane.f32.xlu1 %v3286_v36 }
0x22fb   :  { %v3536_v45 = vpop.xlane.xlu0 %3535 }
0x22fc   :  { %v3538_v37 = vsub.f32 %v3530_v17, %v3536_v45  ;;  %v3533_v46 = vpop.xlane.xlu1 %3532 }
0x22fd   :  { %v3537_v38 = vsub.f32 %v3529_v29, %v3533_v46 }
0x22fe   :  { %v3541_v50 = vmul.f32 1.442695, %v3538_v37 }
0x22ff   :  { %v3539_v28 = vmul.f32 1.442695, %v3537_v38 }
0x2300   :  { %6852 = vpow2.f32 %v3541_v50 }
0x2301   :  { %6854 = vpow2.f32 %v3539_v28  ;;  %v6719_v28 = vld [vmem:[%s8320_s3 + $0x98] sm:$0xff]  }
0x230a   :  { %v6853_v23 = vpop.eup %6852 }
0x230b   :  { %v6855_v13 = vpop.eup %6854  ;;  %v3546_v18 = vsel %vm8356_vm6, %v6853_v23, 0.0 }
0x230c   :  { %3547 = vadd.xlane.f32.xlu0 %v3546_v18  ;;  %v3543_v9 = vsel %vm8357_vm8, %v6855_v13, 0.0 }
0x230d   :  { %3544 = vadd.xlane.f32.xlu1 %v3543_v9 }
0x231e   :  { %6640 = vrot.lane.b32.xlu1 %v6639_v44, %s6997_s30 }
0x2322   :  { %v3291_v33 = vpop.xlane.xlu0 %3290 }
0x2323   :  { %6856 = vrcp.f32 %v3291_v33  ;;  %v3288_v30 = vpop.xlane.xlu1 %3287 }
0x2324   :  { %6858 = vrcp.f32 %v3288_v30 }
0x232d   :  { %v6857_v48 = vpop.eup %6856 }
0x232e   :  { %v6859_v42 = vpop.eup %6858  ;;  %v3295_v1 = vmul.f32 %v6857_v48, %v6849_v60 }
0x232f   :  { %v3294_v3 = vmul.f32 %v6859_v42, %v6851_v2 }
0x2331   :  { %6326 = vmatprep.mubr.msk.f32.mxu1 %vm8358_vm1, %v3294_v3 }
0x2332   :  { %6327 = vmatmul.mubr.msk.f32.vlgmr.msra.gmra.mrb[74].mxu1 %vm8359_vm3, %v3295_v1 }
0x2333   :  { %6331 = vmatprep.mubr.msk.bf16.mxu1 %vm8342_vm0, %v7643_v49  ;;  %6330 = vmatpush3.bf16.msra.mxu1 %v6716_v47  ;;  %v5823_v47 = vld [vmem:[%s8319_s2 + $0xc] ss:$0 sm:$0xff] }
0x2334   :  { %6349 = vmatprep.subr.bf16.mxu1 %v7643_v49 }
0x2399   :  { %v3548_v24 = vpop.xlane.xlu0 %3547 }
0x239a   :  { %6860 = vrcp.f32 %v3548_v24  ;;  %v3545_v5 = vpop.xlane.xlu1 %3544 }
0x239b   :  { %6862 = vrcp.f32 %v3545_v5 }
0x239e   :  { %v6641_v22 = vpop.permute.xlu1 %6640 }
0x239f   :  { %v6643_v59 = vunpack.i.h.bf16 %v6641_v22  ;;  %v6642_v44 = vunpack.i.l.bf16 %v6641_v22 }
0x23a1   :  { %v6563_v20 = vpack.c.bf16 %v6643_v59, %v6642_v44  ;;  %v5824_v59 = vld [vmem:[%s8319_s2 + $0xd] ss:$0 sm:$0xff] }
0x23a3   :  { %6564 = vmatprep.subr.bf16.mxu0 %v6563_v20 }
0x23a4   :  { %v6861_v55 = vpop.eup %6860  ;;  %6566 = vmatpush3.bf16.msra.mxu0 %v6563_v20 }
0x23a5   :  { %v6863_v56 = vpop.eup %6862  ;;  %6355 = vmatprep.subr.bf16.mxu0 %v7643_v49  ;;  %v3552_v58 = vmul.f32 %v6861_v55, %v6853_v23  ;;  %v6720_v23 = vld [vmem:[%s8320_s3 + $0x90] sm:$0xff]  }
0x23a6   :  { %v3551_v57 = vmul.f32 %v6863_v56, %v6855_v13  ;;  %v6721_v13 = vld [vmem:[%s8320_s3 + $0xa0] sm:$0xff]  }
0x23a8   :  { %6346 = vmatprep.mubr.msk.f32.mxu0 %vm8360_vm4, %v3551_v57  ;;  %v6722_v57 = vld [vmem:[%s8320_s3 + $0xb8] sm:$0xff]   ;;  %vm8370_vm4 = vmmov %vm8368_vm2 }
0x23a9   :  { %6347 = vmatmul.mubr.msk.f32.vlgmr.msra.gmra.mrb[46].mxu0 %vm8361_vm10, %v3552_v58  ;;  %v6723_v58 = vld [vmem:[%s8320_s3 + $0xa8] sm:$0xff]   ;;  %vm8371_vm10 = vmmov %vm8368_vm2 }
0x23aa   :  { %6359 = vmatprep.mubr.msk.bf16.mxu0 %vm8342_vm0, %v7643_v49 }
0x2405   :  { %v6328_v62 = vpop.f32.mrb[74].mxu1 }
0x2406   :  { %v3368_v63 = vpop.f32.mrb[75].mxu1 }
0x2407   :  { %v3379_v61 = vpack.c.bf16 %v6328_v62, %v3368_v63  ;;  %v6724_v62 = vld [vmem:[%s8320_s3 + $0xc0] sm:$0xff]   ;;  %v6725_v63 = vld [vmem:[%s8320_s3 + $0xb0] sm:$0xff]  }
0x2409   :  { %6332 = vmatmul.mubr.msk.bf16.vlgmr.msra.gmra.mrb[76].mxu1 %vm8362_vm11, %v3379_v61  ;;  %v5829_v61 = vld [vmem:[%s8319_s2 + $0xf] ss:$0 sm:$0xff]  ;;  %vm8372_vm11 = vmmov %vm8368_vm2 }
0x240a   :  { %6350 = vmatpush3.bf16.msra.mxu1 %v6717_v53  ;;  %6351 = vmatprep.mubr.msk.bf16.mxu1 %vm8342_vm0, %v7643_v49  ;;  %v5825_v53 = vld [vmem:[%s8319_s2 + $0xe] ss:$0 sm:$0xff] }
0x240b   :  { %6363 = vmatprep.subr.bf16.mxu1 %v7643_v49 }
0x247c   :  { %v6348_v32 = vpop.f32.mrb[46].mxu0 }
0x247d   :  { %v3633_v4 = vpop.f32.mrb[47].mxu0 }
0x247e   :  { %v3644_v51 = vpack.c.bf16 %v6348_v32, %v3633_v4 }
0x2480   :  { %6352 = vmatmul.mubr.msk.bf16.vlgmr.msra.gmra.mrb[80].mxu1 %vm8363_vm9, %v3644_v51  ;;  %vm8373_vm9 = vmmov %vm8368_vm2 }
0x2481   :  { %6367 = vmatprep.mubr.msk.bf16.mxu1 %vm8342_vm0, %v7643_v49  ;;  %6364 = vmatpush3.bf16.msra.mxu1 %v6719_v28 }
0x2482   :  { %6365 = vmatprep.subr.bf16.mxu1 %v7643_v49 }
0x2485   :  { %6366 = vmatpush3.bf16.msra.mxu1 %v6721_v13 }
0x2486   :  { %6379 = vmatprep.subr.bf16.mxu1 %v7643_v49 }
0x24dc   :  { %v3423_v6 = vpop.f32.mrb[76].mxu1 }
0x24dd   :  { %v6333_v7 = vpop.f32.mrb[77].mxu1  ;;  %v3434_v14 = vadd.f32 %v5814_v12, %v3423_v6 }
0x24de   :  { %v3426_v10 = vpop.f32.mrb[78].mxu1 }
0x24df   :  { %v6334_v11 = vpop.f32.mrb[79].mxu1  ;;  %v3435_v17 = vadd.f32 %v5814_v12, %v3426_v10 }
0x2553   :  { %v3688_v15 = vpop.f32.mrb[80].mxu1 }
0x2554   :  { %v3695_v29 = vadd.f32 %v3688_v15, %v3434_v14  ;;  %v6353_v35 = vpop.f32.mrb[81].mxu1 }
0x2555   :  { %v3691_v19 = vpop.f32.mrb[82].mxu1 }
0x2556   :  { %v3696_v52 = vadd.f32 %v3691_v19, %v3435_v17  ;;  %v6354_v21 = vpop.f32.mrb[83].mxu1  ;;  %v3697_v8 = vadd.f32 %v3695_v29, %v7741_v26 }
0x2558   :  { %v3701_v34 = vsel %vm8364_vm13, %v3697_v8, 0.0  ;;  %v3698_v43 = vadd.f32 %v3696_v52, %v7743_v40  ;;  %v6718_v40 = vld [vmem:[%s8320_s3 + $0x88] sm:$0xff]   ;;  %vm8374_vm13 = vmmov %vm8368_vm2 }
0x2559   :  { %3702 = vadd.xlane.f32.xlu0 %v3701_v34  ;;  %6356 = vmatpush3.bf16.msra.mxu0 %v6718_v40 }
0x255a   :  { %v3704_v27 = vsel %vm8365_vm14, %v3698_v43, 0.0  ;;  %6357 = vmatprep.subr.bf16.mxu0 %v7643_v49  ;;  %vm8375_vm14 = vmmov %vm8368_vm2 }
0x255d   :  { %3705 = vadd.xlane.f32.xlu0 %v3704_v27  ;;  %6358 = vmatpush3.bf16.msra.mxu0 %v6720_v23 }
0x255e   :  { %6371 = vmatprep.subr.bf16.mxu0 %v7643_v49 }
0x25e6   :  { %v3703_v60 = vpop.xlane.xlu0 %3702 }
0x25e7   :  { %v3707_v2 = vmul.f32 0.03125, %v3703_v60 }
0x25e9   :  { %v3709_v16 = vsub.f32 %v3697_v8, %v3707_v2 }
0x25ea   :  { %v3706_v36 = vpop.xlane.xlu0 %3705 }
0x25eb   :  { %v3708_v45 = vmul.f32 0.03125, %v3706_v36  ;;  %v3711_v37 = vmul.f32 %v3709_v16, %v3709_v16 }
0x25ed   :  { %v3710_v46 = vsub.f32 %v3698_v43, %v3708_v45  ;;  %v3713_v38 = vsel %vm8366_vm15, %v3711_v37, 0.0  ;;  %vm8376_vm15 = vmmov %vm8368_vm2 }
0x25ee   :  { %3714 = vadd.xlane.f32.xlu0 %v3713_v38 }
0x25ef   :  { %v3712_v50 = vmul.f32 %v3710_v46, %v3710_v46 }
0x25f1   :  { %v3716_v26 = vsel %vm8367_vm12, %v3712_v50, 0.0  ;;  %vm8377_vm12 = vmmov %vm8368_vm2 }
0x25f2   :  { %3717 = vadd.xlane.f32.xlu0 %v3716_v26 }
0x267b   :  { %v3715_v18 = vpop.xlane.xlu0 %3714 }
0x267c   :  { %v3719_v9 = vmul.f32 0.03125, %v3715_v18 }
0x267e   :  { %v3721_v33 = vadd.f32 1e-12, %v3719_v9 }
0x267f   :  { %v3718_v30 = vpop.xlane.xlu0 %3717 }
0x2680   :  { %6864 = vrsqrt.f32 %v3721_v33  ;;  %v3720_v48 = vmul.f32 0.03125, %v3718_v30 }
0x2682   :  { %v3722_v42 = vadd.f32 1e-12, %v3720_v48 }
0x2684   :  { %6866 = vrsqrt.f32 %v3722_v42 }
0x268a   :  { %v6865_v3 = vpop.eup %6864 }
0x268b   :  { %v3725_v1 = vmul.f32 %v6865_v3, %v3709_v16 }
0x268d   :  { %v3731_v5 = vmul.f32 %v5823_v47, %v3725_v1 }
0x268e   :  { %v6867_v24 = vpop.eup %6866 }
0x268f   :  { %v3726_v22 = vmul.f32 %v6867_v24, %v3710_v46  ;;  %v7882_v20 = vadd.f32 %v5824_v59, %v3731_v5 }
0x2691   :  { %v3732_v44 = vmul.f32 %v5823_v47, %v3726_v22 }
0x2693   :  { %v7884_v55 = vadd.f32 %v5824_v59, %v3732_v44 }
0x2695   :  { %v3739_v56 = vpack.c.bf16 %v7884_v55, %v7882_v20 }
0x2697   :  { %6360 = vmatmul.mubr.msk.bf16.vlgmr.msra.gmra.mrb[48].mxu0 %vm8368_vm2, %v3739_v56  ;;  %6368 = vmatmul.mubr.msk.bf16.vlgmr.msra.gmra.mrb[84].mxu1 %vm8369_vm7, %v3739_v56  ;;  %vm8378_vm7 = vcmask 130048  }
0x2698   :  { %6375 = vmatprep.mubr.msk.bf16.mxu0 %vm8342_vm0, %v7643_v49  ;;  %6383 = vmatprep.mubr.msk.bf16.mxu1 %vm8342_vm0, %v7643_v49 }
0x2699   :  { %6372 = vmatpush3.bf16.msra.mxu0 %v6722_v57  ;;  %6380 = vmatpush3.bf16.msra.mxu1 %v6723_v58 }
0x269a   :  { %6373 = vmatprep.subr.bf16.mxu0 %v7643_v49  ;;  %6381 = vmatprep.subr.bf16.mxu1 %v7643_v49 }
0x269d   :  { %6374 = vmatpush3.bf16.msra.mxu0 %v6724_v62  ;;  %6382 = vmatpush3.bf16.msra.mxu1 %v6725_v63 }
0x269e   :  { %6387 = vmatprep.subr.bf16.mxu0 %v7643_v49  ;;  %6395 = vmatprep.subr.bf16.mxu1 %v7643_v49 }
0x276a   :  { %v3798_v32 = vpop.f32.mrb[48].mxu0  ;;  %v3860_v4 = vpop.f32.mrb[84].mxu1 }
0x276b   :  { %v7916_v51 = vadd.f32 %v5825_v53, %v3798_v32  ;;  %v7918_v6 = vadd.f32 %v5829_v61, %v3860_v4  ;;  %v6361_v7 = vpop.f32.mrb[49].mxu0  ;;  %v6369_v10 = vpop.f32.mrb[85].mxu1 }
0x276c   :  { %v3801_v11 = vpop.f32.mrb[50].mxu0  ;;  %v3863_v12 = vpop.f32.mrb[86].mxu1 }
0x276d   :  { %v7921_v49 = vmul.f32 0.70710677, %v7916_v51  ;;  %v7924_v14 = vmul.f32 0.70710677, %v7918_v6  ;;  %v7926_v15 = vadd.f32 %v5825_v53, %v3801_v11  ;;  %v7928_v17 = vadd.f32 %v5829_v61, %v3863_v12  ;;  %v6362_v29 = vpop.f32.mrb[51].mxu0  ;;  %v6370_v35 = vpop.f32.mrb[87].mxu1 }
0x276f   :  { %v3875_v19 = vand.u32 2147483647, %v7921_v49  ;;  %v3932_v52 = vand.u32 2147483647, %v7924_v14  ;;  %v7933_v21 = vmul.f32 0.70710677, %v7926_v15 }
0x2770   :  { %v7937_v27 = vmul.f32 0.70710677, %v7928_v17  ;;  %vm3871_vm6 = vcmp.ge.f32.partialorder %v7921_v49, 0.0  ;;  %vm3928_vm8 = vcmp.ge.f32.partialorder %v7924_v14, 0.0 }
0x2771   :  { %v3877_v8 = vmul.f32 0.3275911, %v3875_v19  ;;  %v3934_v34 = vmul.f32 0.3275911, %v3932_v52  ;;  %v3876_v43 = vand.u32 2147483647, %v7933_v21 }
0x2772   :  { %v3933_v45 = vand.u32 2147483647, %v7937_v27  ;;  %v3901_v38 = vsub.f32 0.0, %v3875_v19  ;;  %v3958_v50 = vsub.f32 0.0, %v3932_v52  ;;  %vm3872_vm1 = vcmp.ge.f32.partialorder %v7933_v21, 0.0 }
0x2773   :  { %v3879_v60 = vadd.f32 1.0, %v3877_v8  ;;  %v3936_v2 = vadd.f32 1.0, %v3934_v34  ;;  %v3878_v16 = vmul.f32 0.3275911, %v3876_v43  ;;  %v3902_v28 = vsub.f32 0.0, %v3876_v43 }
0x2774   :  { %v3935_v37 = vmul.f32 0.3275911, %v3933_v45  ;;  %v3903_v40 = vmul.f32 %v3901_v38, %v3875_v19  ;;  %v3960_v18 = vmul.f32 %v3958_v50, %v3932_v52  ;;  %v3959_v30 = vsub.f32 0.0, %v3933_v45 }
0x2775   :  { %6868 = vrcp.f32 %v3879_v60  ;;  %v3880_v36 = vadd.f32 1.0, %v3878_v16  ;;  %v3904_v1 = vmul.f32 %v3902_v28, %v3876_v43  ;;  %v3930_v49 = vsel %vm3928_vm8, 1.0, %v6998_v31 }
0x2776   :  { %6870 = vrcp.f32 %v3936_v2  ;;  %v3937_v46 = vadd.f32 1.0, %v3935_v37  ;;  %v3905_v42 = vmul.f32 1.442695, %v3903_v40  ;;  %v3962_v24 = vmul.f32 1.442695, %v3960_v18 }
0x2777   :  { %6872 = vrcp.f32 %v3880_v36  ;;  %v3961_v57 = vmul.f32 %v3959_v30, %v3933_v45  ;;  %v3907_v62 = vmul.f32 1.442695, %v3904_v1  ;;  %v3873_v30 = vsel %vm3871_vm6, 1.0, %v6998_v31  ;;  %vm8379_vm6 = vmmov %vm8378_vm7 }
0x2778   :  { %6874 = vrcp.f32 %v3937_v46  ;;  %vm3929_vm3 = vcmp.ge.f32.partialorder %v7937_v27, 0.0  ;;  %vm8380_vm8 = vmmov %vm8379_vm6 }
0x2779   :  { %6876 = vpow2.f32 %v3905_v42  ;;  %v3964_v11 = vmul.f32 1.442695, %v3961_v57  ;;  %v3867_v57 = vmul.f32 0.5, %v7916_v51 }
0x277a   :  { %6878 = vpow2.f32 %v3962_v24 }
0x277b   :  { %6880 = vpow2.f32 %v3907_v62 }
0x277c   :  { %6882 = vpow2.f32 %v3964_v11 }
0x277f   :  { %v6869_v26 = vpop.eup %6868 }
0x2780   :  { %v6871_v23 = vpop.eup %6870  ;;  %v3883_v13 = vmul.f32 1.0614054, %v6869_v26 }
0x2781   :  { %v3940_v9 = vmul.f32 1.0614054, %v6871_v23  ;;  %v6873_v48 = vpop.eup %6872 }
0x2782   :  { %v3885_v33 = vadd.f32 -1.4531521, %v3883_v13  ;;  %v3884_v5 = vmul.f32 1.0614054, %v6873_v48  ;;  %v6875_v59 = vpop.eup %6874 }
0x2783   :  { %v3942_v3 = vadd.f32 -1.4531521, %v3940_v9  ;;  %v3941_v63 = vmul.f32 1.0614054, %v6875_v59  ;;  %v6877_v45 = vpop.eup %6876 }
0x2784   :  { %v3887_v47 = vmul.f32 %v6869_v26, %v3885_v33  ;;  %v3886_v56 = vadd.f32 -1.4531521, %v3884_v5  ;;  %v6879_v38 = vpop.eup %6878 }
0x2785   :  { %v3944_v22 = vmul.f32 %v6871_v23, %v3942_v3  ;;  %v3943_v4 = vadd.f32 -1.4531521, %v3941_v63  ;;  %v6881_v33 = vpop.eup %6880 }
0x2786   :  { %v3889_v44 = vadd.f32 1.4214138, %v3887_v47  ;;  %v3888_v61 = vmul.f32 %v6873_v48, %v3886_v56  ;;  %v6883_v47 = vpop.eup %6882 }
0x2787   :  { %v3946_v58 = vadd.f32 1.4214138, %v3944_v22  ;;  %v3945_v29 = vmul.f32 %v6875_v59, %v3943_v4  ;;  %v3874_v22 = vsel %vm3872_vm1, 1.0, %v6998_v31  ;;  %v3925_v4 = vmul.f32 0.5, %v7928_v17  ;;  %vm8381_vm1 = vmmov %vm8379_vm6 }
0x2788   :  { %v3891_v53 = vmul.f32 %v6869_v26, %v3889_v44  ;;  %v3890_v10 = vadd.f32 1.4214138, %v3888_v61 }
0x2789   :  { %v3948_v32 = vmul.f32 %v6871_v23, %v3946_v58  ;;  %v3947_v8 = vadd.f32 1.4214138, %v3945_v29  ;;  %v3868_v58 = vmul.f32 0.5, %v7926_v15  ;;  %v7956_v15 = vld [vmem:[%s8324_s7] sm:$0xff] }
0x278a   :  { %v3893_v7 = vadd.f32 -0.28449672, %v3891_v53  ;;  %v3892_v19 = vmul.f32 %v6873_v48, %v3890_v10 }
0x278b   :  { %v3950_v12 = vadd.f32 -0.28449672, %v3948_v32  ;;  %v3949_v2 = vmul.f32 %v6875_v59, %v3947_v8  ;;  %v3924_v32 = vmul.f32 0.5, %v7918_v6 }
0x278c   :  { %v3895_v35 = vmul.f32 %v6869_v26, %v3893_v7  ;;  %v3894_v43 = vadd.f32 -0.28449672, %v3892_v19 }
0x278d   :  { %v3952_v52 = vmul.f32 %v6871_v23, %v3950_v12  ;;  %v3951_v46 = vadd.f32 -0.28449672, %v3949_v2 }
0x278e   :  { %v3897_v34 = vadd.f32 0.2548296, %v3895_v35  ;;  %v3896_v36 = vmul.f32 %v6873_v48, %v3894_v43  ;;  %v5839_v35 = vld [vmem:[%s8319_s2 + $0x10] ss:$0 sm:$0xff] }
0x278f   :  { %v3954_v60 = vadd.f32 0.2548296, %v3952_v52  ;;  %v3953_v13 = vmul.f32 %v6875_v59, %v3951_v46 }
0x2790   :  { %v3899_v16 = vmul.f32 %v6869_v26, %v3897_v34  ;;  %v3898_v40 = vadd.f32 0.2548296, %v3896_v36 }
0x2791   :  { %v3956_v37 = vmul.f32 %v6871_v23, %v3954_v60  ;;  %v3955_v26 = vadd.f32 0.2548296, %v3953_v13 }
0x2792   :  { %v3909_v50 = vmul.f32 %v6877_v45, %v3899_v16  ;;  %v3900_v9 = vmul.f32 %v6873_v48, %v3898_v40 }
0x2793   :  { %v3966_v28 = vmul.f32 %v6879_v38, %v3956_v37  ;;  %v3957_v1 = vmul.f32 %v6875_v59, %v3955_v26  ;;  %v3931_v59 = vsel %vm3929_vm3, 1.0, %v6998_v31  ;;  %v6728_v26 = vld [vmem:[%s8320_s3 + $0xd0] sm:$0xff]   ;;  %vm8382_vm3 = vmmov %vm8381_vm1 }
0x2794   :  { %v3911_v18 = vsub.f32 1.0, %v3909_v50  ;;  %v3910_v23 = vmul.f32 %v6881_v33, %v3900_v9 }
0x2795   :  { %v3968_v42 = vsub.f32 1.0, %v3966_v28  ;;  %v3967_v48 = vmul.f32 %v6883_v47, %v3957_v1 }
0x2796   :  { %v3913_v3 = vmul.f32 %v3911_v18, %v3873_v30  ;;  %v3912_v24 = vsub.f32 1.0, %v3910_v23 }
0x2797   :  { %v3970_v5 = vmul.f32 %v3968_v42, %v3930_v49  ;;  %v3969_v14 = vsub.f32 1.0, %v3967_v48  ;;  %v6727_v42 = vld [vmem:[%s8320_s3 + $0xd8] sm:$0xff]  }
0x2798   :  { %v3915_v44 = vadd.f32 1.0, %v3913_v3  ;;  %v3914_v56 = vmul.f32 %v3912_v24, %v3874_v22  ;;  %v6729_v3 = vld [vmem:[%s8320_s3 + $0xe0] sm:$0xff]  }
0x2799   :  { %v3972_v62 = vadd.f32 1.0, %v3970_v5  ;;  %v3971_v63 = vmul.f32 %v3969_v14, %v3931_v59 }
0x279a   :  { %v3916_v21 = vadd.f32 1.0, %v3914_v56  ;;  %v3917_v53 = vmul.f32 %v3915_v44, %v3867_v57  ;;  %v5840_v44 = vld [vmem:[%s8319_s2 + $0x11] ss:$0 sm:$0xff] }
0x279b   :  { %v3973_v27 = vadd.f32 1.0, %v3971_v63  ;;  %v3974_v10 = vmul.f32 %v3972_v62, %v3924_v32  ;;  %v6730_v63 = vld [vmem:[%s8320_s3 + $0xe8] sm:$0xff]   ;;  %v5842_v32 = vld [vmem:[%s8319_s2 + $0x14] ss:$0 sm:$0xff] }
0x279c   :  { %v3918_v61 = vmul.f32 %v3916_v21, %v3868_v58  ;;  %v5841_v58 = vld [vmem:[%s8319_s2 + $0x12] ss:$0 sm:$0xff] }
0x279d   :  { %v3975_v11 = vmul.f32 %v3973_v27, %v3925_v4  ;;  %v5846_v27 = vld [vmem:[%s8319_s2 + $0x15] ss:$0 sm:$0xff] }
0x279e   :  { %v3919_v7 = vpack.c.bf16 %v3918_v61, %v3917_v53  ;;  %v6731_v61 = vld [vmem:[%s8320_s3 + $0xf0] sm:$0xff]  }
0x279f   :  { %v3976_v51 = vpack.c.bf16 %v3975_v11, %v3974_v10 }
0x27a0   :  { %6384 = vmatmul.mubr.msk.bf16.vlgmr.msra.gmra.mrb[88].mxu1 %vm8370_vm4, %v3919_v7  ;;  %vm8383_vm4 = vmmov %vm8381_vm1 }
0x27a1   :  { %6399 = vmatprep.mubr.msk.bf16.mxu1 %vm8342_vm0, %v7956_v15  ;;  %6376 = vmatmul.mubr.msk.bf16.vlgmr.msra.gmra.mrb[52].mxu0 %vm8371_vm10, %v3976_v51  ;;  %vm8384_vm10 = vmmov %vm8381_vm1 }
0x27a2   :  { %6391 = vmatprep.mubr.msk.bf16.mxu0 %vm8342_vm0, %v7956_v15  ;;  %6396 = vmatpush3.bf16.msra.mxu1 %v6727_v42 }
0x27a3   :  { %6397 = vmatprep.subr.bf16.mxu1 %v7956_v15 }
0x27a6   :  { %6398 = vmatpush3.bf16.msra.mxu1 %v6729_v3 }
0x2873   :  { %v4086_v6 = vpop.f32.mrb[88].mxu1 }
0x2874   :  { %v6385_v17 = vpop.f32.mrb[89].mxu1  ;;  %v4030_v29 = vpop.f32.mrb[52].mxu0 }
0x2875   :  { %v4089_v12 = vpop.f32.mrb[90].mxu1  ;;  %v4087_v52 = vadd.f32 %v4086_v6, %v4030_v29  ;;  %v6377_v8 = vpop.f32.mrb[53].mxu0 }
0x2876   :  { %v6386_v19 = vpop.f32.mrb[91].mxu1  ;;  %v4033_v34 = vpop.f32.mrb[54].mxu0 }
0x2877   :  { %v4098_v43 = vadd.f32 %v5839_v35, %v4087_v52  ;;  %v4090_v60 = vadd.f32 %v4089_v12, %v4033_v34  ;;  %v6378_v2 = vpop.f32.mrb[55].mxu0  ;;  %v5850_v34 = vld [vmem:[%s8319_s2 + $0x16] ss:$0 sm:$0xff] }
0x2879   :  { %v4099_v16 = vadd.f32 %v5839_v35, %v4090_v60  ;;  %v4100_v36 = vadd.f32 %v4098_v43, %v7882_v20 }
0x287b   :  { %v4104_v45 = vsel %vm8372_vm11, %v4100_v36, 0.0  ;;  %v4101_v37 = vadd.f32 %v4099_v16, %v7884_v55  ;;  %v6726_v55 = vld [vmem:[%s8320_s3 + $0xc8] sm:$0xff]   ;;  %vm8385_vm11 = vmmov %vm8381_vm1 }
0x287c   :  { %4105 = vadd.xlane.f32.xlu0 %v4104_v45  ;;  %6388 = vmatpush3.bf16.msra.mxu0 %v6726_v55 }
0x287d   :  { %v4107_v46 = vsel %vm8373_vm9, %v4101_v37, 0.0  ;;  %6389 = vmatprep.subr.bf16.mxu0 %v7956_v15  ;;  %vm8386_vm9 = vmmov %vm8381_vm1 }
0x287e   :  { %4108 = vadd.xlane.f32.xlu1 %v4107_v46 }
0x2880   :  { %6390 = vmatpush3.bf16.msra.mxu0 %v6728_v26 }
0x2881   :  { %6403 = vmatprep.subr.bf16.mxu0 %v7956_v15 }
0x2909   :  { %v4106_v38 = vpop.xlane.xlu0 %4105 }
0x290a   :  { %v4110_v50 = vmul.f32 0.03125, %v4106_v38 }
0x290b   :  { %v4109_v40 = vpop.xlane.xlu1 %4108 }
0x290c   :  { %v4112_v28 = vsub.f32 %v4100_v36, %v4110_v50  ;;  %v4111_v13 = vmul.f32 0.03125, %v4109_v40 }
0x290e   :  { %v4113_v18 = vsub.f32 %v4101_v37, %v4111_v13  ;;  %v4114_v9 = vmul.f32 %v4112_v28, %v4112_v28 }
0x2910   :  { %v4116_v33 = vsel %vm8374_vm13, %v4114_v9, 0.0  ;;  %v4115_v30 = vmul.f32 %v4113_v18, %v4113_v18  ;;  %vm8387_vm13 = vmmov %vm8381_vm1 }
0x2911   :  { %4117 = vadd.xlane.f32.xlu0 %v4116_v33 }
0x2912   :  { %v4119_v20 = vsel %vm8375_vm14, %v4115_v30, 0.0  ;;  %vm8388_vm14 = vmmov %vm8381_vm1 }
0x2915   :  { %4120 = vadd.xlane.f32.xlu0 %v4119_v20 }
0x299e   :  { %v4118_v23 = vpop.xlane.xlu0 %4117 }
0x299f   :  { %v4122_v1 = vmul.f32 0.03125, %v4118_v23 }
0x29a1   :  { %v4124_v47 = vadd.f32 1e-12, %v4122_v1 }
0x29a2   :  { %v4121_v49 = vpop.xlane.xlu0 %4120 }
0x29a3   :  { %6884 = vrsqrt.f32 %v4124_v47  ;;  %v4123_v24 = vmul.f32 0.03125, %v4121_v49 }
0x29a5   :  { %v4125_v5 = vadd.f32 1e-12, %v4123_v24 }
0x29a7   :  { %6886 = vrsqrt.f32 %v4125_v5 }
0x29ad   :  { %v6885_v22 = vpop.eup %6884 }
0x29ae   :  { %v4128_v48 = vmul.f32 %v6885_v22, %v4112_v28 }
0x29b0   :  { %v4134_v14 = vmul.f32 %v5840_v44, %v4128_v48 }
0x29b1   :  { %v6887_v56 = vpop.eup %6886 }
0x29b2   :  { %v4129_v57 = vmul.f32 %v6887_v56, %v4113_v18  ;;  %v7993_v59 = vadd.f32 %v5841_v58, %v4134_v14 }
0x29b4   :  { %v4135_v21 = vmul.f32 %v5840_v44, %v4129_v57 }
0x29b6   :  { %v7995_v62 = vadd.f32 %v5841_v58, %v4135_v21 }
0x29b8   :  { %v4142_v53 = vpack.c.bf16 %v7995_v62, %v7993_v59 }
0x29ba   :  { %6392 = vmatmul.mubr.msk.bf16.vlgmr.msra.gmra.mrb[56].mxu0 %vm8376_vm15, %v4142_v53  ;;  %6400 = vmatmul.mubr.msk.bf16.vlgmr.msra.gmra.mrb[92].mxu1 %vm8377_vm12, %v4142_v53  ;;  %vm8390_vm15 = vmmov %vm8381_vm1 }
0x29bb   :  { %6404 = vmatpush3.bf16.msra.mxu0 %v6730_v63  ;;  %6407 = vmatprep.mubr.msk.bf16.mxu0 %vm8342_vm0, %v7956_v15  ;;  %vm8391_vm12 = vmmov %vm8381_vm1 }
0x29bc   :  { %6405 = vmatprep.subr.bf16.mxu0 %v7956_v15 }
0x29bf   :  { %6406 = vmatpush3.bf16.msra.mxu0 %v6731_v61 }
0x29c0   :  { %6425 = vmatprep.subr.bf16.mxu0 %v7956_v15 }
0x29c2   :  { %6408 = vmatmul.mubr.msk.bf16.vlgmr.msra.gmra.mrb[60].mxu0 %vm8368_vm2, %v4142_v53  ;;  %vm8392_vm2 = vmmov %vm8381_vm1 }
0x29c3   :  { %6427 = vmatprep.mubr.msk.bf16.mxu0 %vm8342_vm0, %v7956_v15 }
0x2a8d   :  { %v4201_v4 = vpop.f32.mrb[56].mxu0  ;;  %v4263_v7 = vpop.f32.mrb[92].mxu1 }
0x2a8e   :  { %v4202_v10 = vadd.f32 %v5842_v32, %v4201_v4  ;;  %v6393_v11 = vpop.f32.mrb[57].mxu0  ;;  %v6401_v51 = vpop.f32.mrb[93].mxu1  ;;  %v4264_v12 = vadd.f32 %v5846_v27, %v4263_v7 }
0x2a8f   :  { %v4204_v6 = vpop.f32.mrb[58].mxu0  ;;  %v4266_v17 = vpop.f32.mrb[94].mxu1 }
0x2a90   :  { %v4267_v29 = vadd.f32 %v5846_v27, %v4266_v17  ;;  %4586 = vrot.lane.b32.xlu1 %v4202_v10, %s6997_s30  ;;  %v6394_v35 = vpop.f32.mrb[59].mxu0  ;;  %v6402_v19 = vpop.f32.mrb[95].mxu1  ;;  %6415 = vmatprep.mubr.msk.f32.mxu1 %vm8378_vm7, %v4202_v10  ;;  %v4205_v37 = vadd.f32 %v5842_v32, %v4204_v6  ;;  %v6732_v32 = vld [vmem:[%s8320_s3 + $0xf8] sm:$0xff]   ;;  %vm8393_vm7 = vmmov %vm8381_vm1 }
0x2a91   :  { %6426 = vmatpush3.bf16.msra.mxu0 %v6732_v32 }
0x2a92   :  { %v6644_v52 = vpack.i.bf16 %v4267_v29, %v4264_v12  ;;  %v6567_v8 = vpack.c.bf16 %v4267_v29, %v4264_v12 }
0x2a94   :  { %6569 = vmatprep.subr.msk.bf16.mxu1 %vm8346_vm5, %v6567_v8 }
0x2a95   :  { %v4325_v43 = vpop.f32.mrb[60].mxu0  ;;  %6572 = vmatpush3.bf16.xpose.msk.msra.mxu1 %vm8346_vm5, %v6567_v8 }
0x2a96   :  { %v6409_v60 = vpop.f32.mrb[61].mxu0  ;;  %v8029_v16 = vadd.f32 %v5850_v34, %v4325_v43 }
0x2a97   :  { %v4328_v2 = vpop.f32.mrb[62].mxu0 }
0x2a98   :  { %v8031_v36 = vadd.f32 %v5850_v34, %v4328_v2  ;;  %v6410_v45 = vpop.f32.mrb[63].mxu0 }
0x2a9a   :  { %v6649_v46 = vpack.i.bf16 %v8031_v36, %v8029_v16  ;;  %v6573_v38 = vpack.c.bf16 %v8031_v36, %v8029_v16 }
0x2a9c   :  { %6416 = vmatmul.mubr.msk.f32.vlgmr.msra.gmra.mrb[96].mxu1 %vm8379_vm6, %v4205_v37  ;;  %6574 = vmatprep.subr.bf16.mxu1 %v6573_v38  ;;  %vm8394_vm6 = vmmov %vm8381_vm1 }
0x2a9d   :  { %6576 = vmatpush3.bf16.msra.mxu1 %v6573_v38 }
0x2b02   :  { %v4587_v53 = vpop.permute.xlu1 %4586 }
0x2b6f   :  { %v6417_v50 = vpop.f32.mrb[96].mxu1 }
0x2b70   :  { %v4411_v40 = vpop.f32.mrb[97].mxu1  ;;  %v4421_v28 = vmul.f32 0.25, %v6417_v50 }
0x2b71   :  { %v4420_v13 = vmul.f32 0.25, %v4411_v40 }
0x2b72   :  { %v4423_v33 = vadd.f32 %v7805_v54, %v4421_v28 }
0x2b73   :  { %v4422_v18 = vadd.f32 %v7810_v0, %v4420_v13 }
0x2b74   :  { %v4427_v30 = vsel %vm8381_vm1, %v4423_v33, -inf }
0x2b75   :  { %v4424_v9 = vsel %vm8380_vm8, %v4422_v18, -inf  ;;  %vm8395_vm8 = vmmov %vm8381_vm1 }
0x2b76   :  { %4425 = vmax.xlane.f32.xlu0 %v4424_v9 }
0x2b7a   :  { %4428 = vmax.xlane.f32.xlu0 %v4427_v30 }
0x2c03   :  { %v4426_v20 = vpop.xlane.xlu0 %4425 }
0x2c04   :  { %v4430_v55 = vsub.f32 %v4422_v18, %v4426_v20  ;;  %v6733_v20 = vld [vmem:[%s8320_s3 + $0x100] sm:$0xff]  }
0x2c06   :  { %v4432_v3 = vmul.f32 1.442695, %v4430_v55 }
0x2c07   :  { %v4429_v42 = vpop.xlane.xlu0 %4428 }
0x2c08   :  { %v4431_v26 = vsub.f32 %v4423_v33, %v4429_v42 }
0x2c0a   :  { %v4434_v23 = vmul.f32 1.442695, %v4431_v26 }
0x2c0c   :  { %6888 = vpow2.f32 %v4434_v23 }
0x2c0d   :  { %6890 = vpow2.f32 %v4432_v3  ;;  %v5862_v3 = vld [vmem:[%s8319_s2 + $0x17] ss:$0 sm:$0xff] }
0x2c16   :  { %v6889_v1 = vpop.eup %6888 }
0x2c17   :  { %v4439_v47 = vsel %vm8382_vm3, %v6889_v1, 0.0  ;;  %v6891_v49 = vpop.eup %6890 }
0x2c18   :  { %4440 = vadd.xlane.f32.xlu0 %v4439_v47  ;;  %v4436_v24 = vsel %vm8383_vm4, %v6891_v49, 0.0 }
0x2c1c   :  { %4437 = vadd.xlane.f32.xlu0 %v4436_v24 }
0x2c32   :  { %6645 = vrot.lane.b32.xlu0 %v6644_v52, %s6997_s30 }
0x2c36   :  { %4588 = vrot.lane.b32.xlu0 %v4205_v37, %s6997_s30 }
0x2ca5   :  { %v4441_v5 = vpop.xlane.xlu0 %4440 }
0x2ca6   :  { %6892 = vrcp.f32 %v4441_v5 }
0x2ca9   :  { %v4438_v22 = vpop.xlane.xlu0 %4437 }
0x2caa   :  { %6894 = vrcp.f32 %v4438_v22 }
0x2cad   :  { %v6646_v48 = vpop.permute.xlu0 %6645 }
0x2cae   :  { %v6648_v44 = vunpack.i.h.bf16 %v6646_v48  ;;  %v6647_v56 = vunpack.i.l.bf16 %v6646_v48 }
0x2cb0   :  { %v6577_v14 = vpack.c.bf16 %v6648_v44, %v6647_v56  ;;  %v6893_v57 = vpop.eup %6892 }
0x2cb1   :  { %v4445_v63 = vmul.f32 %v6893_v57, %v6889_v1  ;;  %v4589_v61 = vpop.permute.xlu0 %4588 }
0x2cb2   :  { %6579 = vmatprep.subr.msk.bf16.mxu1 %vm8346_vm5, %v6577_v14 }
0x2cb4   :  { %v6895_v58 = vpop.eup %6894 }
0x2cb5   :  { %v4444_v21 = vmul.f32 %v6895_v58, %v6891_v49 }
0x2cb7   :  { %6422 = vmatprep.mubr.msk.f32.mxu1 %vm8384_vm10, %v4444_v21 }
0x2cb8   :  { %6423 = vmatmul.mubr.msk.f32.vlgmr.msra.gmra.mrb[98].mxu1 %vm8385_vm11, %v4445_v63 }
0x2cb9   :  { %6582 = vmatpush3.bf16.xpose.msk.msra.mxu1 %vm8346_vm5, %v6577_v14  ;;  %6435 = vmatprep.mubr.msk.f32.mxu1 %vm8386_vm9, %v4587_v53  ;;  %vm8389_vm5 = vmmov %vm8381_vm1  ;;  %vm8396_vm1 = vcmask 261120  }
0x2cba   :  { %6445 = vmatprep.subr.bf16.mxu1 %v7956_v15  ;;  %vm8397_vm3 = vmmov %vm8396_vm1 }
0x2cbb   :  { %vm8398_vm4 = vmmov %vm8396_vm1 }
0x2cbc   :  { %vm8399_vm10 = vmmov %vm8396_vm1 }
0x2cbd   :  { %vm8400_vm11 = vmmov %vm8396_vm1 }
0x2cbe   :  { %vm8401_vm9 = vmmov %vm8396_vm1 }
0x2cc0   :  { %6436 = vmatmul.mubr.msk.f32.vlgmr.msra.gmra.mrb[100].mxu1 %vm8387_vm13, %v4589_v61 }
0x2cc1   :  { %6447 = vmatprep.mubr.msk.bf16.mxu1 %vm8342_vm0, %v7956_v15  ;;  %6446 = vmatpush3.bf16.msra.mxu1 %v6733_v20 }
0x2cc2   :  { %6459 = vmatprep.subr.bf16.mxu1 %v7956_v15 }
0x2d8b   :  { %v6424_v4 = vpop.f32.mrb[98].mxu1 }
0x2d8c   :  { %v4518_v27 = vpop.f32.mrb[99].mxu1 }
0x2d8d   :  { %v4529_v7 = vpack.c.bf16 %v6424_v4, %v4518_v27 }
0x2d8f   :  { %6428 = vmatmul.mubr.msk.bf16.vlgmr.msra.gmra.mrb[64].mxu0 %vm8388_vm14, %v4529_v7 }
0x2d93   :  { %v6437_v25 = vpop.f32.mrb[100].mxu1 }
0x2d94   :  { %v4678_v10 = vmul.f32 0.25, %v6437_v25  ;;  %v4668_v11 = vpop.f32.mrb[101].mxu1  ;;  %v6735_v25 = vld [vmem:[%s8320_s3 + $0x118] sm:$0xff]  }
0x2d95   :  { %v4677_v51 = vmul.f32 0.25, %v4668_v11  ;;  %v6737_v11 = vld [vmem:[%s8320_s3 + $0x120] sm:$0xff]  }
0x2d96   :  { %v4680_v6 = vadd.f32 %v7805_v54, %v4678_v10  ;;  %v6736_v10 = vld [vmem:[%s8320_s3 + $0x110] sm:$0xff]  }
0x2d97   :  { %v4679_v17 = vadd.f32 %v7810_v0, %v4677_v51 }
0x2d98   :  { %v4684_v12 = vsel %vm8389_vm5, %v4680_v6, -inf }
0x2d99   :  { %4685 = vmax.xlane.f32.xlu0 %v4684_v12  ;;  %v4681_v29 = vsel %vm8390_vm15, %v4679_v17, -inf }
0x2d9a   :  { %4682 = vmax.xlane.f32.xlu1 %v4681_v29 }
0x2dab   :  { %6650 = vrot.lane.b32.xlu1 %v6649_v46, %s6997_s30 }
0x2e26   :  { %v4686_v35 = vpop.xlane.xlu0 %4685 }
0x2e27   :  { %v4688_v19 = vsub.f32 %v4680_v6, %v4686_v35  ;;  %v4683_v52 = vpop.xlane.xlu1 %4682 }
0x2e28   :  { %v4687_v8 = vsub.f32 %v4679_v17, %v4683_v52 }
0x2e29   :  { %v4691_v34 = vmul.f32 1.442695, %v4688_v19 }
0x2e2a   :  { %v4689_v43 = vmul.f32 1.442695, %v4687_v8  ;;  %v5871_v8 = vld [vmem:[%s8319_s2 + $0x18] ss:$0 sm:$0xff] }
0x2e2b   :  { %v6651_v54 = vpop.permute.xlu1 %6650 }
0x2e2c   :  { %6896 = vpow2.f32 %v4689_v43  ;;  %v6653_v0 = vunpack.i.h.bf16 %v6651_v54  ;;  %v6652_v60 = vunpack.i.l.bf16 %v6651_v54 }
0x2e2d   :  { %6898 = vpow2.f32 %v4691_v34 }
0x2e2e   :  { %v6583_v2 = vpack.c.bf16 %v6653_v0, %v6652_v60  ;;  %v5872_v0 = vld [vmem:[%s8319_s2 + $0x19] ss:$0 sm:$0xff] }
0x2e30   :  { %6584 = vmatprep.subr.bf16.mxu0 %v6583_v2 }
0x2e31   :  { %6586 = vmatpush3.bf16.msra.mxu0 %v6583_v2 }
0x2e32   :  { %6451 = vmatprep.subr.bf16.mxu0 %v7956_v15 }
0x2e36   :  { %v6897_v45 = vpop.eup %6896 }
0x2e37   :  { %v4693_v16 = vsel %vm8391_vm12, %v6897_v45, 0.0  ;;  %v6899_v36 = vpop.eup %6898  ;;  %vm8402_vm12 = vmmov %vm8396_vm1 }
0x2e38   :  { %4694 = vadd.xlane.f32.xlu0 %v4693_v16  ;;  %v4696_v37 = vsel %vm8392_vm2, %v6899_v36, 0.0  ;;  %vm8403_vm2 = vmmov %vm8396_vm1 }
0x2e3c   :  { %4697 = vadd.xlane.f32.xlu0 %v4696_v37  ;;  %v6739_v37 = vld [vmem:[%s8320_s3 + $0x128] sm:$0xff]  }
0x2e62   :  { %v4573_v46 = vpop.f32.mrb[64].mxu0 }
0x2e63   :  { %v6429_v38 = vpop.f32.mrb[65].mxu0  ;;  %v4584_v23 = vadd.f32 %v5862_v3, %v4573_v46  ;;  %v6740_v46 = vld [vmem:[%s8320_s3 + $0x140] sm:$0xff]  }
0x2e64   :  { %v4576_v50 = vpop.f32.mrb[66].mxu0  ;;  %v6741_v38 = vld [vmem:[%s8320_s3 + $0x130] sm:$0xff]  }
0x2e65   :  { %v6430_v40 = vpop.f32.mrb[67].mxu0  ;;  %v4585_v47 = vadd.f32 %v5862_v3, %v4576_v50  ;;  %v5873_v50 = vld [vmem:[%s8319_s2 + $0x1a] ss:$0 sm:$0xff] }
0x2e66   :  { %v5877_v40 = vld [vmem:[%s8319_s2 + $0x1b] ss:$0 sm:$0xff] }
0x2ec5   :  { %v4695_v28 = vpop.xlane.xlu0 %4694 }
0x2ec6   :  { %6900 = vrcp.f32 %v4695_v28 }
0x2ec9   :  { %v4698_v13 = vpop.xlane.xlu0 %4697 }
0x2eca   :  { %6902 = vrcp.f32 %v4698_v13 }
0x2ed0   :  { %v6901_v18 = vpop.eup %6900 }
0x2ed1   :  { %v4701_v9 = vmul.f32 %v6901_v18, %v6897_v45 }
0x2ed3   :  { %6442 = vmatprep.mubr.msk.f32.mxu0 %vm8393_vm7, %v4701_v9  ;;  %vm8404_vm7 = vmmov %vm8396_vm1 }
0x2ed4   :  { %v6903_v33 = vpop.eup %6902 }
0x2ed5   :  { %v4702_v30 = vmul.f32 %v6903_v33, %v6899_v36  ;;  %v6738_v36 = vld [vmem:[%s8320_s3 + $0x138] sm:$0xff]  }
0x2ed7   :  { %6443 = vmatmul.mubr.msk.f32.vlgmr.msra.gmra.mrb[68].mxu0 %vm8394_vm6, %v4702_v30  ;;  %vm8405_vm6 = vmmov %vm8396_vm1 }
0x2ed8   :  { %6455 = vmatprep.mubr.msk.bf16.mxu0 %vm8342_vm0, %v7956_v15 }
0x2faa   :  { %v6444_v55 = vpop.f32.mrb[68].mxu0 }
0x2fab   :  { %v4783_v42 = vpop.f32.mrb[69].mxu0 }
0x2fac   :  { %v4794_v26 = vpack.c.bf16 %v6444_v55, %v4783_v42 }
0x2fae   :  { %6448 = vmatmul.mubr.msk.bf16.vlgmr.msra.gmra.mrb[104].mxu1 %vm8395_vm8, %v4794_v26  ;;  %vm8406_vm8 = vmmov %vm8396_vm1 }
0x2faf   :  { %6463 = vmatprep.mubr.msk.bf16.mxu1 %vm8342_vm0, %v7956_v15  ;;  %6460 = vmatpush3.bf16.msra.mxu1 %v6735_v25 }
0x2fb0   :  { %6461 = vmatprep.subr.bf16.mxu1 %v7956_v15 }
0x2fb3   :  { %6462 = vmatpush3.bf16.msra.mxu1 %v6737_v11 }
0x2fb4   :  { %6475 = vmatprep.subr.bf16.mxu1 %v7956_v15 }
0x3081   :  { %v4838_v1 = vpop.f32.mrb[104].mxu1 }
0x3082   :  { %v4845_v49 = vadd.f32 %v4838_v1, %v4584_v23  ;;  %v6449_v24 = vpop.f32.mrb[105].mxu1 }
0x3083   :  { %v4841_v5 = vpop.f32.mrb[106].mxu1 }
0x3084   :  { %v4847_v22 = vadd.f32 %v4845_v49, %v7993_v59  ;;  %v4846_v48 = vadd.f32 %v4841_v5, %v4585_v47  ;;  %v6450_v44 = vpop.f32.mrb[107].mxu1 }
0x3086   :  { %v4848_v56 = vadd.f32 %v4846_v48, %v7995_v62  ;;  %v4851_v14 = vsel %vm8396_vm1, %v4847_v22, 0.0  ;;  %v6734_v62 = vld [vmem:[%s8320_s3 + $0x108] sm:$0xff]  }
0x3087   :  { %4852 = vadd.xlane.f32.xlu0 %v4851_v14  ;;  %6452 = vmatpush3.bf16.msra.mxu0 %v6734_v62 }
0x3088   :  { %v4854_v57 = vsel %vm8397_vm3, %v4848_v56, 0.0  ;;  %6453 = vmatprep.subr.bf16.mxu0 %v7956_v15  ;;  %vm8407_vm3 = vmmov %vm8396_vm1 }
0x308b   :  { %4855 = vadd.xlane.f32.xlu0 %v4854_v57  ;;  %6454 = vmatpush3.bf16.msra.mxu0 %v6736_v10 }
0x308c   :  { %6467 = vmatprep.subr.bf16.mxu0 %v7956_v15 }
0x3114   :  { %v4853_v58 = vpop.xlane.xlu0 %4852 }
0x3115   :  { %v4857_v21 = vmul.f32 0.03125, %v4853_v58 }
0x3117   :  { %v4859_v63 = vsub.f32 %v4847_v22, %v4857_v21 }
0x3118   :  { %v4856_v53 = vpop.xlane.xlu0 %4855 }
0x3119   :  { %v4858_v61 = vmul.f32 0.03125, %v4856_v53  ;;  %v4861_v32 = vmul.f32 %v4859_v63, %v4859_v63 }
0x311b   :  { %v4860_v4 = vsub.f32 %v4848_v56, %v4858_v61  ;;  %v4863_v27 = vsel %vm8398_vm4, %v4861_v32, 0.0  ;;  %vm8408_vm4 = vmmov %vm8396_vm1 }
0x311c   :  { %4864 = vadd.xlane.f32.xlu0 %v4863_v27 }
0x311d   :  { %v4862_v59 = vmul.f32 %v4860_v4, %v4860_v4 }
0x311f   :  { %v4866_v7 = vsel %vm8399_vm10, %v4862_v59, 0.0  ;;  %vm8409_vm10 = vmmov %vm8396_vm1 }
0x3120   :  { %4867 = vadd.xlane.f32.xlu0 %v4866_v7 }
0x31a9   :  { %v4865_v51 = vpop.xlane.xlu0 %4864 }
0x31aa   :  { %v4869_v6 = vmul.f32 0.03125, %v4865_v51 }
0x31ac   :  { %v4871_v17 = vadd.f32 1e-12, %v4869_v6 }
0x31ad   :  { %v4868_v12 = vpop.xlane.xlu0 %4867 }
0x31ae   :  { %6904 = vrsqrt.f32 %v4871_v17  ;;  %v4870_v29 = vmul.f32 0.03125, %v4868_v12 }
0x31b0   :  { %v4872_v35 = vadd.f32 1e-12, %v4870_v29 }
0x31b2   :  { %6906 = vrsqrt.f32 %v4872_v35 }
0x31b8   :  { %v6905_v19 = vpop.eup %6904 }
0x31b9   :  { %v4875_v52 = vmul.f32 %v6905_v19, %v4859_v63 }
0x31bb   :  { %v4881_v43 = vmul.f32 %v5871_v8, %v4875_v52 }
0x31bc   :  { %v6907_v34 = vpop.eup %6906 }
0x31bd   :  { %v4876_v54 = vmul.f32 %v6907_v34, %v4860_v4  ;;  %v8114_v2 = vadd.f32 %v5872_v0, %v4881_v43 }
0x31bf   :  { %v4882_v60 = vmul.f32 %v5871_v8, %v4876_v54 }
0x31c1   :  { %v8116_v45 = vadd.f32 %v5872_v0, %v4882_v60 }
0x31c3   :  { %v4889_v16 = vpack.c.bf16 %v8116_v45, %v8114_v2 }
0x31c5   :  { %6456 = vmatmul.mubr.msk.bf16.vlgmr.msra.gmra.mrb[72].mxu0 %vm8400_vm11, %v4889_v16  ;;  %6464 = vmatmul.mubr.msk.bf16.vlgmr.msra.gmra.mrb[108].mxu1 %vm8401_vm9, %v4889_v16  ;;  %vm8410_vm11 = vmmov %vm8396_vm1 }
0x31c6   :  { %6471 = vmatprep.mubr.msk.bf16.mxu0 %vm8342_vm0, %v7956_v15  ;;  %6479 = vmatprep.mubr.msk.bf16.mxu1 %vm8342_vm0, %v7956_v15 }
0x31c7   :  { %6468 = vmatpush3.bf16.msra.mxu0 %v6738_v36  ;;  %6476 = vmatpush3.bf16.msra.mxu1 %v6739_v37 }
0x31c8   :  { %6469 = vmatprep.subr.bf16.mxu0 %v7956_v15  ;;  %6477 = vmatprep.subr.bf16.mxu1 %v7956_v15 }
0x31cb   :  { %6470 = vmatpush3.bf16.msra.mxu0 %v6740_v46  ;;  %6478 = vmatpush3.bf16.msra.mxu1 %v6741_v38 }
0x31cc   :  { %6483 = vmatprep.subr.bf16.mxu0 %v7956_v15  ;;  %6491 = vmatprep.subr.bf16.mxu1 %v7956_v15 }
0x3298   :  { %v4948_v28 = vpop.f32.mrb[72].mxu0  ;;  %v5010_v13 = vpop.f32.mrb[108].mxu1 }
0x3299   :  { %v8148_v18 = vadd.f32 %v5873_v50, %v4948_v28  ;;  %v8150_v9 = vadd.f32 %v5877_v40, %v5010_v13  ;;  %v6457_v33 = vpop.f32.mrb[73].mxu0  ;;  %v6465_v30 = vpop.f32.mrb[109].mxu1 }
0x329a   :  { %v4951_v20 = vpop.f32.mrb[74].mxu0  ;;  %v5013_v55 = vpop.f32.mrb[110].mxu1 }
0x329b   :  { %v8153_v42 = vmul.f32 0.70710677, %v8148_v18  ;;  %v8156_v26 = vmul.f32 0.70710677, %v8150_v9  ;;  %v8158_v3 = vadd.f32 %v5873_v50, %v4951_v20  ;;  %v8160_v23 = vadd.f32 %v5877_v40, %v5013_v55  ;;  %v6458_v1 = vpop.f32.mrb[75].mxu0  ;;  %v6466_v47 = vpop.f32.mrb[111].mxu1 }
0x329d   :  { %v5025_v49 = vand.u32 2147483647, %v8153_v42  ;;  %v5082_v24 = vand.u32 2147483647, %v8156_v26  ;;  %v8165_v5 = vmul.f32 0.70710677, %v8158_v3 }
0x329e   :  { %v8169_v56 = vmul.f32 0.70710677, %v8160_v23  ;;  %vm5021_vm13 = vcmp.ge.f32.partialorder %v8153_v42, 0.0  ;;  %vm5078_vm14 = vcmp.ge.f32.partialorder %v8156_v26, 0.0 }
0x329f   :  { %v5027_v22 = vmul.f32 0.3275911, %v5025_v49  ;;  %v5084_v48 = vmul.f32 0.3275911, %v5082_v24  ;;  %v5026_v44 = vand.u32 2147483647, %v8165_v5 }
0x32a0   :  { %v5083_v63 = vand.u32 2147483647, %v8169_v56  ;;  %v5051_v32 = vsub.f32 0.0, %v5025_v49  ;;  %v5108_v4 = vsub.f32 0.0, %v5082_v24  ;;  %vm5022_vm5 = vcmp.ge.f32.partialorder %v8165_v5, 0.0 }
0x32a1   :  { %v5029_v14 = vadd.f32 1.0, %v5027_v22  ;;  %v5086_v57 = vadd.f32 1.0, %v5084_v48  ;;  %v5028_v58 = vmul.f32 0.3275911, %v5026_v44  ;;  %v5052_v7 = vsub.f32 0.0, %v5026_v44 }
0x32a2   :  { %v5085_v53 = vmul.f32 0.3275911, %v5083_v63  ;;  %v5053_v59 = vmul.f32 %v5051_v32, %v5025_v49  ;;  %v5110_v10 = vmul.f32 %v5108_v4, %v5082_v24  ;;  %v5109_v6 = vsub.f32 0.0, %v5083_v63 }
0x32a3   :  { %6908 = vrcp.f32 %v5029_v14  ;;  %v5030_v21 = vadd.f32 1.0, %v5028_v58  ;;  %v5054_v35 = vmul.f32 %v5052_v7, %v5026_v44  ;;  %v5080_v42 = vsel %vm5078_vm14, 1.0, %v6998_v31  ;;  %vm8412_vm14 = vmmov %vm8396_vm1 }
0x32a4   :  { %6910 = vrcp.f32 %v5086_v57  ;;  %v5087_v61 = vadd.f32 1.0, %v5085_v53  ;;  %v5055_v12 = vmul.f32 1.442695, %v5053_v59  ;;  %v5112_v52 = vmul.f32 1.442695, %v5110_v10 }
0x32a5   :  { %6912 = vrcp.f32 %v5030_v21  ;;  %v5111_v60 = vmul.f32 %v5109_v6, %v5083_v63  ;;  %v5057_v36 = vmul.f32 1.442695, %v5054_v35  ;;  %vm5079_vm15 = vcmp.ge.f32.partialorder %v8169_v56, 0.0 }
0x32a6   :  { %6914 = vrcp.f32 %v5087_v61 }
0x32a7   :  { %6916 = vpow2.f32 %v5055_v12  ;;  %v5114_v33 = vmul.f32 1.442695, %v5111_v60 }
0x32a8   :  { %6918 = vpow2.f32 %v5112_v52  ;;  %v5024_v52 = vsel %vm5022_vm5, 1.0, %v6998_v31  ;;  %vm8413_vm5 = vmmov %vm8396_vm1 }
0x32a9   :  { %6920 = vpow2.f32 %v5057_v36 }
0x32aa   :  { %6922 = vpow2.f32 %v5114_v33 }
0x32ad   :  { %v6909_v27 = vpop.eup %6908 }
0x32ae   :  { %v6911_v62 = vpop.eup %6910  ;;  %v5033_v25 = vmul.f32 1.0614054, %v6909_v27 }
0x32af   :  { %v5090_v11 = vmul.f32 1.0614054, %v6911_v62  ;;  %v6913_v17 = vpop.eup %6912 }
0x32b0   :  { %v5035_v51 = vadd.f32 -1.4531521, %v5033_v25  ;;  %v5034_v8 = vmul.f32 1.0614054, %v6913_v17  ;;  %v6915_v43 = vpop.eup %6914 }
0x32b1   :  { %v5092_v29 = vadd.f32 -1.4531521, %v5090_v11  ;;  %v5091_v37 = vmul.f32 1.0614054, %v6915_v43  ;;  %v6917_v58 = vpop.eup %6916  ;;  %v5023_v11 = vsel %vm5021_vm13, 1.0, %v6998_v31  ;;  %vm8411_vm13 = vmmov %vm8396_vm1 }
0x32b2   :  { %v5037_v19 = vmul.f32 %v6909_v27, %v5035_v51  ;;  %v5036_v0 = vadd.f32 -1.4531521, %v5034_v8  ;;  %v6919_v53 = vpop.eup %6918 }
0x32b3   :  { %v5094_v34 = vmul.f32 %v6911_v62, %v5092_v29  ;;  %v5093_v40 = vadd.f32 -1.4531521, %v5091_v37  ;;  %v6921_v10 = vpop.eup %6920 }
0x32b4   :  { %v5039_v54 = vadd.f32 1.4214138, %v5037_v19  ;;  %v5038_v38 = vmul.f32 %v6913_v17, %v5036_v0  ;;  %v6923_v29 = vpop.eup %6922  ;;  %v5018_v0 = vmul.f32 0.5, %v8158_v3 }
0x32b5   :  { %v5096_v16 = vadd.f32 1.4214138, %v5094_v34  ;;  %v5095_v20 = vmul.f32 %v6915_v43, %v5093_v40 }
0x32b6   :  { %v5041_v46 = vmul.f32 %v6909_v27, %v5039_v54  ;;  %v5040_v13 = vadd.f32 1.4214138, %v5038_v38  ;;  %v5017_v54 = vmul.f32 0.5, %v8148_v18  ;;  %v5075_v38 = vmul.f32 0.5, %v8160_v23  ;;  %v5887_v23 = vld [vmem:[%s8319_s2 + $0x1c] ss:$0 sm:$0xff] }
0x32b7   :  { %v5098_v50 = vmul.f32 %v6911_v62, %v5096_v16  ;;  %v5097_v49 = vadd.f32 1.4214138, %v5095_v20 }
0x32b8   :  { %v5043_v28 = vadd.f32 -0.28449672, %v5041_v46  ;;  %v5042_v1 = vmul.f32 %v6913_v17, %v5040_v13  ;;  %v5074_v46 = vmul.f32 0.5, %v8150_v9 }
0x32b9   :  { %v5100_v30 = vadd.f32 -0.28449672, %v5098_v50  ;;  %v5099_v44 = vmul.f32 %v6915_v43, %v5097_v49 }
0x32ba   :  { %v5045_v55 = vmul.f32 %v6909_v27, %v5043_v28  ;;  %v5044_v22 = vadd.f32 -0.28449672, %v5042_v1 }
0x32bb   :  { %v5102_v47 = vmul.f32 %v6911_v62, %v5100_v30  ;;  %v5101_v63 = vadd.f32 -0.28449672, %v5099_v44 }
0x32bc   :  { %v5047_v24 = vadd.f32 0.2548296, %v5045_v55  ;;  %v5046_v57 = vmul.f32 %v6913_v17, %v5044_v22 }
0x32bd   :  { %v5104_v48 = vadd.f32 0.2548296, %v5102_v47  ;;  %v5103_v59 = vmul.f32 %v6915_v43, %v5101_v63 }
0x32be   :  { %v5049_v14 = vmul.f32 %v6909_v27, %v5047_v24  ;;  %v5048_v32 = vadd.f32 0.2548296, %v5046_v57 }
0x32bf   :  { %v5106_v21 = vmul.f32 %v6911_v62, %v5104_v48  ;;  %v5105_v27 = vadd.f32 0.2548296, %v5103_v59 }
0x32c0   :  { %v5059_v61 = vmul.f32 %v6917_v58, %v5049_v14  ;;  %v5050_v25 = vmul.f32 %v6913_v17, %v5048_v32 }
0x32c1   :  { %v5116_v4 = vmul.f32 %v6919_v53, %v5106_v21  ;;  %v5107_v12 = vmul.f32 %v6915_v43, %v5105_v27  ;;  %v5081_v43 = vsel %vm5079_vm15, 1.0, %v6998_v31  ;;  %vm8414_vm15 = vmmov %vm8396_vm1 }
0x32c2   :  { %v5061_v7 = vsub.f32 1.0, %v5059_v61  ;;  %v5060_v62 = vmul.f32 %v6921_v10, %v5050_v25  ;;  %v6743_v25 = vld [vmem:[%s8320_s3 + $0x150] sm:$0xff]   ;;  %v5581_v10 = vld [vmem:[%s8317_s0 + $0x8] sm:$0xff] }
0x32c3   :  { %v5118_v51 = vsub.f32 1.0, %v5116_v4  ;;  %v5117_v17 = vmul.f32 %v6923_v29, %v5107_v12 }
0x32c4   :  { %v5063_v6 = vmul.f32 %v5061_v7, %v5023_v11  ;;  %v5062_v35 = vsub.f32 1.0, %v5060_v62  ;;  %v7001_v11 = vmov 5  }
0x32c5   :  { %v5120_v19 = vmul.f32 %v5118_v51, %v5080_v42  ;;  %v5119_v26 = vsub.f32 1.0, %v5117_v17  ;;  %6655 = vset.pattern.permute.xlu1 %v7001_v11  ;;  %v5583_v51 = vcvt.s32.f32 %v5581_v10  ;;  %6654 = vset.pattern.permute.xlu0 %v7001_v11  ;;  %v5889_v17 = vld [vmem:[%s8319_s2 + $0x1e] ss:$0 sm:$0xff] }
0x32c6   :  { %v5065_v8 = vadd.f32 1.0, %v5063_v6  ;;  %v5064_v34 = vmul.f32 %v5062_v35, %v5024_v52 }
0x32c7   :  { %v5122_v60 = vadd.f32 1.0, %v5120_v19  ;;  %v5121_v16 = vmul.f32 %v5119_v26, %v5081_v43  ;;  %v5888_v19 = vld [vmem:[%s8319_s2 + $0x1d] ss:$0 sm:$0xff] }
0x32c8   :  { %v5066_v5 = vadd.f32 1.0, %v5064_v34  ;;  %v5067_v36 = vmul.f32 %v5065_v8, %v5017_v54  ;;  %v6744_v43 = vld [vmem:[%s8320_s3 + $0x158] sm:$0xff]  }
0x32c9   :  { %v5123_v56 = vadd.f32 1.0, %v5121_v16  ;;  %v5124_v40 = vmul.f32 %v5122_v60, %v5074_v46  ;;  %v6745_v16 = vld [vmem:[%s8320_s3 + $0x160] sm:$0xff]  }
0x32ca   :  { %v5068_v37 = vmul.f32 %v5066_v5, %v5018_v0 }
0x32cb   :  { %v5125_v28 = vmul.f32 %v5123_v56, %v5075_v38 }
0x32cc   :  { %v5069_v50 = vpack.c.bf16 %v5068_v37, %v5067_v36  ;;  %v5890_v36 = vld [vmem:[%s8319_s2 + $0x3] ss:$0 sm:$0xff] }
0x32cd   :  { %v5126_v18 = vpack.c.bf16 %v5125_v28, %v5124_v40 }
0x32ce   :  { %6480 = vmatmul.mubr.msk.bf16.vlgmr.msra.gmra.mrb[112].mxu1 %vm8402_vm12, %v5069_v50  ;;  %vm8415_vm12 = vmmov %vm8396_vm1 }
0x32cf   :  { %6495 = vmatprep.mubr.msk.bf16.mxu1 %vm8342_vm0, %v7956_v15  ;;  %6472 = vmatmul.mubr.msk.bf16.vlgmr.msra.gmra.mrb[76].mxu0 %vm8403_vm2, %v5126_v18 }
0x32d0   :  { %6487 = vmatprep.mubr.msk.bf16.mxu0 %vm8342_vm0, %v7956_v15 }
0x33a1   :  { %v5236_v3 = vpop.f32.mrb[112].mxu1 }
0x33a2   :  { %v6481_v13 = vpop.f32.mrb[113].mxu1  ;;  %v5180_v33 = vpop.f32.mrb[76].mxu0 }
0x33a3   :  { %v5239_v9 = vpop.f32.mrb[114].mxu1  ;;  %v5237_v20 = vadd.f32 %v5236_v3, %v5180_v33  ;;  %v6473_v55 = vpop.f32.mrb[77].mxu0 }
0x33a4   :  { %v6482_v30 = vpop.f32.mrb[115].mxu1  ;;  %v5183_v1 = vpop.f32.mrb[78].mxu0 }
0x33a5   :  { %v5248_v47 = vadd.f32 %v5887_v23, %v5237_v20  ;;  %v5240_v49 = vadd.f32 %v5239_v9, %v5183_v1  ;;  %v6474_v24 = vpop.f32.mrb[79].mxu0 }
0x33a7   :  { %v5249_v22 = vadd.f32 %v5887_v23, %v5240_v49  ;;  %v5250_v48 = vadd.f32 %v5248_v47, %v8114_v2 }
0x33a9   :  { %v5254_v44 = vsel %vm8404_vm7, %v5250_v48, 0.0  ;;  %v5251_v14 = vadd.f32 %v5249_v22, %v8116_v45  ;;  %v6742_v45 = vld [vmem:[%s8320_s3 + $0x148] sm:$0xff]  }
0x33aa   :  { %5255 = vadd.xlane.f32.xlu1 %v5254_v44  ;;  %6484 = vmatpush3.bf16.msra.mxu0 %v6742_v45 }
0x33ab   :  { %v5257_v57 = vsel %vm8405_vm6, %v5251_v14, 0.0  ;;  %6485 = vmatprep.subr.bf16.mxu0 %v7956_v15 }
0x33ac   :  { %5258 = vadd.xlane.f32.xlu0 %v5257_v57 }
0x33ae   :  { %6486 = vmatpush3.bf16.msra.mxu0 %v6743_v25 }
0x33af   :  { %6499 = vmatprep.subr.bf16.mxu0 %v7956_v15 }
0x33bb   :  { %5591 = vperm.xlu1 %6655, %v5583_v51  }
0x3437   :  { %v5256_v58 = vpop.xlane.xlu1 %5255 }
0x3438   :  { %v5260_v21 = vmul.f32 0.03125, %v5256_v58 }
0x3439   :  { %v5259_v63 = vpop.xlane.xlu0 %5258 }
0x343a   :  { %v5262_v53 = vsub.f32 %v5250_v48, %v5260_v21  ;;  %v5261_v61 = vmul.f32 0.03125, %v5259_v63 }
0x343c   :  { %v5263_v32 = vsub.f32 %v5251_v14, %v5261_v61  ;;  %v5264_v4 = vmul.f32 %v5262_v53, %v5262_v53 }
0x343e   :  { %v5266_v59 = vsel %vm8406_vm8, %v5264_v4, 0.0  ;;  %v5265_v7 = vmul.f32 %v5263_v32, %v5263_v32 }
0x343f   :  { %5267 = vadd.xlane.f32.xlu0 %v5266_v59 }
0x3440   :  { %v5269_v2 = vsel %vm8396_vm1, %v5265_v7, 0.0 }
0x3443   :  { %5270 = vadd.xlane.f32.xlu0 %v5269_v2 }
0x34cc   :  { %v5268_v27 = vpop.xlane.xlu0 %5267 }
0x34cd   :  { %v5272_v6 = vmul.f32 0.03125, %v5268_v27 }
0x34cf   :  { %v5274_v62 = vadd.f32 1e-12, %v5272_v6 }
0x34d0   :  { %v5271_v12 = vpop.xlane.xlu0 %5270 }
0x34d1   :  { %6924 = vrsqrt.f32 %v5274_v62  ;;  %v5273_v29 = vmul.f32 0.03125, %v5271_v12 }
0x34d3   :  { %v5275_v42 = vadd.f32 1e-12, %v5273_v29 }
0x34d5   :  { %6926 = vrsqrt.f32 %v5275_v42 }
0x34db   :  { %v6925_v35 = vpop.eup %6924 }
0x34dc   :  { %v5278_v52 = vmul.f32 %v6925_v35, %v5262_v53 }
0x34de   :  { %v5284_v8 = vmul.f32 %v5888_v19, %v5278_v52 }
0x34df   :  { %v6927_v34 = vpop.eup %6926 }
0x34e0   :  { %v5279_v26 = vmul.f32 %v6927_v34, %v5263_v32  ;;  %v5290_v54 = vadd.f32 %v5889_v17, %v5284_v8 }
0x34e2   :  { %v5285_v0 = vmul.f32 %v5888_v19, %v5279_v26  ;;  %5598 = vst.msk [vmem:[%s8324_s7] sm:$0xff] %vm8407_vm3, %v5290_v54 }
0x34e4   :  { %v5291_v5 = vadd.f32 %v5889_v17, %v5285_v0 }
0x34e6   :  { %v5292_v60 = vpack.c.bf16 %v5291_v5, %v5290_v54  ;;  %5599 = vst.msk [vmem:[%s8324_s7 + $0x8] sm:$0xff] %vm8408_vm4, %v5291_v5 }
0x34e8   :  { %6488 = vmatmul.mubr.msk.bf16.vlgmr.msra.gmra.mrb[80].mxu0 %vm8409_vm10, %v5292_v60 }
0x34e9   :  { %6500 = vmatpush3.bf16.msra.mxu0 %v6744_v43  ;;  %6503 = vmatprep.mubr.msk.bf16.mxu0 %vm8342_vm0, %v7956_v15 }
0x34ea   :  { %6501 = vmatprep.subr.bf16.mxu0 %v7956_v15 }
0x34ed   :  { %6502 = vmatpush3.bf16.msra.mxu0 %v6745_v16 }
0x34f0   :  { %6504 = vmatmul.mubr.msk.bf16.vlgmr.msra.gmra.mrb[84].mxu0 %vm8410_vm11, %v5292_v60 }
0x35bb   :  { %v5351_v37 = vpop.f32.mrb[80].mxu0 }
0x35bc   :  { %v5352_v46 = vadd.f32 %v5890_v36, %v5351_v37  ;;  %v6489_v38 = vpop.f32.mrb[81].mxu0 }
0x35bd   :  { %v5354_v56 = vpop.f32.mrb[82].mxu0 }
0x35be   :  { %v5360_v50 = vmul.f32 0.70710677, %v5352_v46  ;;  %v5355_v40 = vadd.f32 %v5890_v36, %v5354_v56  ;;  %v6490_v28 = vpop.f32.mrb[83].mxu0  ;;  %v5358_v26 = vmul.f32 0.5, %v5352_v46 }
0x35c0   :  { %v5366_v18 = vand.u32 2147483647, %v5360_v50  ;;  %v5361_v3 = vmul.f32 0.70710677, %v5355_v40  ;;  %vm5362_vm0 = vcmp.ge.f32.partialorder %v5360_v50, 0.0  ;;  %v5359_v60 = vmul.f32 0.5, %v5355_v40 }
0x35c1   :  { %v5364_v52 = vsel %vm5362_vm0, 1.0, %v6998_v31 }
0x35c2   :  { %v5368_v13 = vmul.f32 0.3275911, %v5366_v18  ;;  %v5367_v9 = vand.u32 2147483647, %v5361_v3  ;;  %v5392_v49 = vsub.f32 0.0, %v5366_v18  ;;  %vm5363_vm9 = vcmp.ge.f32.partialorder %v5361_v3, 0.0 }
0x35c3   :  { %v8238_v33 = vpop.f32.mrb[84].mxu0  ;;  %v5365_v54 = vsel %vm5363_vm9, 1.0, %v6998_v31 }
0x35c4   :  { %v5370_v23 = vadd.f32 1.0, %v5368_v13  ;;  %v5369_v30 = vmul.f32 0.3275911, %v5367_v9  ;;  %v6505_v20 = vpop.f32.mrb[85].mxu0  ;;  %v5393_v24 = vsub.f32 0.0, %v5367_v9  ;;  %v5394_v48 = vmul.f32 %v5392_v49, %v5366_v18 }
0x35c5   :  { %v8240_v55 = vpop.f32.mrb[86].mxu0  ;;  %v6746_v20 = vld [vmem:[%s8321_s4] sm:$0xff]  }
0x35c6   :  { %6928 = vrcp.f32 %v5370_v23  ;;  %v5371_v1 = vadd.f32 1.0, %v5369_v30  ;;  %v6506_v47 = vpop.f32.mrb[87].mxu0  ;;  %v5395_v57 = vmul.f32 %v5393_v24, %v5367_v9  ;;  %v5396_v21 = vmul.f32 1.442695, %v5394_v48  ;;  %v5580_v23 = vld [vmem:[%s8317_s0] sm:$0xff]  ;;  %6492 = vmatpush3.bf16.msra.mxu1 %v6746_v20 }
0x35c7   :  { %v5582_v30 = vcvt.s32.f32 %v5580_v23  ;;  %6493 = vmatprep.subr.bf16.mxu1 %v7956_v15  ;;  %v5592_v15 = vpop.permute.xlu1 %5591 }
0x35c8   :  { %6930 = vrcp.f32 %v5371_v1  ;;  %v5398_v32 = vmul.f32 1.442695, %v5395_v57  ;;  %v6747_v1 = vld [vmem:[%s8321_s4 + $0x8] sm:$0xff]   ;;  %s7002_s4 = smov 32  }
0x35c9   :  { %6932 = vpow2.f32 %v5396_v21 }
0x35ca   :  { %6934 = vpow2.f32 %v5398_v32  ;;  %6494 = vmatpush3.bf16.msra.mxu1 %v6747_v1 }
0x35d0   :  { %v6929_v22 = vpop.eup %6928 }
0x35d1   :  { %v5374_v44 = vmul.f32 1.0614054, %v6929_v22 }
0x35d2   :  { %v6931_v14 = vpop.eup %6930 }
0x35d3   :  { %v5376_v58 = vadd.f32 -1.4531521, %v5374_v44  ;;  %v5375_v63 = vmul.f32 1.0614054, %v6931_v14  ;;  %v6933_v62 = vpop.eup %6932 }
0x35d4   :  { %v6935_v35 = vpop.eup %6934 }
0x35d5   :  { %v5378_v53 = vmul.f32 %v6929_v22, %v5376_v58  ;;  %v5377_v61 = vadd.f32 -1.4531521, %v5375_v63 }
0x35d7   :  { %v5380_v4 = vadd.f32 1.4214138, %v5378_v53  ;;  %v5379_v59 = vmul.f32 %v6931_v14, %v5377_v61 }
0x35d9   :  { %v5382_v7 = vmul.f32 %v6929_v22, %v5380_v4  ;;  %v5381_v2 = vadd.f32 1.4214138, %v5379_v59  ;;  %v5894_v4 = vld [vmem:[%s8319_s2 + $0x4] ss:$0 sm:$0xff] }
0x35db   :  { %v5384_v45 = vadd.f32 -0.28449672, %v5382_v7  ;;  %v5383_v25 = vmul.f32 %v6931_v14, %v5381_v2 }
0x35dd   :  { %v5386_v10 = vmul.f32 %v6929_v22, %v5384_v45  ;;  %v5385_v11 = vadd.f32 -0.28449672, %v5383_v25 }
0x35df   :  { %v5388_v51 = vadd.f32 0.2548296, %v5386_v10  ;;  %v5387_v27 = vmul.f32 %v6931_v14, %v5385_v11 }
0x35e1   :  { %v5390_v6 = vmul.f32 %v6929_v22, %v5388_v51  ;;  %v5389_v12 = vadd.f32 0.2548296, %v5387_v27 }
0x35e3   :  { %v5400_v29 = vmul.f32 %v6933_v62, %v5390_v6  ;;  %v5391_v42 = vmul.f32 %v6931_v14, %v5389_v12  ;;  %v5900_v14 = vld [vmem:[%s8319_s2 + $0x6] ss:$0 sm:$0xff] }
0x35e4   :  { %v5574_v57 = vadd.f32 %v5900_v14, %v8238_v33  ;;  %v5577_v21 = vadd.f32 %v5900_v14, %v8240_v55  ;;  %v5895_v33 = vld [vmem:[%s8319_s2 + $0x5] ss:$0 sm:$0xff] }
0x35e5   :  { %v5402_v19 = vsub.f32 1.0, %v5400_v29  ;;  %v5401_v17 = vmul.f32 %v6935_v35, %v5391_v42 }
0x35e6   :  { %v5595_v32 = vmul.f32 %v5592_v15, %v5577_v21 }
0x35e7   :  { %v5404_v8 = vmul.f32 %v5402_v19, %v5364_v52  ;;  %v5403_v34 = vsub.f32 1.0, %v5401_v17 }
0x35e9   :  { %v5406_v0 = vadd.f32 1.0, %v5404_v8  ;;  %v5405_v5 = vmul.f32 %v5403_v34, %v5365_v54 }
0x35eb   :  { %v5408_v43 = vmul.f32 %v5406_v0, %v5358_v26  ;;  %v5407_v16 = vadd.f32 1.0, %v5405_v5 }
0x35ed   :  { %v5412_v36 = vsel %vm8411_vm13, %v5408_v43, 0.0  ;;  %v5409_v37 = vmul.f32 %v5407_v16, %v5359_v60 }
0x35ee   :  { %5413 = vadd.xlane.f32.xlu0 %v5412_v36 }
0x35ef   :  { %v5415_v38 = vsel %vm8412_vm14, %v5409_v37, 0.0 }
0x35f2   :  { %5416 = vadd.xlane.f32.xlu0 %v5415_v38 }
0x367b   :  { %v5414_v56 = vpop.xlane.xlu0 %5413 }
0x367c   :  { %v5418_v50 = vmul.f32 0.03125, %v5414_v56 }
0x367e   :  { %v5420_v28 = vsub.f32 %v5408_v43, %v5418_v50 }
0x367f   :  { %v5417_v18 = vpop.xlane.xlu0 %5416 }
0x3680   :  { %v5419_v3 = vmul.f32 0.03125, %v5417_v18  ;;  %v5422_v46 = vmul.f32 %v5420_v28, %v5420_v28 }
0x3682   :  { %v5421_v13 = vsub.f32 %v5409_v37, %v5419_v3  ;;  %v5424_v31 = vsel %vm8413_vm5, %v5422_v46, 0.0 }
0x3683   :  { %5425 = vadd.xlane.f32.xlu0 %v5424_v31 }
0x3684   :  { %v5423_v9 = vmul.f32 %v5421_v13, %v5421_v13 }
0x3686   :  { %v5427_v40 = vsel %vm8414_vm15, %v5423_v9, 0.0 }
0x3687   :  { %5428 = vadd.xlane.f32.xlu0 %v5427_v40 }
0x369d   :  { %5586 = vperm.xlu0 %6654, %v5582_v30  }
0x3710   :  { %v5426_v47 = vpop.xlane.xlu0 %5425 }
0x3711   :  { %v5430_v49 = vmul.f32 0.03125, %v5426_v47 }
0x3713   :  { %v5432_v24 = vadd.f32 1e-12, %v5430_v49 }
0x3714   :  { %v5429_v22 = vpop.xlane.xlu0 %5428 }
0x3715   :  { %6936 = vrsqrt.f32 %v5432_v24  ;;  %v5431_v48 = vmul.f32 0.03125, %v5429_v22 }
0x3717   :  { %v5433_v44 = vadd.f32 1e-12, %v5431_v48 }
0x3719   :  { %6938 = vrsqrt.f32 %v5433_v44 }
0x371c   :  { %v5587_v58 = vpop.permute.xlu0 %5586 }
0x371d   :  { %v5594_v63 = vmul.f32 %v5587_v58, %v5574_v57 }
0x371f   :  { %v6937_v53 = vpop.eup %6936  ;;  %5602 = vrot.lane.b32.xlu1 %v5594_v63, %s7002_s4 }
0x3720   :  { %v5436_v61 = vmul.f32 %v6937_v53, %v5420_v28 }
0x3722   :  { %v5442_v7 = vmul.f32 %v5894_v4, %v5436_v61 }
0x3723   :  { %v6939_v59 = vpop.eup %6938  ;;  %5604 = vrot.lane.b32.xlu1 %v5595_v32, %s7002_s4 }
0x3724   :  { %v5437_v2 = vmul.f32 %v6939_v59, %v5421_v13  ;;  %v5448_v45 = vadd.f32 %v5895_v33, %v5442_v7 }
0x3726   :  { %v5443_v55 = vmul.f32 %v5894_v4, %v5437_v2 }
0x3728   :  { %v5449_v25 = vadd.f32 %v5895_v33, %v5443_v55 }
0x372a   :  { %v5450_v10 = vpack.c.bf16 %v5449_v25, %v5448_v45 }
0x372c   :  { %6496 = vmatmul.mubr.msk.bf16.vlgmr.msra.gmra.mrb[116].mxu1 %vm8415_vm12, %v5450_v10 }
0x372d   :  { %6954 = shalt.err (!%p6951_p4)
}
0x372e   :  { %s6955_s16 = scalar_lea.hbm %s8322_s5, 256 }
0x372f   :  { %p6956_p5 = scmp.ne.s32.totalorder %s8322_s5, %s6955_s16  ;;  %p6959_p6 = scmp.lt.u32.totalorder %s6955_s16, %s8322_s5 }
0x3731   :  { %p6961_p7 = pnand %p6959_p6, %p6956_p5 }
0x3733   :  { %6964 = shalt.err (!%p6961_p7)
}
0x3734   :  { %s7004_s21 = smov 128   ;;  %s7005_s22 = smov 8   ;;  %vm5608_vm2 = vcmask 523520   ;;  %vm5611_vm7 = vcmask 531968   ;;  %v5896_v27 = vld [vmem:[%s8319_s2] ss:$0 sm:$0xff] }
0x3735   :  { %5625 = dma.vmem_to_hbm [thread:$0]  %s5620_s12, 256, %s8322_s5, [#allocation3], %s7004_s21, %s7004_s21, %s7005_s22  }
0x3736   :  { %s7006_s8 = smov [#allocation4]  }
0x3737   :  { %s5631_s9 = sshll.u32 %s7006_s8, 4  ;;  %s5632_s9 = int_to_ptr.vmem [resolvable:$true] %s5631_s9 }
0x3738   :  { %s6965_s10 = scalar_lea.vmem %s5632_s9, 256  ;;  %p6970_p9 = scmp.lt.s32.totalorder %s5632_s9, %s5632_s9 }
0x3739   :  { %p6966_p8 = scmp.ne.s32.totalorder %s5632_s9, %s6965_s10  ;;  %p6971_p10 = scmp.lt.s32.totalorder %s6965_s10, %s6965_s10 }
0x373b   :  { %p6972_p11 = por %p6971_p10, %p6970_p9 }
0x373d   :  { %p6973_p12 = pnand %p6972_p11, %p6966_p8 }
0x3791   :  { %v5603_v11 = vpop.permute.xlu1 %5602 }
0x3792   :  { %5609 = vst.msk [vmem:[%s8324_s7] sm:$0xff] %vm5608_vm2, %v5603_v11 }
0x3793   :  { %5612 = vst.msk [vmem:[%s8324_s7] sm:$0xff] %vm5611_vm7, %v7701_v41 }
0x3795   :  { %v5605_v51 = vpop.permute.xlu1 %5604 }
0x3796   :  { %5610 = vst.msk [vmem:[%s8324_s7 + $0x8] sm:$0xff] %vm5608_vm2, %v5605_v51 }
0x3797   :  { %5613 = vst.msk [vmem:[%s8324_s7 + $0x8] sm:$0xff] %vm5611_vm7, %v7704_v39 }
0x37ff   :  { %v5509_v6 = vpop.f32.mrb[116].mxu1 }
0x3800   :  { %v5510_v62 = vadd.f32 %v5896_v27, %v5509_v6  ;;  %v6497_v12 = vpop.f32.mrb[117].mxu1 }
0x3801   :  { %v5512_v41 = vpop.f32.mrb[118].mxu1 }
0x3802   :  { %5516 = vst [vmem:[#allocation4] sm:$0xff] %v5510_v62  ;;  %v5513_v29 = vadd.f32 %v5896_v27, %v5512_v41  ;;  %v6498_v42 = vpop.f32.mrb[119].mxu1 }
0x3804   :  { %5517 = vst [vmem:[#allocation4 + $0x8] sm:$0xff] %v5513_v29 }
0x3805   :  { %6976 = shalt.err (!%p6973_p12)
}
0x3806   :  { %s6977_s11 = scalar_lea.hbm %s8323_s6, 256 }
0x3807   :  { %p6978_p13 = scmp.ne.s32.totalorder %s8323_s6, %s6977_s11  ;;  %p6981_p0 = scmp.lt.u32.totalorder %s6977_s11, %s8323_s6 }
0x3809   :  { %p6983_p1 = pnand %p6981_p0, %p6978_p13 }
0x380b   :  { %6986 = shalt.err (!%p6983_p1)
}
0x380c   :  { %5637 = dma.vmem_to_hbm [thread:$0]  %s5632_s9, 256, %s8323_s6, [#allocation5], %s7004_s21, %s7004_s21, %s7005_s22  }
0x380d   :  { %6987 = dma.done.wait [#allocation3], 256  }
0x380e   :  { %6988 = vsyncadd [#allocation3], 4294967040 }
0x380f   :  { %6989 = dma.done.wait [#allocation5], 256  }
0x3810   :  { %6990 = vsyncadd [#allocation5], 4294967040 }
0x3811   :  { %5648 = vsyncpa [#allocation3], 1 }
0x3812   :  { %5649 = vsyncpa [#allocation5], 1 }

</bundles_post_ra>
